<compile_context>
chip_gen: v6e
topology: v6e:2x2x1
jax: 0.10.0
libtpu: 0.0.40
codegen_flags: <defaults>
</compile_context>

<pallas_src>
import numpy as np
import jax
import jax.numpy as jnp
from jax import lax
from jax.experimental import pallas as pl
from jax.experimental.pallas import tpu as pltpu

# ---- synthetic "config" (the PyTorch module pulls these from a checkpoint) ----
USER_LEN = 5            # self.user_len
IDNUM = 4               # config.idnum
BASE_VOCAB = 120
VOCAB = BASE_VOCAB + 8  # resize_token_embeddings(+8) -> 128 (lane-aligned)
EMSIZE = 64             # hidden size
N_HEADS = 4
HEAD_DIM = EMSIZE // N_HEADS
INTER = 128             # MLP intermediate size
N_LAYERS = 2
IGNORE = -100
RMS_EPS = 1e-6
NEG = -1e9


# ----------------------------- Pallas kernel ---------------------------------
def _rmsnorm(h, w):
    # h: (M, E), w: (1, E)
    var = jnp.mean(h * h, axis=-1, keepdims=True)
    return h * lax.rsqrt(var + RMS_EPS) * w


def prefer_llama_kernel(x_ref, qb_ref, kc_ref, lab_ref, cos_ref, sin_ref,
                        ln1_ref, wqkv_ref, wo_ref,
                        ln2_ref, wgu_ref, wd_ref,
                        lnf_ref, lmhead_ref,
                        nll_ref, cnt_ref):
    M, E = x_ref.shape                 # M = batch_group * padded_seq
    L = wqkv_ref.shape[0]
    I = wd_ref.shape[1]
    V = lmhead_ref.shape[1]
    H = N_HEADS
    Dh = E // H

    h = x_ref[...]                     # (M, E) f32 residual stream
    cos = cos_ref[...]                 # (M, E) f32
    sin = sin_ref[...]                 # (M, E) f32

    # ---- additive attention bias built in-kernel (no (M,M) HBM->VMEM DMA) ----
    # allow[i, j] = (query i and key j belong to the same sequence, key j not padded,
    #                and j <= i  i.e. causal)   -> 0.0, else NEG.
    r = lax.broadcasted_iota(jnp.int32, (M, M), 0)           # query row index
    c = lax.broadcasted_iota(jnp.int32, (M, M), 1)           # key   col index
    allow = (qb_ref[...] == kc_ref[...]) & (c <= r)          # (M,1)==(1,M) -> (M,M)
    bias = jnp.where(allow, 0.0, NEG).astype(jnp.float32)

    for l in range(L):
        # ----------------- attention block -----------------
        hn = _rmsnorm(h, ln1_ref[l]).astype(jnp.bfloat16)
        # fused [q | q@ROT | k | k@ROT | v] projection (q columns pre-scaled by
        # 1/sqrt(Dh)): (M, E) x (E, 5E) -> f32
        qkv = jnp.dot(hn, wqkv_ref[l], preferred_element_type=jnp.float32)
        # RoPE: rotate-half folded into weights; RoPE pairs are lane-co-resident.
        q = qkv[:, 0 * E:1 * E] * cos + qkv[:, 1 * E:2 * E] * sin
        k = qkv[:, 2 * E:3 * E] * cos + qkv[:, 3 * E:4 * E] * sin
        v = qkv[:, 4 * E:5 * E]
        q = q.astype(jnp.bfloat16)
        k = k.astype(jnp.bfloat16)
        v = v.astype(jnp.bfloat16)

        wo_l = wo_ref[l]                                      # (E, E) bf16
        attn = jnp.zeros((M, E), jnp.float32)
        for hh in range(H):                                   # H=4, batch-vectorized
            sl = slice(hh * Dh, (hh + 1) * Dh)
            sc = lax.dot_general(q[:, sl], k[:, sl], (((1,), (1,)), ((), ())),
                                 preferred_element_type=jnp.float32)
            sc = sc + bias                                    # scale already folded in
            sc = sc - jnp.max(sc, axis=-1, keepdims=True)
            p = jnp.exp(sc)
            p = p * pl.reciprocal(jnp.sum(p, axis=-1, keepdims=True), approx=True)
            ctx = jnp.dot(p.astype(jnp.bfloat16), v[:, sl],
                          preferred_element_type=jnp.float32)  # (M, Dh)
            # accumulate directly through the sublane slice of W_O (no concat)
            attn = attn + jnp.dot(ctx.astype(jnp.bfloat16), wo_l[sl, :],
                                  preferred_element_type=jnp.float32)
        h = h + attn

        # ----------------- MLP (SwiGLU, fused gate|up) -----------------
        hn2 = _rmsnorm(h, ln2_ref[l]).astype(jnp.bfloat16)
        gu = jnp.dot(hn2, wgu_ref[l], preferred_element_type=jnp.float32)  # (M, 2I)
        g = gu[:, :I]
        u = gu[:, I:]
        act = g * pl.reciprocal(1.0 + jnp.exp(-g), approx=True)           # SiLU
        h = h + jnp.dot((act * u).astype(jnp.bfloat16), wd_ref[l],
                        preferred_element_type=jnp.float32)

    # -------- LM head + masked cross-entropy (labels pre-shifted; no one-hot) --------
    hn = _rmsnorm(h, lnf_ref[...]).astype(jnp.bfloat16)
    logits = jnp.dot(hn, lmhead_ref[...], preferred_element_type=jnp.float32)  # (M, V)
    lab = lab_ref[...]                                        # (M, 1) int32, IGNORE=-100
    col = lax.broadcasted_iota(jnp.int32, (M, V), 1)
    picked = jnp.sum(jnp.where(col == lab, logits, 0.0), axis=-1, keepdims=True)
    valid = (lab >= 0).astype(jnp.float32)                    # explicit IGNORE mask
    m = jnp.max(logits, axis=-1, keepdims=True)
    logz = m + jnp.log(jnp.sum(jnp.exp(logits - m), axis=-1, keepdims=True))
    nll = jnp.sum((logz - picked) * valid, keepdims=True)     # (1, 1) group partial
    cnt = jnp.sum(valid, keepdims=True)                       # (1, 1)
    nll_ref[...] = jnp.broadcast_to(nll, nll_ref.shape)       # lane-dense store
    cnt_ref[...] = jnp.broadcast_to(cnt, cnt_ref.shape)


# ------------------------------- glue / wrapper -------------------------------
def rope_tables(seq_len, head_dim, base=10000.0):
    inv_freq = 1.0 / (base ** (jnp.arange(0, head_dim, 2, dtype=jnp.float32)
                               / head_dim))
    t = jnp.arange(seq_len, dtype=jnp.float32)
    freqs = jnp.outer(t, inv_freq)                    # (S, Dh/2)
    emb = jnp.concatenate([freqs, freqs], axis=-1)    # (S, Dh)
    return jnp.cos(emb), jnp.sin(emb)


def build_rot_mat(emsize, head_dim):
    """(E, E) signed permutation P with rotate_half_per_head(x) == x @ P."""
    rot = np.zeros((emsize, emsize), np.float32)
    half = head_dim // 2
    for base in range(0, emsize, head_dim):
        for d in range(half):
            rot[base + d + half, base + d] = -1.0
            rot[base + d, base + d + half] = 1.0
    return jnp.asarray(rot)


def init_params(key):
    ks = jax.random.split(key, 10)

    def nrm(k, shape, s=0.02):
        return (s * jax.random.normal(k, shape)).astype(jnp.float32)

    E, L, I = EMSIZE, N_LAYERS, INTER
    return dict(
        tok_emb=nrm(ks[0], (VOCAB, E)),
        # nn.Embedding(idnum * user_len, emsize).uniform_(-0.1, 0.1)
        user_emb=jax.random.uniform(ks[1], (IDNUM * USER_LEN, E),
                                    jnp.float32, -0.1, 0.1),
        ln1=jnp.ones((L, 1, E), jnp.float32),
        wq=nrm(ks[2], (L, E, E)),
        wk=nrm(ks[3], (L, E, E)),
        wv=nrm(ks[4], (L, E, E)),
        wo=nrm(ks[5], (L, E, E)),
        ln2=jnp.ones((L, 1, E), jnp.float32),
        wg=nrm(ks[6], (L, E, I)),
        wu=nrm(ks[7], (L, E, I)),
        wd=nrm(ks[8], (L, I, E)),
        lnf=jnp.ones((1, E), jnp.float32),
        lm_head=nrm(ks[9], (E, VOCAB)),
    )


def pack_params(params):
    """Fuse [q|q@ROT|k|k@ROT|v] (with 1/sqrt(Dh) folded into q columns) and gate|up;
    cast matmul weights to bf16."""
    rot = build_rot_mat(EMSIZE, HEAD_DIM)
    scale = jnp.float32(1.0 / np.sqrt(HEAD_DIM))
    wq = params["wq"] * scale                  # attention scale folded into Q weights
    wk, wv = params["wk"], params["wv"]
    wqkv = jnp.concatenate([wq, wq @ rot, wk, wk @ rot, wv], axis=-1)   # (L, E, 5E)
    wgu = jnp.concatenate([params["wg"], params["wu"]], axis=-1)        # (L, E, 2I)
    return dict(
        ln1=params["ln1"], ln2=params["ln2"], lnf=params["lnf"],
        wqkv=wqkv.astype(jnp.bfloat16),
        wo=params["wo"].astype(jnp.bfloat16),
        wgu=wgu.astype(jnp.bfloat16),
        wd=params["wd"].astype(jnp.bfloat16),
        lm_head=params["lm_head"].astype(jnp.bfloat16),
    )


def _group_batches(B, S, target_rows=128):
    """Smallest divisor of B such that group_rows >= target (raises MXU M); else B."""
    for gb in range(1, B + 1):
        if B % gb == 0 and gb * S >= target_rows:
            return gb
    return B


def prefer_codellama_forward(params, user_id, input_ids, attention_mask):
    """Training-path forward of PreferCodeLlama; returns {'loss': scalar}."""
    B, T = input_ids.shape
    S_raw = USER_LEN + T
    S = ((S_raw + 7) // 8) * 8          # pad sequence to a multiple of 8 sublanes
    pad = S - S_raw
    E = EMSIZE
    BS = B * S

    GB = _group_batches(B, S)           # batches per grid step
    G = B // GB                         # grid size (parallel over TCs when >1)
    M = GB * S                          # activation rows per grid step

    # id_sql = user_id*user_len + arange(user_len); u_emd = user_embeddings(id_sql)
    id_sql = user_id[:, None] * USER_LEN + jnp.arange(USER_LEN)[None, :]
    u_emd = jnp.take(params["user_emb"], id_sql, axis=0)          # (B, 5, E)
    w_emd = jnp.take(params["tok_emb"], input_ids, axis=0)        # (B, T, E)
    src_emd = jnp.concatenate([u_emd, w_emd], axis=1)             # (B, S_raw, E)
    src_emd = jnp.pad(src_emd, ((0, 0), (0, pad), (0, 0)))        # (B, S, E)

    pad_mask = jnp.concatenate(
        [jnp.ones((B, USER_LEN), jnp.float32),
         attention_mask.astype(jnp.float32)], axis=1)             # (B, S_raw)
    pad_mask = jnp.pad(pad_mask, ((0, 0), (0, pad)))              # (B, S), pads -> 0

    pred_left = jnp.full((B, USER_LEN), IGNORE, jnp.int32)
    pred_right = jnp.where(attention_mask == 1, input_ids,
                           jnp.int32(IGNORE)).astype(jnp.int32)
    newlabels = jnp.concatenate([pred_left, pred_right], axis=1)  # (B, S_raw)
    newlabels = jnp.pad(newlabels, ((0, 0), (0, pad)),
                        constant_values=IGNORE)                   # (B, S)
    # Next-token shift: row s is scored against label s+1; last row IGNORE.
    shifted = jnp.concatenate(
        [newlabels[:, 1:], jnp.full((B, 1), IGNORE, jnp.int32)], axis=1)
    labels = shifted.reshape(BS, 1)                               # (BS, 1) int32

    # Tiny mask descriptors (bias is built inside the kernel from these):
    #   qb[i]   = sequence/batch index of query row i
    #   kcode[j]= sequence index of key j if the key is valid, else -1
    qb = jnp.repeat(jnp.arange(B, dtype=jnp.int32), S).reshape(BS, 1)
    kcode = jnp.where(pad_mask > 0.5,
                      jnp.arange(B, dtype=jnp.int32)[:, None],
                      jnp.int32(-1)).reshape(G, M)

    # RoPE tables tiled over heads and batch so the kernel never reshapes them.
    cos, sin = rope_tables(S, HEAD_DIM)                  # (S, Dh)
    cos_full = jnp.tile(cos, (B, N_HEADS))               # (BS, E)
    sin_full = jnp.tile(sin, (B, N_HEADS))               # (BS, E)

    packed = pack_params(params)

    L, I, V = N_LAYERS, INTER, VOCAB
    flops = int(G * (L * (2 * M * E * 5 * E + 4 * M * M * E + 2 * M * E * E
                          + 2 * M * E * 2 * I + 2 * M * I * E)
                     + 2 * M * E * V))
    transcendentals = int(G * (L * (N_HEADS * M * M + M * I) + M * V))

    args = (
        src_emd.reshape(BS, E).astype(jnp.float32),   # (BS, E)
        qb,                                           # (BS, 1) int32
        kcode,                                        # (G, M) int32
        labels,                                       # (BS, 1) int32
        cos_full, sin_full,                           # (BS, E) f32 each
        packed["ln1"], packed["wqkv"], packed["wo"],
        packed["ln2"], packed["wgu"], packed["wd"],
        packed["lnf"], packed["lm_head"],
    )
    bytes_accessed = int(sum(a.size * a.dtype.itemsize for a in args)
                         + 2 * G * 128 * 4)

    in_specs = [
        pl.BlockSpec((M, E), lambda g: (g, 0)),            # x
        pl.BlockSpec((M, 1), lambda g: (g, 0)),            # qb
        pl.BlockSpec((1, M), lambda g: (g, 0)),            # kcode
        pl.BlockSpec((M, 1), lambda g: (g, 0)),            # labels
        pl.BlockSpec((M, E), lambda g: (g, 0)),            # cos
        pl.BlockSpec((M, E), lambda g: (g, 0)),            # sin
        pl.BlockSpec((L, 1, E), lambda g: (0, 0, 0)),      # ln1
        pl.BlockSpec((L, E, 5 * E), lambda g: (0, 0, 0)),  # wqkv
        pl.BlockSpec((L, E, E), lambda g: (0, 0, 0)),      # wo
        pl.BlockSpec((L, 1, E), lambda g: (0, 0, 0)),      # ln2
        pl.BlockSpec((L, E, 2 * I), lambda g: (0, 0, 0)),  # wgu
        pl.BlockSpec((L, I, E), lambda g: (0, 0, 0)),      # wd
        pl.BlockSpec((1, E), lambda g: (0, 0)),            # lnf
        pl.BlockSpec((E, V), lambda g: (0, 0)),            # lm_head
    ]
    out_specs = [
        pl.BlockSpec((1, 128), lambda g: (g, 0)),          # per-group NLL (lane-dense)
        pl.BlockSpec((1, 128), lambda g: (g, 0)),          # per-group count
    ]

    nll_out, cnt_out = pl.pallas_call(
        prefer_llama_kernel,
        grid=(G,),
        in_specs=in_specs,
        out_specs=out_specs,
        out_shape=(jax.ShapeDtypeStruct((G, 128), jnp.float32),
                   jax.ShapeDtypeStruct((G, 128), jnp.float32)),
        compiler_params=pltpu.CompilerParams(
            dimension_semantics=("parallel",)),
        cost_estimate=pl.CostEstimate(flops=flops,
                                      transcendentals=transcendentals,
                                      bytes_accessed=bytes_accessed),
    )(*args)

    loss = jnp.sum(nll_out[:, 0]) / jnp.maximum(jnp.sum(cnt_out[:, 0]), 1.0)
    return {"loss": loss}


if __name__ == "__main__":
    key = jax.random.PRNGKey(0)
    kp, k1, k2 = jax.random.split(key, 3)

    params = init_params(kp)

    B, T = 2, 8
    user_id = jax.random.randint(k1, (B,), 0, IDNUM, dtype=jnp.int32)
    input_ids = jax.random.randint(k2, (B, T), 0, VOCAB, dtype=jnp.int32)
    # pad out the last two tokens of the second sequence
    attention_mask = jnp.ones((B, T), jnp.int32).at[1, T - 2:].set(0)

    out = prefer_codellama_forward(params, user_id, input_ids, attention_mask)
    loss = jax.block_until_ready(out["loss"])
    assert bool(jnp.isfinite(loss))
    print("KERNEL_OK")
</pallas_src>

<mosaic_0001>
module attributes {stable_mosaic.version = 11 : i64} {
  func.func @prefer_llama_kernel(%arg0: i32, %arg1: memref<32x64xf32, #tpu.memory_space<vmem>>, %arg2: memref<32x1xi32, #tpu.memory_space<vmem>>, %arg3: memref<1x32xi32, #tpu.memory_space<vmem>>, %arg4: memref<32x1xi32, #tpu.memory_space<vmem>>, %arg5: memref<32x64xf32, #tpu.memory_space<vmem>>, %arg6: memref<32x64xf32, #tpu.memory_space<vmem>>, %arg7: memref<2x1x64xf32, #tpu.memory_space<vmem>>, %arg8: memref<2x64x320xbf16, #tpu.memory_space<vmem>>, %arg9: memref<2x64x64xbf16, #tpu.memory_space<vmem>>, %arg10: memref<2x1x64xf32, #tpu.memory_space<vmem>>, %arg11: memref<2x64x256xbf16, #tpu.memory_space<vmem>>, %arg12: memref<2x128x64xbf16, #tpu.memory_space<vmem>>, %arg13: memref<1x64xf32, #tpu.memory_space<vmem>>, %arg14: memref<64x128xbf16, #tpu.memory_space<vmem>>, %arg15: memref<1x128xf32, #tpu.memory_space<vmem>>, %arg16: memref<1x128xf32, #tpu.memory_space<vmem>>) attributes {dimension_semantics = [#tpu.dimension_semantics<parallel>], iteration_bounds = array<i64: 1>, scalar_prefetch = 0 : i64, scratch_operands = 0 : i64, tpu.core_type = #tpu.core_type<tc>, window_params = [{transform_indices = @transform_0, window_bounds = array<i64: 32, 64>}, {transform_indices = @transform_1, window_bounds = array<i64: 32, 1>}, {transform_indices = @transform_2, window_bounds = array<i64: 1, 32>}, {transform_indices = @transform_3, window_bounds = array<i64: 32, 1>}, {transform_indices = @transform_4, window_bounds = array<i64: 32, 64>}, {transform_indices = @transform_5, window_bounds = array<i64: 32, 64>}, {pipeline_mode = #tpu.pipeline_mode<synchronous>, transform_indices = @transform_6, window_bounds = array<i64: 2, 1, 64>}, {pipeline_mode = #tpu.pipeline_mode<synchronous>, transform_indices = @transform_7, window_bounds = array<i64: 2, 64, 320>}, {pipeline_mode = #tpu.pipeline_mode<synchronous>, transform_indices = @transform_8, window_bounds = array<i64: 2, 64, 64>}, {pipeline_mode = #tpu.pipeline_mode<synchronous>, transform_indices = @transform_9, window_bounds = array<i64: 2, 1, 64>}, {pipeline_mode = #tpu.pipeline_mode<synchronous>, transform_indices = @transform_10, window_bounds = array<i64: 2, 64, 256>}, {pipeline_mode = #tpu.pipeline_mode<synchronous>, transform_indices = @transform_11, window_bounds = array<i64: 2, 128, 64>}, {pipeline_mode = #tpu.pipeline_mode<synchronous>, transform_indices = @transform_12, window_bounds = array<i64: 1, 64>}, {pipeline_mode = #tpu.pipeline_mode<synchronous>, transform_indices = @transform_13, window_bounds = array<i64: 64, 128>}, {transform_indices = @transform_14, window_bounds = array<i64: 1, 128>}, {transform_indices = @transform_15, window_bounds = array<i64: 1, 128>}]} {
    %c0 = arith.constant 0 : index
    %c0_0 = arith.constant 0 : index
    %0 = vector.load %arg1[%c0, %c0_0] : memref<32x64xf32, #tpu.memory_space<vmem>>, vector<32x64xf32>
    %c0_1 = arith.constant 0 : index
    %c0_2 = arith.constant 0 : index
    %1 = vector.load %arg5[%c0_1, %c0_2] : memref<32x64xf32, #tpu.memory_space<vmem>>, vector<32x64xf32>
    %c0_3 = arith.constant 0 : index
    %c0_4 = arith.constant 0 : index
    %2 = vector.load %arg6[%c0_3, %c0_4] : memref<32x64xf32, #tpu.memory_space<vmem>>, vector<32x64xf32>
    %3 = tpu.iota {dimensions = array<i32: 0>} : vector<32x32xi32>
    %4 = tpu.iota {dimensions = array<i32: 1>} : vector<32x32xi32>
    %c0_5 = arith.constant 0 : index
    %c0_6 = arith.constant 0 : index
    %5 = vector.load %arg2[%c0_5, %c0_6] : memref<32x1xi32, #tpu.memory_space<vmem>>, vector<32x1xi32>
    %c0_7 = arith.constant 0 : index
    %c0_8 = arith.constant 0 : index
    %6 = vector.load %arg3[%c0_7, %c0_8] : memref<1x32xi32, #tpu.memory_space<vmem>>, vector<1x32xi32>
    %7 = vector.broadcast %5 : vector<32x1xi32> to vector<32x32xi32>
    %8 = vector.broadcast %6 : vector<1x32xi32> to vector<32x32xi32>
    %9 = arith.cmpi eq, %7, %8 : vector<32x32xi32>
    %10 = arith.cmpi sle, %4, %3 : vector<32x32xi32>
    %11 = arith.andi %9, %10 : vector<32x32xi1>
    %cst = arith.constant 0.000000e+00 : f32
    %cst_9 = arith.constant -1.000000e+09 : f32
    %12 = vector.broadcast %cst : f32 to vector<32x32xf32>
    %13 = vector.broadcast %cst_9 : f32 to vector<32x32xf32>
    %14 = arith.select %11, %12, %13 : vector<32x32xi1>, vector<32x32xf32>
    %c0_10 = arith.constant 0 : index
    %c0_11 = arith.constant 0 : index
    %c0_12 = arith.constant 0 : index
    %15 = vector.load %arg7[%c0_10, %c0_11, %c0_12] : memref<2x1x64xf32, #tpu.memory_space<vmem>>, vector<1x1x64xf32>
    %16 = vector.shape_cast %15 : vector<1x1x64xf32> to vector<1x64xf32>
    %17 = arith.mulf %0, %0 : vector<32x64xf32>
    %cst_13 = arith.constant dense<0.000000e+00> : vector<32xf32>
    %18 = vector.multi_reduction <add>, %17, %cst_13 [1] : vector<32x64xf32> to vector<32xf32>
    %19 = vector.shape_cast %18 : vector<32xf32> to vector<32x1xf32>
    %cst_14 = arith.constant 6.400000e+01 : f32
    %20 = vector.broadcast %cst_14 : f32 to vector<32x1xf32>
    %21 = arith.divf %19, %20 : vector<32x1xf32>
    %cst_15 = arith.constant 9.99999997E-7 : f32
    %22 = vector.broadcast %cst_15 : f32 to vector<32x1xf32>
    %23 = arith.addf %21, %22 : vector<32x1xf32>
    %24 = math.rsqrt %23 : vector<32x1xf32>
    %25 = vector.broadcast %24 : vector<32x1xf32> to vector<32x64xf32>
    %26 = arith.mulf %0, %25 : vector<32x64xf32>
    %27 = vector.broadcast %16 : vector<1x64xf32> to vector<32x64xf32>
    %28 = arith.mulf %26, %27 : vector<32x64xf32>
    %29 = arith.truncf %28 : vector<32x64xf32> to vector<32x64xbf16>
    %c0_16 = arith.constant 0 : index
    %c0_17 = arith.constant 0 : index
    %c0_18 = arith.constant 0 : index
    %30 = vector.load %arg8[%c0_16, %c0_17, %c0_18] : memref<2x64x320xbf16, #tpu.memory_space<vmem>>, vector<1x64x320xbf16>
    %31 = vector.shape_cast %30 : vector<1x64x320xbf16> to vector<64x320xbf16>
    %cst_19 = arith.constant dense<0.000000e+00> : vector<32x320xf32>
    %32 = tpu.matmul %29, %31, %cst_19 {dimension_numbers = #tpu.dot_dimension_numbers<[1], [0], [0], [1], [0, 0, 1, 1], [], []>} : vector<32x64xbf16>, vector<64x320xbf16>, vector<32x320xf32> -> vector<32x320xf32>
    %33 = vector.extract_strided_slice %32 {offsets = [0, 0], sizes = [32, 64], strides = [1, 1]} : vector<32x320xf32> to vector<32x64xf32>
    %34 = arith.mulf %33, %1 : vector<32x64xf32>
    %35 = vector.extract_strided_slice %32 {offsets = [0, 64], sizes = [32, 64], strides = [1, 1]} : vector<32x320xf32> to vector<32x64xf32>
    %36 = arith.mulf %35, %2 : vector<32x64xf32>
    %37 = arith.addf %34, %36 : vector<32x64xf32>
    %38 = vector.extract_strided_slice %32 {offsets = [0, 128], sizes = [32, 64], strides = [1, 1]} : vector<32x320xf32> to vector<32x64xf32>
    %39 = arith.mulf %38, %1 : vector<32x64xf32>
    %40 = vector.extract_strided_slice %32 {offsets = [0, 192], sizes = [32, 64], strides = [1, 1]} : vector<32x320xf32> to vector<32x64xf32>
    %41 = arith.mulf %40, %2 : vector<32x64xf32>
    %42 = arith.addf %39, %41 : vector<32x64xf32>
    %43 = vector.extract_strided_slice %32 {offsets = [0, 256], sizes = [32, 64], strides = [1, 1]} : vector<32x320xf32> to vector<32x64xf32>
    %44 = arith.truncf %37 : vector<32x64xf32> to vector<32x64xbf16>
    %45 = arith.truncf %42 : vector<32x64xf32> to vector<32x64xbf16>
    %46 = arith.truncf %43 : vector<32x64xf32> to vector<32x64xbf16>
    %c0_20 = arith.constant 0 : index
    %c0_21 = arith.constant 0 : index
    %c0_22 = arith.constant 0 : index
    %47 = vector.load %arg9[%c0_20, %c0_21, %c0_22] : memref<2x64x64xbf16, #tpu.memory_space<vmem>>, vector<1x64x64xbf16>
    %48 = vector.shape_cast %47 : vector<1x64x64xbf16> to vector<64x64xbf16>
    %cst_23 = arith.constant 0.000000e+00 : f32
    %49 = vector.broadcast %cst_23 : f32 to vector<32x64xf32>
    %50 = vector.extract_strided_slice %44 {offsets = [0, 0], sizes = [32, 16], strides = [1, 1]} : vector<32x64xbf16> to vector<32x16xbf16>
    %51 = vector.extract_strided_slice %45 {offsets = [0, 0], sizes = [32, 16], strides = [1, 1]} : vector<32x64xbf16> to vector<32x16xbf16>
    %cst_24 = arith.constant dense<0.000000e+00> : vector<32x32xf32>
    %52 = tpu.matmul %50, %51, %cst_24 {dimension_numbers = #tpu.dot_dimension_numbers<[1], [1], [0], [0], [0, 0, 1, 0], [], []>} : vector<32x16xbf16>, vector<32x16xbf16>, vector<32x32xf32> -> vector<32x32xf32>
    %53 = arith.addf %52, %14 : vector<32x32xf32>
    %cst_25 = arith.constant dense<0xFF800000> : vector<32xf32>
    %54 = vector.multi_reduction <maximumf>, %53, %cst_25 [1] : vector<32x32xf32> to vector<32xf32>
    %55 = vector.shape_cast %54 : vector<32xf32> to vector<32x1xf32>
    %56 = vector.broadcast %55 : vector<32x1xf32> to vector<32x32xf32>
    %57 = arith.subf %53, %56 : vector<32x32xf32>
    %58 = math.exp %57 : vector<32x32xf32>
    %cst_26 = arith.constant dense<0.000000e+00> : vector<32xf32>
    %59 = vector.multi_reduction <add>, %58, %cst_26 [1] : vector<32x32xf32> to vector<32xf32>
    %60 = vector.shape_cast %59 : vector<32xf32> to vector<32x1xf32>
    %61 = tpu.reciprocal %60 {approx = true} : vector<32x1xf32> -> vector<32x1xf32>
    %62 = vector.broadcast %61 : vector<32x1xf32> to vector<32x32xf32>
    %63 = arith.mulf %58, %62 : vector<32x32xf32>
    %64 = arith.truncf %63 : vector<32x32xf32> to vector<32x32xbf16>
    %65 = vector.extract_strided_slice %46 {offsets = [0, 0], sizes = [32, 16], strides = [1, 1]} : vector<32x64xbf16> to vector<32x16xbf16>
    %cst_27 = arith.constant dense<0.000000e+00> : vector<32x16xf32>
    %66 = tpu.matmul %64, %65, %cst_27 {dimension_numbers = #tpu.dot_dimension_numbers<[1], [0], [0], [1], [0, 0, 1, 1], [], []>} : vector<32x32xbf16>, vector<32x16xbf16>, vector<32x16xf32> -> vector<32x16xf32>
    %67 = arith.truncf %66 : vector<32x16xf32> to vector<32x16xbf16>
    %68 = vector.extract_strided_slice %48 {offsets = [0, 0], sizes = [16, 64], strides = [1, 1]} : vector<64x64xbf16> to vector<16x64xbf16>
    %cst_28 = arith.constant dense<0.000000e+00> : vector<32x64xf32>
    %69 = tpu.matmul %67, %68, %cst_28 {dimension_numbers = #tpu.dot_dimension_numbers<[1], [0], [0], [1], [0, 0, 1, 1], [], []>} : vector<32x16xbf16>, vector<16x64xbf16>, vector<32x64xf32> -> vector<32x64xf32>
    %70 = arith.addf %49, %69 : vector<32x64xf32>
    %71 = vector.extract_strided_slice %44 {offsets = [0, 16], sizes = [32, 16], strides = [1, 1]} : vector<32x64xbf16> to vector<32x16xbf16>
    %72 = vector.extract_strided_slice %45 {offsets = [0, 16], sizes = [32, 16], strides = [1, 1]} : vector<32x64xbf16> to vector<32x16xbf16>
    %cst_29 = arith.constant dense<0.000000e+00> : vector<32x32xf32>
    %73 = tpu.matmul %71, %72, %cst_29 {dimension_numbers = #tpu.dot_dimension_numbers<[1], [1], [0], [0], [0, 0, 1, 0], [], []>} : vector<32x16xbf16>, vector<32x16xbf16>, vector<32x32xf32> -> vector<32x32xf32>
    %74 = arith.addf %73, %14 : vector<32x32xf32>
    %cst_30 = arith.constant dense<0xFF800000> : vector<32xf32>
    %75 = vector.multi_reduction <maximumf>, %74, %cst_30 [1] : vector<32x32xf32> to vector<32xf32>
    %76 = vector.shape_cast %75 : vector<32xf32> to vector<32x1xf32>
    %77 = vector.broadcast %76 : vector<32x1xf32> to vector<32x32xf32>
    %78 = arith.subf %74, %77 : vector<32x32xf32>
    %79 = math.exp %78 : vector<32x32xf32>
    %cst_31 = arith.constant dense<0.000000e+00> : vector<32xf32>
    %80 = vector.multi_reduction <add>, %79, %cst_31 [1] : vector<32x32xf32> to vector<32xf32>
    %81 = vector.shape_cast %80 : vector<32xf32> to vector<32x1xf32>
    %82 = tpu.reciprocal %81 {approx = true} : vector<32x1xf32> -> vector<32x1xf32>
    %83 = vector.broadcast %82 : vector<32x1xf32> to vector<32x32xf32>
    %84 = arith.mulf %79, %83 : vector<32x32xf32>
    %85 = arith.truncf %84 : vector<32x32xf32> to vector<32x32xbf16>
    %86 = vector.extract_strided_slice %46 {offsets = [0, 16], sizes = [32, 16], strides = [1, 1]} : vector<32x64xbf16> to vector<32x16xbf16>
    %cst_32 = arith.constant dense<0.000000e+00> : vector<32x16xf32>
    %87 = tpu.matmul %85, %86, %cst_32 {dimension_numbers = #tpu.dot_dimension_numbers<[1], [0], [0], [1], [0, 0, 1, 1], [], []>} : vector<32x32xbf16>, vector<32x16xbf16>, vector<32x16xf32> -> vector<32x16xf32>
    %88 = arith.truncf %87 : vector<32x16xf32> to vector<32x16xbf16>
    %89 = vector.extract_strided_slice %48 {offsets = [16, 0], sizes = [16, 64], strides = [1, 1]} : vector<64x64xbf16> to vector<16x64xbf16>
    %cst_33 = arith.constant dense<0.000000e+00> : vector<32x64xf32>
    %90 = tpu.matmul %88, %89, %cst_33 {dimension_numbers = #tpu.dot_dimension_numbers<[1], [0], [0], [1], [0, 0, 1, 1], [], []>} : vector<32x16xbf16>, vector<16x64xbf16>, vector<32x64xf32> -> vector<32x64xf32>
    %91 = arith.addf %70, %90 : vector<32x64xf32>
    %92 = vector.extract_strided_slice %44 {offsets = [0, 32], sizes = [32, 16], strides = [1, 1]} : vector<32x64xbf16> to vector<32x16xbf16>
    %93 = vector.extract_strided_slice %45 {offsets = [0, 32], sizes = [32, 16], strides = [1, 1]} : vector<32x64xbf16> to vector<32x16xbf16>
    %cst_34 = arith.constant dense<0.000000e+00> : vector<32x32xf32>
    %94 = tpu.matmul %92, %93, %cst_34 {dimension_numbers = #tpu.dot_dimension_numbers<[1], [1], [0], [0], [0, 0, 1, 0], [], []>} : vector<32x16xbf16>, vector<32x16xbf16>, vector<32x32xf32> -> vector<32x32xf32>
    %95 = arith.addf %94, %14 : vector<32x32xf32>
    %cst_35 = arith.constant dense<0xFF800000> : vector<32xf32>
    %96 = vector.multi_reduction <maximumf>, %95, %cst_35 [1] : vector<32x32xf32> to vector<32xf32>
    %97 = vector.shape_cast %96 : vector<32xf32> to vector<32x1xf32>
    %98 = vector.broadcast %97 : vector<32x1xf32> to vector<32x32xf32>
    %99 = arith.subf %95, %98 : vector<32x32xf32>
    %100 = math.exp %99 : vector<32x32xf32>
    %cst_36 = arith.constant dense<0.000000e+00> : vector<32xf32>
    %101 = vector.multi_reduction <add>, %100, %cst_36 [1] : vector<32x32xf32> to vector<32xf32>
    %102 = vector.shape_cast %101 : vector<32xf32> to vector<32x1xf32>
    %103 = tpu.reciprocal %102 {approx = true} : vector<32x1xf32> -> vector<32x1xf32>
    %104 = vector.broadcast %103 : vector<32x1xf32> to vector<32x32xf32>
    %105 = arith.mulf %100, %104 : vector<32x32xf32>
    %106 = arith.truncf %105 : vector<32x32xf32> to vector<32x32xbf16>
    %107 = vector.extract_strided_slice %46 {offsets = [0, 32], sizes = [32, 16], strides = [1, 1]} : vector<32x64xbf16> to vector<32x16xbf16>
    %cst_37 = arith.constant dense<0.000000e+00> : vector<32x16xf32>
    %108 = tpu.matmul %106, %107, %cst_37 {dimension_numbers = #tpu.dot_dimension_numbers<[1], [0], [0], [1], [0, 0, 1, 1], [], []>} : vector<32x32xbf16>, vector<32x16xbf16>, vector<32x16xf32> -> vector<32x16xf32>
    %109 = arith.truncf %108 : vector<32x16xf32> to vector<32x16xbf16>
    %110 = vector.extract_strided_slice %48 {offsets = [32, 0], sizes = [16, 64], strides = [1, 1]} : vector<64x64xbf16> to vector<16x64xbf16>
    %cst_38 = arith.constant dense<0.000000e+00> : vector<32x64xf32>
    %111 = tpu.matmul %109, %110, %cst_38 {dimension_numbers = #tpu.dot_dimension_numbers<[1], [0], [0], [1], [0, 0, 1, 1], [], []>} : vector<32x16xbf16>, vector<16x64xbf16>, vector<32x64xf32> -> vector<32x64xf32>
    %112 = arith.addf %91, %111 : vector<32x64xf32>
    %113 = vector.extract_strided_slice %44 {offsets = [0, 48], sizes = [32, 16], strides = [1, 1]} : vector<32x64xbf16> to vector<32x16xbf16>
    %114 = vector.extract_strided_slice %45 {offsets = [0, 48], sizes = [32, 16], strides = [1, 1]} : vector<32x64xbf16> to vector<32x16xbf16>
    %cst_39 = arith.constant dense<0.000000e+00> : vector<32x32xf32>
    %115 = tpu.matmul %113, %114, %cst_39 {dimension_numbers = #tpu.dot_dimension_numbers<[1], [1], [0], [0], [0, 0, 1, 0], [], []>} : vector<32x16xbf16>, vector<32x16xbf16>, vector<32x32xf32> -> vector<32x32xf32>
    %116 = arith.addf %115, %14 : vector<32x32xf32>
    %cst_40 = arith.constant dense<0xFF800000> : vector<32xf32>
    %117 = vector.multi_reduction <maximumf>, %116, %cst_40 [1] : vector<32x32xf32> to vector<32xf32>
    %118 = vector.shape_cast %117 : vector<32xf32> to vector<32x1xf32>
    %119 = vector.broadcast %118 : vector<32x1xf32> to vector<32x32xf32>
    %120 = arith.subf %116, %119 : vector<32x32xf32>
    %121 = math.exp %120 : vector<32x32xf32>
    %cst_41 = arith.constant dense<0.000000e+00> : vector<32xf32>
    %122 = vector.multi_reduction <add>, %121, %cst_41 [1] : vector<32x32xf32> to vector<32xf32>
    %123 = vector.shape_cast %122 : vector<32xf32> to vector<32x1xf32>
    %124 = tpu.reciprocal %123 {approx = true} : vector<32x1xf32> -> vector<32x1xf32>
    %125 = vector.broadcast %124 : vector<32x1xf32> to vector<32x32xf32>
    %126 = arith.mulf %121, %125 : vector<32x32xf32>
    %127 = arith.truncf %126 : vector<32x32xf32> to vector<32x32xbf16>
    %128 = vector.extract_strided_slice %46 {offsets = [0, 48], sizes = [32, 16], strides = [1, 1]} : vector<32x64xbf16> to vector<32x16xbf16>
    %cst_42 = arith.constant dense<0.000000e+00> : vector<32x16xf32>
    %129 = tpu.matmul %127, %128, %cst_42 {dimension_numbers = #tpu.dot_dimension_numbers<[1], [0], [0], [1], [0, 0, 1, 1], [], []>} : vector<32x32xbf16>, vector<32x16xbf16>, vector<32x16xf32> -> vector<32x16xf32>
    %130 = arith.truncf %129 : vector<32x16xf32> to vector<32x16xbf16>
    %131 = vector.extract_strided_slice %48 {offsets = [48, 0], sizes = [16, 64], strides = [1, 1]} : vector<64x64xbf16> to vector<16x64xbf16>
    %cst_43 = arith.constant dense<0.000000e+00> : vector<32x64xf32>
    %132 = tpu.matmul %130, %131, %cst_43 {dimension_numbers = #tpu.dot_dimension_numbers<[1], [0], [0], [1], [0, 0, 1, 1], [], []>} : vector<32x16xbf16>, vector<16x64xbf16>, vector<32x64xf32> -> vector<32x64xf32>
    %133 = arith.addf %112, %132 : vector<32x64xf32>
    %134 = arith.addf %0, %133 : vector<32x64xf32>
    %c0_44 = arith.constant 0 : index
    %c0_45 = arith.constant 0 : index
    %c0_46 = arith.constant 0 : index
    %135 = vector.load %arg10[%c0_44, %c0_45, %c0_46] : memref<2x1x64xf32, #tpu.memory_space<vmem>>, vector<1x1x64xf32>
    %136 = vector.shape_cast %135 : vector<1x1x64xf32> to vector<1x64xf32>
    %137 = arith.mulf %134, %134 : vector<32x64xf32>
    %cst_47 = arith.constant dense<0.000000e+00> : vector<32xf32>
    %138 = vector.multi_reduction <add>, %137, %cst_47 [1] : vector<32x64xf32> to vector<32xf32>
    %139 = vector.shape_cast %138 : vector<32xf32> to vector<32x1xf32>
    %cst_48 = arith.constant 6.400000e+01 : f32
    %140 = vector.broadcast %cst_48 : f32 to vector<32x1xf32>
    %141 = arith.divf %139, %140 : vector<32x1xf32>
    %cst_49 = arith.constant 9.99999997E-7 : f32
    %142 = vector.broadcast %cst_49 : f32 to vector<32x1xf32>
    %143 = arith.addf %141, %142 : vector<32x1xf32>
    %144 = math.rsqrt %143 : vector<32x1xf32>
    %145 = vector.broadcast %144 : vector<32x1xf32> to vector<32x64xf32>
    %146 = arith.mulf %134, %145 : vector<32x64xf32>
    %147 = vector.broadcast %136 : vector<1x64xf32> to vector<32x64xf32>
    %148 = arith.mulf %146, %147 : vector<32x64xf32>
    %149 = arith.truncf %148 : vector<32x64xf32> to vector<32x64xbf16>
    %c0_50 = arith.constant 0 : index
    %c0_51 = arith.constant 0 : index
    %c0_52 = arith.constant 0 : index
    %150 = vector.load %arg11[%c0_50, %c0_51, %c0_52] : memref<2x64x256xbf16, #tpu.memory_space<vmem>>, vector<1x64x256xbf16>
    %151 = vector.shape_cast %150 : vector<1x64x256xbf16> to vector<64x256xbf16>
    %cst_53 = arith.constant dense<0.000000e+00> : vector<32x256xf32>
    %152 = tpu.matmul %149, %151, %cst_53 {dimension_numbers = #tpu.dot_dimension_numbers<[1], [0], [0], [1], [0, 0, 1, 1], [], []>} : vector<32x64xbf16>, vector<64x256xbf16>, vector<32x256xf32> -> vector<32x256xf32>
    %153 = vector.extract_strided_slice %152 {offsets = [0, 0], sizes = [32, 128], strides = [1, 1]} : vector<32x256xf32> to vector<32x128xf32>
    %154 = vector.extract_strided_slice %152 {offsets = [0, 128], sizes = [32, 128], strides = [1, 1]} : vector<32x256xf32> to vector<32x128xf32>
    %cst_54 = arith.constant 0.000000e+00 : f32
    %155 = vector.broadcast %cst_54 : f32 to vector<32x128xf32>
    %156 = arith.subf %155, %153 : vector<32x128xf32>
    %157 = math.exp %156 : vector<32x128xf32>
    %cst_55 = arith.constant 1.000000e+00 : f32
    %158 = vector.broadcast %cst_55 : f32 to vector<32x128xf32>
    %159 = arith.addf %158, %157 : vector<32x128xf32>
    %160 = tpu.reciprocal %159 {approx = true} : vector<32x128xf32> -> vector<32x128xf32>
    %161 = arith.mulf %153, %160 : vector<32x128xf32>
    %162 = arith.mulf %161, %154 : vector<32x128xf32>
    %163 = arith.truncf %162 : vector<32x128xf32> to vector<32x128xbf16>
    %c0_56 = arith.constant 0 : index
    %c0_57 = arith.constant 0 : index
    %c0_58 = arith.constant 0 : index
    %164 = vector.load %arg12[%c0_56, %c0_57, %c0_58] : memref<2x128x64xbf16, #tpu.memory_space<vmem>>, vector<1x128x64xbf16>
    %165 = vector.shape_cast %164 : vector<1x128x64xbf16> to vector<128x64xbf16>
    %cst_59 = arith.constant dense<0.000000e+00> : vector<32x64xf32>
    %166 = tpu.matmul %163, %165, %cst_59 {dimension_numbers = #tpu.dot_dimension_numbers<[1], [0], [0], [1], [0, 0, 1, 1], [], []>} : vector<32x128xbf16>, vector<128x64xbf16>, vector<32x64xf32> -> vector<32x64xf32>
    %167 = arith.addf %134, %166 : vector<32x64xf32>
    %c1 = arith.constant 1 : index
    %c0_60 = arith.constant 0 : index
    %c0_61 = arith.constant 0 : index
    %168 = vector.load %arg7[%c1, %c0_60, %c0_61] : memref<2x1x64xf32, #tpu.memory_space<vmem>>, vector<1x1x64xf32>
    %169 = vector.shape_cast %168 : vector<1x1x64xf32> to vector<1x64xf32>
    %170 = arith.mulf %167, %167 : vector<32x64xf32>
    %cst_62 = arith.constant dense<0.000000e+00> : vector<32xf32>
    %171 = vector.multi_reduction <add>, %170, %cst_62 [1] : vector<32x64xf32> to vector<32xf32>
    %172 = vector.shape_cast %171 : vector<32xf32> to vector<32x1xf32>
    %cst_63 = arith.constant 6.400000e+01 : f32
    %173 = vector.broadcast %cst_63 : f32 to vector<32x1xf32>
    %174 = arith.divf %172, %173 : vector<32x1xf32>
    %cst_64 = arith.constant 9.99999997E-7 : f32
    %175 = vector.broadcast %cst_64 : f32 to vector<32x1xf32>
    %176 = arith.addf %174, %175 : vector<32x1xf32>
    %177 = math.rsqrt %176 : vector<32x1xf32>
    %178 = vector.broadcast %177 : vector<32x1xf32> to vector<32x64xf32>
    %179 = arith.mulf %167, %178 : vector<32x64xf32>
    %180 = vector.broadcast %169 : vector<1x64xf32> to vector<32x64xf32>
    %181 = arith.mulf %179, %180 : vector<32x64xf32>
    %182 = arith.truncf %181 : vector<32x64xf32> to vector<32x64xbf16>
    %c1_65 = arith.constant 1 : index
    %c0_66 = arith.constant 0 : index
    %c0_67 = arith.constant 0 : index
    %183 = vector.load %arg8[%c1_65, %c0_66, %c0_67] : memref<2x64x320xbf16, #tpu.memory_space<vmem>>, vector<1x64x320xbf16>
    %184 = vector.shape_cast %183 : vector<1x64x320xbf16> to vector<64x320xbf16>
    %cst_68 = arith.constant dense<0.000000e+00> : vector<32x320xf32>
    %185 = tpu.matmul %182, %184, %cst_68 {dimension_numbers = #tpu.dot_dimension_numbers<[1], [0], [0], [1], [0, 0, 1, 1], [], []>} : vector<32x64xbf16>, vector<64x320xbf16>, vector<32x320xf32> -> vector<32x320xf32>
    %186 = vector.extract_strided_slice %185 {offsets = [0, 0], sizes = [32, 64], strides = [1, 1]} : vector<32x320xf32> to vector<32x64xf32>
    %187 = arith.mulf %186, %1 : vector<32x64xf32>
    %188 = vector.extract_strided_slice %185 {offsets = [0, 64], sizes = [32, 64], strides = [1, 1]} : vector<32x320xf32> to vector<32x64xf32>
    %189 = arith.mulf %188, %2 : vector<32x64xf32>
    %190 = arith.addf %187, %189 : vector<32x64xf32>
    %191 = vector.extract_strided_slice %185 {offsets = [0, 128], sizes = [32, 64], strides = [1, 1]} : vector<32x320xf32> to vector<32x64xf32>
    %192 = arith.mulf %191, %1 : vector<32x64xf32>
    %193 = vector.extract_strided_slice %185 {offsets = [0, 192], sizes = [32, 64], strides = [1, 1]} : vector<32x320xf32> to vector<32x64xf32>
    %194 = arith.mulf %193, %2 : vector<32x64xf32>
    %195 = arith.addf %192, %194 : vector<32x64xf32>
    %196 = vector.extract_strided_slice %185 {offsets = [0, 256], sizes = [32, 64], strides = [1, 1]} : vector<32x320xf32> to vector<32x64xf32>
    %197 = arith.truncf %190 : vector<32x64xf32> to vector<32x64xbf16>
    %198 = arith.truncf %195 : vector<32x64xf32> to vector<32x64xbf16>
    %199 = arith.truncf %196 : vector<32x64xf32> to vector<32x64xbf16>
    %c1_69 = arith.constant 1 : index
    %c0_70 = arith.constant 0 : index
    %c0_71 = arith.constant 0 : index
    %200 = vector.load %arg9[%c1_69, %c0_70, %c0_71] : memref<2x64x64xbf16, #tpu.memory_space<vmem>>, vector<1x64x64xbf16>
    %201 = vector.shape_cast %200 : vector<1x64x64xbf16> to vector<64x64xbf16>
    %cst_72 = arith.constant 0.000000e+00 : f32
    %202 = vector.broadcast %cst_72 : f32 to vector<32x64xf32>
    %203 = vector.extract_strided_slice %197 {offsets = [0, 0], sizes = [32, 16], strides = [1, 1]} : vector<32x64xbf16> to vector<32x16xbf16>
    %204 = vector.extract_strided_slice %198 {offsets = [0, 0], sizes = [32, 16], strides = [1, 1]} : vector<32x64xbf16> to vector<32x16xbf16>
    %cst_73 = arith.constant dense<0.000000e+00> : vector<32x32xf32>
    %205 = tpu.matmul %203, %204, %cst_73 {dimension_numbers = #tpu.dot_dimension_numbers<[1], [1], [0], [0], [0, 0, 1, 0], [], []>} : vector<32x16xbf16>, vector<32x16xbf16>, vector<32x32xf32> -> vector<32x32xf32>
    %206 = arith.addf %205, %14 : vector<32x32xf32>
    %cst_74 = arith.constant dense<0xFF800000> : vector<32xf32>
    %207 = vector.multi_reduction <maximumf>, %206, %cst_74 [1] : vector<32x32xf32> to vector<32xf32>
    %208 = vector.shape_cast %207 : vector<32xf32> to vector<32x1xf32>
    %209 = vector.broadcast %208 : vector<32x1xf32> to vector<32x32xf32>
    %210 = arith.subf %206, %209 : vector<32x32xf32>
    %211 = math.exp %210 : vector<32x32xf32>
    %cst_75 = arith.constant dense<0.000000e+00> : vector<32xf32>
    %212 = vector.multi_reduction <add>, %211, %cst_75 [1] : vector<32x32xf32> to vector<32xf32>
    %213 = vector.shape_cast %212 : vector<32xf32> to vector<32x1xf32>
    %214 = tpu.reciprocal %213 {approx = true} : vector<32x1xf32> -> vector<32x1xf32>
    %215 = vector.broadcast %214 : vector<32x1xf32> to vector<32x32xf32>
    %216 = arith.mulf %211, %215 : vector<32x32xf32>
    %217 = arith.truncf %216 : vector<32x32xf32> to vector<32x32xbf16>
    %218 = vector.extract_strided_slice %199 {offsets = [0, 0], sizes = [32, 16], strides = [1, 1]} : vector<32x64xbf16> to vector<32x16xbf16>
    %cst_76 = arith.constant dense<0.000000e+00> : vector<32x16xf32>
    %219 = tpu.matmul %217, %218, %cst_76 {dimension_numbers = #tpu.dot_dimension_numbers<[1], [0], [0], [1], [0, 0, 1, 1], [], []>} : vector<32x32xbf16>, vector<32x16xbf16>, vector<32x16xf32> -> vector<32x16xf32>
    %220 = arith.truncf %219 : vector<32x16xf32> to vector<32x16xbf16>
    %221 = vector.extract_strided_slice %201 {offsets = [0, 0], sizes = [16, 64], strides = [1, 1]} : vector<64x64xbf16> to vector<16x64xbf16>
    %cst_77 = arith.constant dense<0.000000e+00> : vector<32x64xf32>
    %222 = tpu.matmul %220, %221, %cst_77 {dimension_numbers = #tpu.dot_dimension_numbers<[1], [0], [0], [1], [0, 0, 1, 1], [], []>} : vector<32x16xbf16>, vector<16x64xbf16>, vector<32x64xf32> -> vector<32x64xf32>
    %223 = arith.addf %202, %222 : vector<32x64xf32>
    %224 = vector.extract_strided_slice %197 {offsets = [0, 16], sizes = [32, 16], strides = [1, 1]} : vector<32x64xbf16> to vector<32x16xbf16>
    %225 = vector.extract_strided_slice %198 {offsets = [0, 16], sizes = [32, 16], strides = [1, 1]} : vector<32x64xbf16> to vector<32x16xbf16>
    %cst_78 = arith.constant dense<0.000000e+00> : vector<32x32xf32>
    %226 = tpu.matmul %224, %225, %cst_78 {dimension_numbers = #tpu.dot_dimension_numbers<[1], [1], [0], [0], [0, 0, 1, 0], [], []>} : vector<32x16xbf16>, vector<32x16xbf16>, vector<32x32xf32> -> vector<32x32xf32>
    %227 = arith.addf %226, %14 : vector<32x32xf32>
    %cst_79 = arith.constant dense<0xFF800000> : vector<32xf32>
    %228 = vector.multi_reduction <maximumf>, %227, %cst_79 [1] : vector<32x32xf32> to vector<32xf32>
    %229 = vector.shape_cast %228 : vector<32xf32> to vector<32x1xf32>
    %230 = vector.broadcast %229 : vector<32x1xf32> to vector<32x32xf32>
    %231 = arith.subf %227, %230 : vector<32x32xf32>
    %232 = math.exp %231 : vector<32x32xf32>
    %cst_80 = arith.constant dense<0.000000e+00> : vector<32xf32>
    %233 = vector.multi_reduction <add>, %232, %cst_80 [1] : vector<32x32xf32> to vector<32xf32>
    %234 = vector.shape_cast %233 : vector<32xf32> to vector<32x1xf32>
    %235 = tpu.reciprocal %234 {approx = true} : vector<32x1xf32> -> vector<32x1xf32>
    %236 = vector.broadcast %235 : vector<32x1xf32> to vector<32x32xf32>
    %237 = arith.mulf %232, %236 : vector<32x32xf32>
    %238 = arith.truncf %237 : vector<32x32xf32> to vector<32x32xbf16>
    %239 = vector.extract_strided_slice %199 {offsets = [0, 16], sizes = [32, 16], strides = [1, 1]} : vector<32x64xbf16> to vector<32x16xbf16>
    %cst_81 = arith.constant dense<0.000000e+00> : vector<32x16xf32>
    %240 = tpu.matmul %238, %239, %cst_81 {dimension_numbers = #tpu.dot_dimension_numbers<[1], [0], [0], [1], [0, 0, 1, 1], [], []>} : vector<32x32xbf16>, vector<32x16xbf16>, vector<32x16xf32> -> vector<32x16xf32>
    %241 = arith.truncf %240 : vector<32x16xf32> to vector<32x16xbf16>
    %242 = vector.extract_strided_slice %201 {offsets = [16, 0], sizes = [16, 64], strides = [1, 1]} : vector<64x64xbf16> to vector<16x64xbf16>
    %cst_82 = arith.constant dense<0.000000e+00> : vector<32x64xf32>
    %243 = tpu.matmul %241, %242, %cst_82 {dimension_numbers = #tpu.dot_dimension_numbers<[1], [0], [0], [1], [0, 0, 1, 1], [], []>} : vector<32x16xbf16>, vector<16x64xbf16>, vector<32x64xf32> -> vector<32x64xf32>
    %244 = arith.addf %223, %243 : vector<32x64xf32>
    %245 = vector.extract_strided_slice %197 {offsets = [0, 32], sizes = [32, 16], strides = [1, 1]} : vector<32x64xbf16> to vector<32x16xbf16>
    %246 = vector.extract_strided_slice %198 {offsets = [0, 32], sizes = [32, 16], strides = [1, 1]} : vector<32x64xbf16> to vector<32x16xbf16>
    %cst_83 = arith.constant dense<0.000000e+00> : vector<32x32xf32>
    %247 = tpu.matmul %245, %246, %cst_83 {dimension_numbers = #tpu.dot_dimension_numbers<[1], [1], [0], [0], [0, 0, 1, 0], [], []>} : vector<32x16xbf16>, vector<32x16xbf16>, vector<32x32xf32> -> vector<32x32xf32>
    %248 = arith.addf %247, %14 : vector<32x32xf32>
    %cst_84 = arith.constant dense<0xFF800000> : vector<32xf32>
    %249 = vector.multi_reduction <maximumf>, %248, %cst_84 [1] : vector<32x32xf32> to vector<32xf32>
    %250 = vector.shape_cast %249 : vector<32xf32> to vector<32x1xf32>
    %251 = vector.broadcast %250 : vector<32x1xf32> to vector<32x32xf32>
    %252 = arith.subf %248, %251 : vector<32x32xf32>
    %253 = math.exp %252 : vector<32x32xf32>
    %cst_85 = arith.constant dense<0.000000e+00> : vector<32xf32>
    %254 = vector.multi_reduction <add>, %253, %cst_85 [1] : vector<32x32xf32> to vector<32xf32>
    %255 = vector.shape_cast %254 : vector<32xf32> to vector<32x1xf32>
    %256 = tpu.reciprocal %255 {approx = true} : vector<32x1xf32> -> vector<32x1xf32>
    %257 = vector.broadcast %256 : vector<32x1xf32> to vector<32x32xf32>
    %258 = arith.mulf %253, %257 : vector<32x32xf32>
    %259 = arith.truncf %258 : vector<32x32xf32> to vector<32x32xbf16>
    %260 = vector.extract_strided_slice %199 {offsets = [0, 32], sizes = [32, 16], strides = [1, 1]} : vector<32x64xbf16> to vector<32x16xbf16>
    %cst_86 = arith.constant dense<0.000000e+00> : vector<32x16xf32>
    %261 = tpu.matmul %259, %260, %cst_86 {dimension_numbers = #tpu.dot_dimension_numbers<[1], [0], [0], [1], [0, 0, 1, 1], [], []>} : vector<32x32xbf16>, vector<32x16xbf16>, vector<32x16xf32> -> vector<32x16xf32>
    %262 = arith.truncf %261 : vector<32x16xf32> to vector<32x16xbf16>
    %263 = vector.extract_strided_slice %201 {offsets = [32, 0], sizes = [16, 64], strides = [1, 1]} : vector<64x64xbf16> to vector<16x64xbf16>
    %cst_87 = arith.constant dense<0.000000e+00> : vector<32x64xf32>
    %264 = tpu.matmul %262, %263, %cst_87 {dimension_numbers = #tpu.dot_dimension_numbers<[1], [0], [0], [1], [0, 0, 1, 1], [], []>} : vector<32x16xbf16>, vector<16x64xbf16>, vector<32x64xf32> -> vector<32x64xf32>
    %265 = arith.addf %244, %264 : vector<32x64xf32>
    %266 = vector.extract_strided_slice %197 {offsets = [0, 48], sizes = [32, 16], strides = [1, 1]} : vector<32x64xbf16> to vector<32x16xbf16>
    %267 = vector.extract_strided_slice %198 {offsets = [0, 48], sizes = [32, 16], strides = [1, 1]} : vector<32x64xbf16> to vector<32x16xbf16>
    %cst_88 = arith.constant dense<0.000000e+00> : vector<32x32xf32>
    %268 = tpu.matmul %266, %267, %cst_88 {dimension_numbers = #tpu.dot_dimension_numbers<[1], [1], [0], [0], [0, 0, 1, 0], [], []>} : vector<32x16xbf16>, vector<32x16xbf16>, vector<32x32xf32> -> vector<32x32xf32>
    %269 = arith.addf %268, %14 : vector<32x32xf32>
    %cst_89 = arith.constant dense<0xFF800000> : vector<32xf32>
    %270 = vector.multi_reduction <maximumf>, %269, %cst_89 [1] : vector<32x32xf32> to vector<32xf32>
    %271 = vector.shape_cast %270 : vector<32xf32> to vector<32x1xf32>
    %272 = vector.broadcast %271 : vector<32x1xf32> to vector<32x32xf32>
    %273 = arith.subf %269, %272 : vector<32x32xf32>
    %274 = math.exp %273 : vector<32x32xf32>
    %cst_90 = arith.constant dense<0.000000e+00> : vector<32xf32>
    %275 = vector.multi_reduction <add>, %274, %cst_90 [1] : vector<32x32xf32> to vector<32xf32>
    %276 = vector.shape_cast %275 : vector<32xf32> to vector<32x1xf32>
    %277 = tpu.reciprocal %276 {approx = true} : vector<32x1xf32> -> vector<32x1xf32>
    %278 = vector.broadcast %277 : vector<32x1xf32> to vector<32x32xf32>
    %279 = arith.mulf %274, %278 : vector<32x32xf32>
    %280 = arith.truncf %279 : vector<32x32xf32> to vector<32x32xbf16>
    %281 = vector.extract_strided_slice %199 {offsets = [0, 48], sizes = [32, 16], strides = [1, 1]} : vector<32x64xbf16> to vector<32x16xbf16>
    %cst_91 = arith.constant dense<0.000000e+00> : vector<32x16xf32>
    %282 = tpu.matmul %280, %281, %cst_91 {dimension_numbers = #tpu.dot_dimension_numbers<[1], [0], [0], [1], [0, 0, 1, 1], [], []>} : vector<32x32xbf16>, vector<32x16xbf16>, vector<32x16xf32> -> vector<32x16xf32>
    %283 = arith.truncf %282 : vector<32x16xf32> to vector<32x16xbf16>
    %284 = vector.extract_strided_slice %201 {offsets = [48, 0], sizes = [16, 64], strides = [1, 1]} : vector<64x64xbf16> to vector<16x64xbf16>
    %cst_92 = arith.constant dense<0.000000e+00> : vector<32x64xf32>
    %285 = tpu.matmul %283, %284, %cst_92 {dimension_numbers = #tpu.dot_dimension_numbers<[1], [0], [0], [1], [0, 0, 1, 1], [], []>} : vector<32x16xbf16>, vector<16x64xbf16>, vector<32x64xf32> -> vector<32x64xf32>
    %286 = arith.addf %265, %285 : vector<32x64xf32>
    %287 = arith.addf %167, %286 : vector<32x64xf32>
    %c1_93 = arith.constant 1 : index
    %c0_94 = arith.constant 0 : index
    %c0_95 = arith.constant 0 : index
    %288 = vector.load %arg10[%c1_93, %c0_94, %c0_95] : memref<2x1x64xf32, #tpu.memory_space<vmem>>, vector<1x1x64xf32>
    %289 = vector.shape_cast %288 : vector<1x1x64xf32> to vector<1x64xf32>
    %290 = arith.mulf %287, %287 : vector<32x64xf32>
    %cst_96 = arith.constant dense<0.000000e+00> : vector<32xf32>
    %291 = vector.multi_reduction <add>, %290, %cst_96 [1] : vector<32x64xf32> to vector<32xf32>
    %292 = vector.shape_cast %291 : vector<32xf32> to vector<32x1xf32>
    %cst_97 = arith.constant 6.400000e+01 : f32
    %293 = vector.broadcast %cst_97 : f32 to vector<32x1xf32>
    %294 = arith.divf %292, %293 : vector<32x1xf32>
    %cst_98 = arith.constant 9.99999997E-7 : f32
    %295 = vector.broadcast %cst_98 : f32 to vector<32x1xf32>
    %296 = arith.addf %294, %295 : vector<32x1xf32>
    %297 = math.rsqrt %296 : vector<32x1xf32>
    %298 = vector.broadcast %297 : vector<32x1xf32> to vector<32x64xf32>
    %299 = arith.mulf %287, %298 : vector<32x64xf32>
    %300 = vector.broadcast %289 : vector<1x64xf32> to vector<32x64xf32>
    %301 = arith.mulf %299, %300 : vector<32x64xf32>
    %302 = arith.truncf %301 : vector<32x64xf32> to vector<32x64xbf16>
    %c1_99 = arith.constant 1 : index
    %c0_100 = arith.constant 0 : index
    %c0_101 = arith.constant 0 : index
    %303 = vector.load %arg11[%c1_99, %c0_100, %c0_101] : memref<2x64x256xbf16, #tpu.memory_space<vmem>>, vector<1x64x256xbf16>
    %304 = vector.shape_cast %303 : vector<1x64x256xbf16> to vector<64x256xbf16>
    %cst_102 = arith.constant dense<0.000000e+00> : vector<32x256xf32>
    %305 = tpu.matmul %302, %304, %cst_102 {dimension_numbers = #tpu.dot_dimension_numbers<[1], [0], [0], [1], [0, 0, 1, 1], [], []>} : vector<32x64xbf16>, vector<64x256xbf16>, vector<32x256xf32> -> vector<32x256xf32>
    %306 = vector.extract_strided_slice %305 {offsets = [0, 0], sizes = [32, 128], strides = [1, 1]} : vector<32x256xf32> to vector<32x128xf32>
    %307 = vector.extract_strided_slice %305 {offsets = [0, 128], sizes = [32, 128], strides = [1, 1]} : vector<32x256xf32> to vector<32x128xf32>
    %cst_103 = arith.constant 0.000000e+00 : f32
    %308 = vector.broadcast %cst_103 : f32 to vector<32x128xf32>
    %309 = arith.subf %308, %306 : vector<32x128xf32>
    %310 = math.exp %309 : vector<32x128xf32>
    %cst_104 = arith.constant 1.000000e+00 : f32
    %311 = vector.broadcast %cst_104 : f32 to vector<32x128xf32>
    %312 = arith.addf %311, %310 : vector<32x128xf32>
    %313 = tpu.reciprocal %312 {approx = true} : vector<32x128xf32> -> vector<32x128xf32>
    %314 = arith.mulf %306, %313 : vector<32x128xf32>
    %315 = arith.mulf %314, %307 : vector<32x128xf32>
    %316 = arith.truncf %315 : vector<32x128xf32> to vector<32x128xbf16>
    %c1_105 = arith.constant 1 : index
    %c0_106 = arith.constant 0 : index
    %c0_107 = arith.constant 0 : index
    %317 = vector.load %arg12[%c1_105, %c0_106, %c0_107] : memref<2x128x64xbf16, #tpu.memory_space<vmem>>, vector<1x128x64xbf16>
    %318 = vector.shape_cast %317 : vector<1x128x64xbf16> to vector<128x64xbf16>
    %cst_108 = arith.constant dense<0.000000e+00> : vector<32x64xf32>
    %319 = tpu.matmul %316, %318, %cst_108 {dimension_numbers = #tpu.dot_dimension_numbers<[1], [0], [0], [1], [0, 0, 1, 1], [], []>} : vector<32x128xbf16>, vector<128x64xbf16>, vector<32x64xf32> -> vector<32x64xf32>
    %320 = arith.addf %287, %319 : vector<32x64xf32>
    %c0_109 = arith.constant 0 : index
    %c0_110 = arith.constant 0 : index
    %321 = vector.load %arg13[%c0_109, %c0_110] : memref<1x64xf32, #tpu.memory_space<vmem>>, vector<1x64xf32>
    %322 = arith.mulf %320, %320 : vector<32x64xf32>
    %cst_111 = arith.constant dense<0.000000e+00> : vector<32xf32>
    %323 = vector.multi_reduction <add>, %322, %cst_111 [1] : vector<32x64xf32> to vector<32xf32>
    %324 = vector.shape_cast %323 : vector<32xf32> to vector<32x1xf32>
    %cst_112 = arith.constant 6.400000e+01 : f32
    %325 = vector.broadcast %cst_112 : f32 to vector<32x1xf32>
    %326 = arith.divf %324, %325 : vector<32x1xf32>
    %cst_113 = arith.constant 9.99999997E-7 : f32
    %327 = vector.broadcast %cst_113 : f32 to vector<32x1xf32>
    %328 = arith.addf %326, %327 : vector<32x1xf32>
    %329 = math.rsqrt %328 : vector<32x1xf32>
    %330 = vector.broadcast %329 : vector<32x1xf32> to vector<32x64xf32>
    %331 = arith.mulf %320, %330 : vector<32x64xf32>
    %332 = vector.broadcast %321 : vector<1x64xf32> to vector<32x64xf32>
    %333 = arith.mulf %331, %332 : vector<32x64xf32>
    %334 = arith.truncf %333 : vector<32x64xf32> to vector<32x64xbf16>
    %c0_114 = arith.constant 0 : index
    %c0_115 = arith.constant 0 : index
    %335 = vector.load %arg14[%c0_114, %c0_115] : memref<64x128xbf16, #tpu.memory_space<vmem>>, vector<64x128xbf16>
    %cst_116 = arith.constant dense<0.000000e+00> : vector<32x128xf32>
    %336 = tpu.matmul %334, %335, %cst_116 {dimension_numbers = #tpu.dot_dimension_numbers<[1], [0], [0], [1], [0, 0, 1, 1], [], []>} : vector<32x64xbf16>, vector<64x128xbf16>, vector<32x128xf32> -> vector<32x128xf32>
    %c0_117 = arith.constant 0 : index
    %c0_118 = arith.constant 0 : index
    %337 = vector.load %arg4[%c0_117, %c0_118] : memref<32x1xi32, #tpu.memory_space<vmem>>, vector<32x1xi32>
    %338 = tpu.iota {dimensions = array<i32: 1>} : vector<32x128xi32>
    %339 = vector.broadcast %337 : vector<32x1xi32> to vector<32x128xi32>
    %340 = arith.cmpi eq, %338, %339 : vector<32x128xi32>
    %cst_119 = arith.constant 0.000000e+00 : f32
    %341 = vector.broadcast %cst_119 : f32 to vector<32x128xf32>
    %342 = arith.select %340, %336, %341 : vector<32x128xi1>, vector<32x128xf32>
    %cst_120 = arith.constant dense<0.000000e+00> : vector<32xf32>
    %343 = vector.multi_reduction <add>, %342, %cst_120 [1] : vector<32x128xf32> to vector<32xf32>
    %344 = vector.shape_cast %343 : vector<32xf32> to vector<32x1xf32>
    %c0_i32 = arith.constant 0 : i32
    %345 = vector.broadcast %c0_i32 : i32 to vector<32x1xi32>
    %346 = arith.cmpi sge, %337, %345 : vector<32x1xi32>
    %347 = arith.extui %346 : vector<32x1xi1> to vector<32x1xi32>
    %348 = arith.sitofp %347 : vector<32x1xi32> to vector<32x1xf32>
    %cst_121 = arith.constant dense<0xFF800000> : vector<32xf32>
    %349 = vector.multi_reduction <maximumf>, %336, %cst_121 [1] : vector<32x128xf32> to vector<32xf32>
    %350 = vector.shape_cast %349 : vector<32xf32> to vector<32x1xf32>
    %351 = vector.broadcast %350 : vector<32x1xf32> to vector<32x128xf32>
    %352 = arith.subf %336, %351 : vector<32x128xf32>
    %353 = math.exp %352 : vector<32x128xf32>
    %cst_122 = arith.constant dense<0.000000e+00> : vector<32xf32>
    %354 = vector.multi_reduction <add>, %353, %cst_122 [1] : vector<32x128xf32> to vector<32xf32>
    %355 = vector.shape_cast %354 : vector<32xf32> to vector<32x1xf32>
    %356 = math.log %355 : vector<32x1xf32>
    %357 = arith.addf %350, %356 : vector<32x1xf32>
    %358 = arith.subf %357, %344 : vector<32x1xf32>
    %359 = arith.mulf %358, %348 : vector<32x1xf32>
    %360 = vector.shape_cast %359 : vector<32x1xf32> to vector<1x32x1xf32>
    %cst_123 = arith.constant dense<0.000000e+00> : vector<1xf32>
    %361 = vector.multi_reduction <add>, %360, %cst_123 [1, 2] : vector<1x32x1xf32> to vector<1xf32>
    %362 = vector.shape_cast %361 : vector<1xf32> to vector<1x1x1xf32>
    %363 = vector.extract %362[0, 0, 0] : f32 from vector<1x1x1xf32>
    %364 = vector.broadcast %363 : f32 to vector<1x1xf32>
    %365 = vector.shape_cast %348 : vector<32x1xf32> to vector<1x32x1xf32>
    %cst_124 = arith.constant dense<0.000000e+00> : vector<1xf32>
    %366 = vector.multi_reduction <add>, %365, %cst_124 [1, 2] : vector<1x32x1xf32> to vector<1xf32>
    %367 = vector.shape_cast %366 : vector<1xf32> to vector<1x1x1xf32>
    %368 = vector.extract %367[0, 0, 0] : f32 from vector<1x1x1xf32>
    %369 = vector.broadcast %368 : f32 to vector<1x1xf32>
    %370 = vector.shape_cast %364 : vector<1x1xf32> to vector<1x1xf32>
    %371 = vector.broadcast %370 : vector<1x1xf32> to vector<1x128xf32>
    %c0_125 = arith.constant 0 : index
    %c0_126 = arith.constant 0 : index
    %372 = vector.load %arg15[%c0_125, %c0_126] : memref<1x128xf32, #tpu.memory_space<vmem>>, vector<1x128xf32>
    tpu.vector_store %arg15[%c0_125, %c0_126], %371 {strides = array<i32>} : memref<1x128xf32, #tpu.memory_space<vmem>>, vector<1x128xf32>,
    %373 = vector.shape_cast %369 : vector<1x1xf32> to vector<1x1xf32>
    %374 = vector.broadcast %373 : vector<1x1xf32> to vector<1x128xf32>
    %c0_127 = arith.constant 0 : index
    %c0_128 = arith.constant 0 : index
    %375 = vector.load %arg16[%c0_127, %c0_128] : memref<1x128xf32, #tpu.memory_space<vmem>>, vector<1x128xf32>
    tpu.vector_store %arg16[%c0_127, %c0_128], %374 {strides = array<i32>} : memref<1x128xf32, #tpu.memory_space<vmem>>, vector<1x128xf32>,
    return
  }
  func.func @transform_0(%arg0: i32) -> (i32, i32) {
    %c0_i32 = arith.constant 0 : i32
    %c0_i32_0 = arith.constant 0 : i32
    return %arg0, %c0_i32 : i32, i32
  }
  func.func @transform_1(%arg0: i32) -> (i32, i32) {
    %c0_i32 = arith.constant 0 : i32
    %c0_i32_0 = arith.constant 0 : i32
    return %arg0, %c0_i32 : i32, i32
  }
  func.func @transform_2(%arg0: i32) -> (i32, i32) {
    %c0_i32 = arith.constant 0 : i32
    %c0_i32_0 = arith.constant 0 : i32
    return %arg0, %c0_i32 : i32, i32
  }
  func.func @transform_3(%arg0: i32) -> (i32, i32) {
    %c0_i32 = arith.constant 0 : i32
    %c0_i32_0 = arith.constant 0 : i32
    return %arg0, %c0_i32 : i32, i32
  }
  func.func @transform_4(%arg0: i32) -> (i32, i32) {
    %c0_i32 = arith.constant 0 : i32
    %c0_i32_0 = arith.constant 0 : i32
    return %arg0, %c0_i32 : i32, i32
  }
  func.func @transform_5(%arg0: i32) -> (i32, i32) {
    %c0_i32 = arith.constant 0 : i32
    %c0_i32_0 = arith.constant 0 : i32
    return %arg0, %c0_i32 : i32, i32
  }
  func.func @transform_6(%arg0: i32) -> (i32, i32, i32) {
    %c0_i32 = arith.constant 0 : i32
    %c0_i32_0 = arith.constant 0 : i32
    %c0_i32_1 = arith.constant 0 : i32
    %c0_i32_2 = arith.constant 0 : i32
    return %c0_i32, %c0_i32_0, %c0_i32_1 : i32, i32, i32
  }
  func.func @transform_7(%arg0: i32) -> (i32, i32, i32) {
    %c0_i32 = arith.constant 0 : i32
    %c0_i32_0 = arith.constant 0 : i32
    %c0_i32_1 = arith.constant 0 : i32
    %c0_i32_2 = arith.constant 0 : i32
    return %c0_i32, %c0_i32_0, %c0_i32_1 : i32, i32, i32
  }
  func.func @transform_8(%arg0: i32) -> (i32, i32, i32) {
    %c0_i32 = arith.constant 0 : i32
    %c0_i32_0 = arith.constant 0 : i32
    %c0_i32_1 = arith.constant 0 : i32
    %c0_i32_2 = arith.constant 0 : i32
    return %c0_i32, %c0_i32_0, %c0_i32_1 : i32, i32, i32
  }
  func.func @transform_9(%arg0: i32) -> (i32, i32, i32) {
    %c0_i32 = arith.constant 0 : i32
    %c0_i32_0 = arith.constant 0 : i32
    %c0_i32_1 = arith.constant 0 : i32
    %c0_i32_2 = arith.constant 0 : i32
    return %c0_i32, %c0_i32_0, %c0_i32_1 : i32, i32, i32
  }
  func.func @transform_10(%arg0: i32) -> (i32, i32, i32) {
    %c0_i32 = arith.constant 0 : i32
    %c0_i32_0 = arith.constant 0 : i32
    %c0_i32_1 = arith.constant 0 : i32
    %c0_i32_2 = arith.constant 0 : i32
    return %c0_i32, %c0_i32_0, %c0_i32_1 : i32, i32, i32
  }
  func.func @transform_11(%arg0: i32) -> (i32, i32, i32) {
    %c0_i32 = arith.constant 0 : i32
    %c0_i32_0 = arith.constant 0 : i32
    %c0_i32_1 = arith.constant 0 : i32
    %c0_i32_2 = arith.constant 0 : i32
    return %c0_i32, %c0_i32_0, %c0_i32_1 : i32, i32, i32
  }
  func.func @transform_12(%arg0: i32) -> (i32, i32) {
    %c0_i32 = arith.constant 0 : i32
    %c0_i32_0 = arith.constant 0 : i32
    %c0_i32_1 = arith.constant 0 : i32
    return %c0_i32, %c0_i32_0 : i32, i32
  }
  func.func @transform_13(%arg0: i32) -> (i32, i32) {
    %c0_i32 = arith.constant 0 : i32
    %c0_i32_0 = arith.constant 0 : i32
    %c0_i32_1 = arith.constant 0 : i32
    return %c0_i32, %c0_i32_0 : i32, i32
  }
  func.func @transform_14(%arg0: i32) -> (i32, i32) {
    %c0_i32 = arith.constant 0 : i32
    %c0_i32_0 = arith.constant 0 : i32
    return %arg0, %c0_i32 : i32, i32
  }
  func.func @transform_15(%arg0: i32) -> (i32, i32) {
    %c0_i32 = arith.constant 0 : i32
    %c0_i32_0 = arith.constant 0 : i32
    return %arg0, %c0_i32 : i32, i32
  }
}

</mosaic_0001>

<bundles_post_ra>
// kernel: tpu_custom_call.1
= control target key start
LH: loop header
LB: loop body
LE: loop exit
PB: predicated region body
PF: predicated region fallthrough
CT: control target
= control target key end

     0   :  { %21 = vsyncpa [#allocation3], 0  ;;  %s5555_s0 = inlined_call_operand.hbm [shape: f32[32,64], index: 0, kind: input, shape index: {}]   ;;  %s5556_s1 = inlined_call_operand.vmem [shape: s32[32,1], index: 1, kind: input, shape index: {}]   ;;  %s5557_s2 = inlined_call_operand.vmem [shape: s32[1,32], index: 2, kind: input, shape index: {}]   ;;  %s5558_s3 = inlined_call_operand.vmem [shape: s32[32,1], index: 3, kind: input, shape index: {}]   ;;  %s5559_s4 = inlined_call_operand.hbm [shape: f32[32,64], index: 4, kind: input, shape index: {}]   ;;  %s5560_s5 = inlined_call_operand.hbm [shape: f32[32,64], index: 5, kind: input, shape index: {}]   ;;  %s5561_s6 = inlined_call_operand.vmem [shape: f32[2,1,64], index: 6, kind: input, shape index: {}]   ;;  %s5562_s7 = inlined_call_operand.vmem [shape: bf16[2,64,320], index: 7, kind: input, shape index: {}]   ;;  %s5563_s8 = inlined_call_operand.vmem [shape: bf16[2,64,64], index: 8, kind: input, shape index: {}]   ;;  %s5564_s9 = inlined_call_operand.vmem [shape: f32[2,1,64], index: 9, kind: input, shape index: {}]   ;;  %s5565_s10 = inlined_call_operand.hbm [shape: bf16[2,64,256], index: 10, kind: input, shape index: {}]   ;;  %s5566_s11 = inlined_call_operand.vmem [shape: bf16[2,128,64], index: 11, kind: input, shape index: {}]   ;;  %s5567_s12 = inlined_call_operand.vmem [shape: f32[1,64], index: 12, kind: input, shape index: {}]   ;;  %s5568_s13 = inlined_call_operand.hbm [shape: bf16[64,128], index: 13, kind: input, shape index: {}]   ;;  %s5569_s14 = inlined_call_operand.hbm [shape: f32[1,128], index: 14, kind: output, shape index: {0}]   ;;  %s5570_s15 = inlined_call_operand.hbm [shape: f32[1,128], index: 15, kind: output, shape index: {1}]  }
   0x1   :  { %22 = vsyncpa [#allocation6], 0 }
   0x2   :  { %23 = vsyncpa [#allocation9], 0 }
   0x3   :  { %24 = vsyncpa [#allocation4], 0 }
   0x4   :  { %25 = vsyncpa [#allocation13], 0  ;;  %s4675_s18 = smov [#allocation5]   ;;  %s4676_s20 = smov [#allocation8]  }
   0x5   :  { %s49_s19 = sshll.u32 %s4675_s18, 4  ;;  %s81_s21 = sshll.u32 %s4676_s20, 4  ;;  %s50_s19 = int_to_ptr.vmem [resolvable:$true] %s49_s19  ;;  %s82_s21 = int_to_ptr.vmem [resolvable:$true] %s81_s21 }
   0x6   :  { %s4533_s22 = scalar_lea.vmem %s50_s19, 512  ;;  %p4538_p1 = scmp.lt.s32.totalorder %s50_s19, %s50_s19 }
   0x7   :  { %p4534_p0 = scmp.ne.s32.totalorder %s50_s19, %s4533_s22  ;;  %p4539_p2 = scmp.lt.s32.totalorder %s4533_s22, %s4533_s22 }
   0x9   :  { %p4540_p3 = por %p4539_p2, %p4538_p1 }
   0xb   :  { %p4541_p4 = pnand %p4540_p3, %p4534_p0 }
   0xd   :  { %4544 = shalt.err (!%p4541_p4)
}
   0xe   :  { %s4677_s23 = smov 128   ;;  %s4678_s24 = smov 8  }
   0xf   :  { %55 = dma.hbm_to_vmem [thread:$0]  %s5559_s4, 512, %s50_s19, [#allocation6], %s4677_s23, %s4677_s23, %s4678_s24  }
  0x10   :  { %s4553_s27 = scalar_lea.vmem %s82_s21, 2048  ;;  %p4558_p6 = scmp.lt.s32.totalorder %s82_s21, %s82_s21 }
  0x11   :  { %p4554_p5 = scmp.ne.s32.totalorder %s82_s21, %s4553_s27  ;;  %p4559_p7 = scmp.lt.s32.totalorder %s4553_s27, %s4553_s27 }
  0x13   :  { %p4560_p8 = por %p4559_p7, %p4558_p6 }
  0x15   :  { %p4561_p9 = pnand %p4560_p8, %p4554_p5 }
  0x17   :  { %4564 = shalt.err (!%p4561_p9)
}
  0x18   :  { %87 = dma.hbm_to_vmem [thread:$0]  %s5565_s10, 2048, %s82_s21, [#allocation9], %s4677_s23, %s4677_s23, %s4678_s24  }
  0x19   :  { %s4679_s30 = smov [#allocation2]   ;;  %s4680_s17 = smov [#allocation7]  }
  0x1a   :  { %s31_s16 = sshll.u32 %s4679_s30, 4  ;;  %s61_s18 = sshll.u32 %s4680_s17, 4  ;;  %s32_s16 = int_to_ptr.vmem [resolvable:$true] %s31_s16  ;;  %s62_s18 = int_to_ptr.vmem [resolvable:$true] %s61_s18 }
  0x1b   :  { %s4573_s4 = scalar_lea.vmem %s32_s16, 512  ;;  %p4578_p11 = scmp.lt.s32.totalorder %s32_s16, %s32_s16 }
  0x1c   :  { %p4574_p10 = scmp.ne.s32.totalorder %s32_s16, %s4573_s4  ;;  %p4579_p12 = scmp.lt.s32.totalorder %s4573_s4, %s4573_s4 }
  0x1e   :  { %p4580_p13 = por %p4579_p12, %p4578_p11 }
  0x20   :  { %p4581_p0 = pnand %p4580_p13, %p4574_p10 }
  0x22   :  { %4584 = shalt.err (!%p4581_p0)
}
  0x23   :  { %37 = dma.hbm_to_vmem [thread:$0]  %s5555_s0, 512, %s32_s16, [#allocation3], %s4677_s23, %s4677_s23, %s4678_s24  }
  0x24   :  { %s4593_s10 = scalar_lea.vmem %s62_s18, 512  ;;  %p4598_p2 = scmp.lt.s32.totalorder %s62_s18, %s62_s18 }
  0x25   :  { %p4594_p1 = scmp.ne.s32.totalorder %s62_s18, %s4593_s10  ;;  %p4599_p3 = scmp.lt.s32.totalorder %s4593_s10, %s4593_s10 }
  0x27   :  { %p4600_p4 = por %p4599_p3, %p4598_p2 }
  0x29   :  { %p4601_p5 = pnand %p4600_p4, %p4594_p1 }
  0x2b   :  { %4604 = shalt.err (!%p4601_p5)
}
  0x2c   :  { %67 = dma.hbm_to_vmem [thread:$0]  %s5560_s5, 512, %s62_s18, [#allocation6], %s4677_s23, %s4677_s23, %s4678_s24  }
  0x2d   :  { %s4681_s25 = smov [#allocation10]  }
  0x2e   :  { %s97_s26 = sshll.u32 %s4681_s25, 4  ;;  %s98_s26 = int_to_ptr.vmem [resolvable:$true] %s97_s26 }
  0x2f   :  { %s4613_s27 = scalar_lea.vmem %s98_s26, 512  ;;  %p4618_p7 = scmp.lt.s32.totalorder %s98_s26, %s98_s26 }
  0x30   :  { %p4614_p6 = scmp.ne.s32.totalorder %s98_s26, %s4613_s27  ;;  %p4619_p8 = scmp.lt.s32.totalorder %s4613_s27, %s4613_s27 }
  0x32   :  { %p4620_p9 = por %p4619_p8, %p4618_p7 }
  0x34   :  { %p4621_p10 = pnand %p4620_p9, %p4614_p6 }
  0x36   :  { %4624 = shalt.err (!%p4621_p10)
}
  0x37   :  { %s4682_s0 = smov 64   ;;  %s4683_s28 = smov 4  }
  0x38   :  { %103 = dma.hbm_to_vmem [thread:$0]  %s5568_s13, 512, %s98_s26, [#allocation9], %s4682_s0, %s4682_s0, %s4683_s28  }
  0x39   :  { %4665 = dma.done.wait [#allocation3], 512  }
  0x3a   :  { %4666 = vsyncadd [#allocation3], 4294966784 }
  0x3b   :  { %4667 = dma.done.wait [#allocation6], 1024  }
  0x3c   :  { %4668 = vsyncadd [#allocation6], 4294966272 }
  0x3d   :  { %4669 = dma.done.wait [#allocation9], 2560  }
  0x3e   :  { %4670 = vsyncadd [#allocation9], 4294964736  ;;  %v4801_v0 = vld [vmem:[#allocation2] sm:$0xff]  ;;  %vm181_vm0 = vcmask 523264   ;;  %v4803_v1 = vld [vmem:[#allocation2 + $0x10] sm:$0xff]  ;;  %v4684_v21 = vmov 0  }
  0x3f   :  { %v4805_v2 = vld [vmem:[#allocation2 + $0x8] sm:$0xff]  ;;  %v177_v3 = vmul.f32 %v4801_v0, %v4801_v0  ;;  %v179_v4 = vmul.f32 %v4803_v1, %v4803_v1  ;;  %v4813_v6 = vld [vmem:[#allocation2 + $0x18] sm:$0xff]  ;;  %v4221_v15 = vld [vmem:[%s5562_s7 + $0x34] ss:$12 sps:$4 sm:$0xff]   ;;  %341 = vmatprep.mubr.bf16.mxu0 %v4684_v21  ;;  %4216 = vset.pattern.permute.xlu1 %v4684_v21  ;;  %vm497_vm1 = vcmask 130048   ;;  %vm559_vm12 = vcmask 261120  }
  0x40   :  { %v178_v5 = vmul.f32 %v4805_v2, %v4805_v2  ;;  %v180_v7 = vmul.f32 %v4813_v6, %v4813_v6  ;;  %v4217_v12 = vld [vmem:[%s5562_s7 + $0x4c] ss:$12 sps:$4 sm:$0xff]   ;;  %v4219_v13 = vld [vmem:[%s5562_s7 + $0x48] ss:$12 sps:$4 sm:$0xff]   ;;  %v4220_v14 = vld [vmem:[%s5562_s7 + $0x50] ss:$12 sps:$4 sm:$0xff]   ;;  %4215 = vset.pattern.permute.xlu0 %v4684_v21 }
  0x41   :  { %v182_v8 = vsel %vm181_vm0, %v177_v3, 0.0  ;;  %v188_v9 = vsel %vm181_vm0, %v179_v4, 0.0  ;;  %v4224_v16 = vld [vmem:[%s5562_s7 + $0x38] ss:$12 sps:$4 sm:$0xff]   ;;  %317 = vmatprep.subr.bf16.mxu0 %v4217_v12  ;;  %3926 = vmatprep.subr.bf16.mxu1 %v4220_v14  ;;  %v4223_v17 = vld [vmem:[%s5562_s7 + $0x30] ss:$12 sps:$4 sm:$0xff]  }
  0x42   :  { %183 = vadd.xlane.f32.xlu0 %v182_v8  ;;  %189 = vadd.xlane.f32.xlu1 %v188_v9  ;;  %v185_v10 = vsel %vm181_vm0, %v178_v5, 0.0  ;;  %v191_v11 = vsel %vm181_vm0, %v180_v7, 0.0  ;;  %v4225_v18 = vld [vmem:[%s5562_s7 + $0x1c] ss:$12 sps:$4 sm:$0xff]   ;;  %v4228_v19 = vld [vmem:[%s5562_s7 + $0x20] ss:$12 sps:$4 sm:$0xff]  }
  0x43   :  { %318 = vmatpush1.bf16.msra.mxu0 %v4219_v13  ;;  %3927 = vmatpush3.bf16.msra.mxu1 %v4220_v14  ;;  %v4227_v20 = vld [vmem:[%s5562_s7 + $0x18] ss:$12 sps:$4 sm:$0xff]   ;;  %v4232_v23 = vld [vmem:[%s5562_s7 + $0x8] ss:$12 sps:$4 sm:$0xff]   ;;  %v4231_v24 = vld [vmem:[%s5562_s7] ss:$12 sps:$4 sm:$0xff]  }
  0x44   :  { %319 = vmatprep.subr.bf16.mxu0 %v4221_v15  ;;  %3928 = vmatprep.subr.bf16.mxu1 %v4224_v16  ;;  %v4229_v22 = vld [vmem:[%s5562_s7 + $0x4] ss:$12 sps:$4 sm:$0xff]   ;;  %v131_v25 = vld [vmem:[#allocation7 + $0x18] sm:$0xff]  ;;  %v129_v28 = vld [vmem:[#allocation7 + $0x8] sm:$0xff]  ;;  %s4687_s30 = smov 96   ;;  %s4688_s5 = smov 80  }
  0x45   :  { %v130_v26 = vld [vmem:[#allocation7 + $0x10] sm:$0xff]  ;;  %v128_v27 = vld [vmem:[#allocation7] sm:$0xff]  ;;  %s4691_s28 = smov [#allocation12]  }
  0x46   :  { %186 = vadd.xlane.f32.xlu0 %v185_v10  ;;  %192 = vadd.xlane.f32.xlu1 %v191_v11  ;;  %v3619_v46 = vld [vmem:[%s5561_s6] ss:$0 sm:$0xff] }
  0x47   :  { %320 = vmatpush1.bf16.msra.mxu0 %v4223_v17  ;;  %3929 = vmatpush3.bf16.msra.mxu1 %v4224_v16  ;;  %v139_v17 = vld [vmem:[%s5556_s1] sm:$0xff] }
  0x48   :  { %321 = vmatprep.subr.bf16.mxu0 %v4225_v18  ;;  %3930 = vmatprep.subr.bf16.mxu1 %v4228_v19 }
  0x4b   :  { %322 = vmatpush1.bf16.msra.mxu0 %v4227_v20  ;;  %3931 = vmatpush3.bf16.msra.mxu1 %v4228_v19  ;;  %v140_v19 = vld [vmem:[%s5556_s1 + $0x8] sm:$0xff]  ;;  %v142_v20 = vld [vmem:[%s5556_s1 + $0x18] sm:$0xff] }
  0x4c   :  { %323 = vmatprep.subr.bf16.mxu0 %v4229_v22  ;;  %3932 = vmatprep.subr.bf16.mxu1 %v4232_v23  ;;  %v141_v22 = vld [vmem:[%s5556_s1 + $0x10] sm:$0xff] }
  0x4f   :  { %324 = vmatpush1.bf16.msra.mxu0 %v4231_v24  ;;  %3933 = vmatpush3.bf16.msra.mxu1 %v4232_v23  ;;  %v126_v24 = vld [vmem:[#allocation5 + $0x10] sm:$0xff] }
  0x57   :  { %425 = vrot.lane.b32.xlu1 %v131_v25, %s4682_s0  ;;  %v127_v25 = vld [vmem:[#allocation5 + $0x18] sm:$0xff] }
  0x5b   :  { %419 = vrot.lane.b32.xlu1 %v128_v27, %s4682_s0 }
  0x5c   :  { %423 = vrot.lane.b32.xlu0 %v130_v26, %s4682_s0 }
  0x5f   :  { %421 = vrot.lane.b32.xlu1 %v129_v28, %s4682_s0 }
  0xcb   :  { %v184_v29 = vpop.xlane.xlu0 %183  ;;  %v190_v30 = vpop.xlane.xlu1 %189 }
  0xcc   :  { %v195_v31 = vmul.f32 0.015625, %v184_v29  ;;  %v197_v32 = vmul.f32 0.015625, %v190_v30 }
  0xce   :  { %v199_v33 = vadd.f32 1e-06, %v195_v31  ;;  %v201_v34 = vadd.f32 1e-06, %v197_v32  ;;  %v124_v32 = vld [vmem:[#allocation5] sm:$0xff] }
  0xcf   :  { %v187_v35 = vpop.xlane.xlu0 %186  ;;  %v193_v36 = vpop.xlane.xlu1 %192 }
  0xd0   :  { %4301 = vrsqrt.f32 %v199_v33  ;;  %v196_v37 = vmul.f32 0.015625, %v187_v35  ;;  %v198_v38 = vmul.f32 0.015625, %v193_v36  ;;  %v125_v33 = vld [vmem:[#allocation5 + $0x8] sm:$0xff] }
  0xd1   :  { %4303 = vrsqrt.f32 %v201_v34 }
  0xd2   :  { %v200_v39 = vadd.f32 1e-06, %v196_v37  ;;  %v202_v40 = vadd.f32 1e-06, %v198_v38 }
  0xd3   :  { %v4880_v62 = vpop.permute.xlu1 %425  ;;  %v4890_v4 = vpop.permute.xlu0 %423 }
  0xd4   :  { %4305 = vrsqrt.f32 %v200_v39 }
  0xd5   :  { %4307 = vrsqrt.f32 %v202_v40 }
  0xd7   :  { %v4894_v7 = vpop.permute.xlu1 %419 }
  0xdb   :  { %v4902_v12 = vpop.permute.xlu1 %421 }
  0xdd   :  { %v4302_v41 = vpop.eup %4301 }
  0xde   :  { %v4304_v42 = vpop.eup %4303  ;;  %v207_v44 = vmul.f32 %v4302_v41, %v4801_v0 }
  0xdf   :  { %v209_v43 = vmul.f32 %v4304_v42, %v4803_v1 }
  0xe0   :  { %v217_v51 = vmul.f32 %v3619_v46, %v207_v44 }
  0xe1   :  { %v4306_v45 = vpop.eup %4305  ;;  %v219_v50 = vmul.f32 %v3619_v46, %v209_v43 }
  0xe2   :  { %v4308_v47 = vpop.eup %4307  ;;  %v208_v48 = vmul.f32 %v4306_v45, %v4805_v2 }
  0xe3   :  { %v210_v49 = vmul.f32 %v4308_v47, %v4813_v6 }
  0xe4   :  { %v218_v52 = vmul.f32 %v3619_v46, %v208_v48 }
  0xe5   :  { %v220_v53 = vmul.f32 %v3619_v46, %v210_v49 }
  0xe6   :  { %v221_v54 = vpack.c.bf16 %v218_v52, %v217_v51 }
  0xe7   :  { %v222_v55 = vpack.c.bf16 %v220_v53, %v219_v50 }
  0xe8   :  { %3632 = vmatmul.mubr.msk.bf16.vlgmr.msra.gmra.mxu0 %vm181_vm0, %v221_v54  ;;  %3934 = vmatprep.mubr.msk.bf16.mxu1 %vm181_vm0, %v221_v54 }
  0xe9   :  { %3935 = vmatmul.mubr.msk.bf16.vlgmr.msra.gmra.mxu1 %vm181_vm0, %v222_v55  ;;  %351 = vmatprep.mubr.bf16.mxu0 %v4684_v21 }
  0xf0   :  { %3633 = vmatmul.mubr.msk.bf16.gmra.mxu0 %vm181_vm0, %v222_v55 }
 0x1a8   :  { %v4876_v56 = vpop.f32.mrf.mxu0 }
 0x1a9   :  { %v3936_v57 = vpop.f32.mrf.mxu1  ;;  %v431_v14 = vmul.f32 %v4894_v7, %v4876_v56  ;;  %v411_v42 = vmul.f32 %v4876_v56, %v124_v32 }
 0x1aa   :  { %v345_v58 = vpop.f32.mrf.mxu0 }
 0x1ab   :  { %v396_v59 = vpop.f32.mrf.mxu1  ;;  %v459_v11 = vmul.f32 %v4894_v7, %v345_v58  ;;  %v455_v34 = vmul.f32 %v345_v58, %v124_v32 }
 0x1ac   :  { %v4878_v60 = vpop.f32.mrf.mxu0 }
 0x1ad   :  { %v3937_v61 = vpop.f32.mrf.mxu1  ;;  %v432_v15 = vmul.f32 %v4902_v12, %v4878_v60  ;;  %v412_v43 = vmul.f32 %v4878_v60, %v125_v33 }
 0x1ae   :  { %v4882_v63 = vpack.c.bf16 %v3937_v61, %v3936_v57  ;;  %v349_v0 = vpop.f32.mrf.mxu0  ;;  %v132_v57 = vlaneseq }
 0x1af   :  { %v399_v1 = vpop.f32.mrf.mxu1  ;;  %v460_v13 = vmul.f32 %v4902_v12, %v349_v0  ;;  %v456_v35 = vmul.f32 %v349_v0, %v125_v33  ;;  %v3618_v0 = vld [vmem:[%s5557_s2] ss:$0 sm:$0xff]  ;;  %s4686_s2 = smov 112  }
 0x1b0   :  { %v4884_v2 = vpack.c.bf16 %v399_v1, %v396_v59  ;;  %v4886_v3 = vpop.f32.mrf.mxu0  ;;  %3946 = vmatprep.subr.bf16.mxu1 %v4882_v63  ;;  %v133_v59 = vshrl.u32 %v132_v57, 7  ;;  %v4952_v60 = vand.u32 127, %v132_v57 }
 0x1b1   :  { %3947 = vmatpush3.bf16.msra.mxu1 %v4882_v63  ;;  %v433_v16 = vmul.f32 %v4890_v4, %v4886_v3  ;;  %v413_v49 = vmul.f32 %v4886_v3, %v126_v24 }
 0x1b2   :  { %v355_v5 = vpop.f32.mrf.mxu0  ;;  %3948 = vmatprep.subr.bf16.mxu1 %v4884_v2  ;;  %v135_v61 = vadd.s32 16, %v133_v59  ;;  %vm164_vm2 = vcmp.le.s32.totalorder %v4952_v60, %v133_v59 }
 0x1b3   :  { %v461_v6 = vmul.f32 %v4890_v4, %v355_v5  ;;  %v457_v26 = vmul.f32 %v355_v5, %v126_v24  ;;  %v134_v5 = vadd.s32 8, %v133_v59 }
 0x1b4   :  { %v357_v8 = vpop.f32.mrf.mxu0  ;;  %vm166_vm4 = vcmp.le.s32.totalorder %v4952_v60, %v135_v61 }
 0x1b5   :  { %3949 = vmatpush3.bf16.msra.mxu1 %v4884_v2  ;;  %471 = vrot.lane.b32.xlu0 %v461_v6, %s4682_s0  ;;  %v434_v18 = vmul.f32 %v4880_v62, %v357_v8  ;;  %v414_v50 = vmul.f32 %v357_v8, %v127_v25  ;;  %v136_v6 = vadd.s32 24, %v133_v59  ;;  %vm165_vm8 = vcmp.le.s32.totalorder %v4952_v60, %v134_v5 }
 0x1b6   :  { %v359_v9 = vpop.f32.mrf.mxu0 }
 0x1b7   :  { %v462_v10 = vmul.f32 %v4880_v62, %v359_v9  ;;  %v458_v27 = vmul.f32 %v359_v9, %v127_v25  ;;  %v4685_v9 = vmov -1e+09   ;;  %vm167_vm10 = vcmp.le.s32.totalorder %v4952_v60, %v136_v6 }
 0x1b9   :  { %473 = vrot.lane.b32.xlu1 %v462_v10, %s4682_s0  ;;  %467 = vrot.lane.b32.xlu0 %v459_v11, %s4682_s0 }
 0x1bd   :  { %469 = vrot.lane.b32.xlu1 %v460_v13, %s4682_s0  ;;  %439 = vrot.lane.b32.xlu0 %v431_v14, %s4682_s0 }
 0x1c1   :  { %441 = vrot.lane.b32.xlu1 %v432_v15, %s4682_s0  ;;  %443 = vrot.lane.b32.xlu0 %v433_v16, %s4682_s0 }
 0x1c5   :  { %445 = vrot.lane.b32.xlu1 %v434_v18, %s4682_s0  ;;  %145 = vperm.xlu0 %4215, %v139_v17  }
 0x1c9   :  { %148 = vperm.xlu1 %4216, %v140_v19   ;;  %154 = vperm.xlu0 %4215, %v142_v20  }
 0x1cd   :  { %151 = vperm.xlu1 %4216, %v141_v22  }
 0x227   :  { %v472_v23 = vpop.permute.xlu0 %471 }
 0x228   :  { %v481_v30 = vadd.f32 %v472_v23, %v457_v26 }
 0x22b   :  { %v474_v28 = vpop.permute.xlu1 %473  ;;  %v468_v29 = vpop.permute.xlu0 %467 }
 0x22c   :  { %v482_v31 = vadd.f32 %v474_v28, %v458_v27  ;;  %v479_v39 = vadd.f32 %v468_v29, %v455_v34 }
 0x22e   :  { %v4929_v36 = vpack.c.bf16 %v482_v31, %v481_v30 }
 0x22f   :  { %v470_v37 = vpop.permute.xlu1 %469  ;;  %v440_v38 = vpop.permute.xlu0 %439 }
 0x230   :  { %v480_v40 = vadd.f32 %v470_v37, %v456_v35  ;;  %4178 = vmatprep.subr.msk.bf16.mxu0 %vm497_vm1, %v4929_v36  ;;  %v508_v41 = vsel %vm497_vm1, %v4929_v36, 0  ;;  %v451_v46 = vadd.f32 %v440_v38, %v411_v42 }
 0x231   :  { %3939 = vmatpush3.bf16.xpose.msra.mxu0 %v508_v41 }
 0x232   :  { %v4937_v44 = vpack.c.bf16 %v480_v40, %v479_v39 }
 0x233   :  { %v442_v45 = vpop.permute.xlu1 %441  ;;  %v444_v48 = vpop.permute.xlu0 %443 }
 0x234   :  { %v452_v47 = vadd.f32 %v442_v45, %v412_v43  ;;  %4179 = vmatprep.subr.msk.bf16.mxu0 %vm497_vm1, %v4937_v44  ;;  %v453_v53 = vadd.f32 %v444_v48, %v413_v49  ;;  %v505_v55 = vsel %vm497_vm1, %v4937_v44, 0 }
 0x236   :  { %v4942_v51 = vpack.c.bf16 %v452_v47, %v451_v46 }
 0x237   :  { %v446_v52 = vpop.permute.xlu1 %445 }
 0x238   :  { %v454_v54 = vadd.f32 %v446_v52, %v414_v50  ;;  %3942 = vmatprep.mubr.msk.bf16.mxu0 %vm497_vm1, %v4942_v51 }
 0x239   :  { %3941 = vmatpush3.bf16.xpose.msra.mxu0 %v505_v55 }
 0x23a   :  { %v4948_v56 = vpack.c.bf16 %v454_v54, %v453_v53 }
 0x240   :  { %3943 = vmatmul.mubr.msk.bf16.vlgmr.msra.gmra.mxu0 %vm497_vm1, %v4948_v56  ;;  %v146_v3 = vpop.permute.xlu0 %145 }
 0x241   :  { %vm160_vm3 = vcmp.eq.s32.totalorder %v146_v3, %v3618_v0 }
 0x242   :  { %vm168_vm6 = vmand %vm160_vm3, %vm164_vm2 }
 0x243   :  { %v4960_v10 = vsel %vm168_vm6, 0.0, %v4685_v9 }
 0x244   :  { %v149_v58 = vpop.permute.xlu1 %148  ;;  %v155_v8 = vpop.permute.xlu0 %154 }
 0x245   :  { %vm161_vm9 = vcmp.eq.s32.totalorder %v149_v58, %v3618_v0  ;;  %vm163_vm11 = vcmp.eq.s32.totalorder %v155_v8, %v3618_v0 }
 0x246   :  { %vm169_vm13 = vmand %vm161_vm9, %vm165_vm8 }
 0x247   :  { %vm171_vm14 = vmand %vm163_vm11, %vm167_vm10  ;;  %v4969_v20 = vsel %vm169_vm13, 0.0, %v4685_v9 }
 0x248   :  { %v152_v1 = vpop.permute.xlu1 %151  ;;  %v4971_v22 = vsel %vm171_vm14, 0.0, %v4685_v9 }
 0x249   :  { %vm162_vm5 = vcmp.eq.s32.totalorder %v152_v1, %v3618_v0 }
 0x24a   :  { %vm170_vm7 = vmand %vm162_vm5, %vm166_vm4  ;;  %vm3550_vm4 = vcmask 7168  }
 0x24b   :  { %v4962_v11 = vsel %vm170_vm7, 0.0, %v4685_v9 }
 0x300   :  { %v3944_v13 = vpop.f32.mrf.mxu0 }
 0x301   :  { %v553_v14 = vadd.f32 %v3944_v13, %v4962_v11 }
 0x302   :  { %v544_v15 = vpop.f32.mrf.mxu0 }
 0x303   :  { %v545_v16 = vadd.f32 %v544_v15, %v4960_v10  ;;  %v566_v17 = vsel %vm559_vm12, %v553_v14, -inf }
 0x304   :  { %567 = vmax.xlane.f32.xlu0 %v566_v17  ;;  %v3945_v18 = vpop.f32.mrf.mxu0  ;;  %v4233_v17 = vld [vmem:[%s5563_s8] sm:$0xff]  }
 0x305   :  { %v560_v19 = vsel %vm559_vm12, %v545_v16, -inf  ;;  %v556_v25 = vadd.f32 %v3945_v18, %v4971_v22 }
 0x306   :  { %v547_v23 = vpop.f32.mrf.mxu0  ;;  %561 = vmax.xlane.f32.xlu1 %v560_v19 }
 0x307   :  { %v548_v24 = vadd.f32 %v547_v23, %v4969_v20  ;;  %v569_v27 = vsel %vm559_vm12, %v556_v25, -inf }
 0x309   :  { %v563_v26 = vsel %vm559_vm12, %v548_v24, -inf }
 0x30a   :  { %564 = vmax.xlane.f32.xlu0 %v563_v26 }
 0x30e   :  { %570 = vmax.xlane.f32.xlu0 %v569_v27 }
 0x38d   :  { %v568_v28 = vpop.xlane.xlu0 %567 }
 0x38e   :  { %v574_v29 = vsub.f32 %v553_v14, %v568_v28 }
 0x38f   :  { %v562_v30 = vpop.xlane.xlu1 %561 }
 0x390   :  { %v580_v31 = vmul.f32 1.442695, %v574_v29  ;;  %v572_v32 = vsub.f32 %v545_v16, %v562_v30 }
 0x392   :  { %4309 = vpow2.f32 %v580_v31  ;;  %v576_v33 = vmul.f32 1.442695, %v572_v32 }
 0x393   :  { %v565_v34 = vpop.xlane.xlu0 %564 }
 0x394   :  { %4311 = vpow2.f32 %v576_v33  ;;  %v573_v35 = vsub.f32 %v548_v24, %v565_v34 }
 0x396   :  { %v578_v37 = vmul.f32 1.442695, %v573_v35 }
 0x397   :  { %v571_v38 = vpop.xlane.xlu0 %570 }
 0x398   :  { %4313 = vpow2.f32 %v578_v37  ;;  %v575_v39 = vsub.f32 %v556_v25, %v571_v38 }
 0x39a   :  { %v582_v40 = vmul.f32 1.442695, %v575_v39 }
 0x39c   :  { %4315 = vpow2.f32 %v582_v40 }
 0x39f   :  { %v4310_v41 = vpop.eup %4309 }
 0x3a0   :  { %v590_v42 = vsel %vm559_vm12, %v4310_v41, 0.0 }
 0x3a1   :  { %v4312_v43 = vpop.eup %4311  ;;  %591 = vadd.xlane.f32.xlu1 %v590_v42 }
 0x3a2   :  { %v584_v45 = vsel %vm559_vm12, %v4312_v43, 0.0 }
 0x3a5   :  { %v4314_v46 = vpop.eup %4313  ;;  %585 = vadd.xlane.f32.xlu1 %v584_v45 }
 0x3a6   :  { %v587_v47 = vsel %vm559_vm12, %v4314_v46, 0.0 }
 0x3a7   :  { %588 = vadd.xlane.f32.xlu0 %v587_v47 }
 0x3a9   :  { %v4316_v48 = vpop.eup %4315 }
 0x3aa   :  { %v593_v49 = vsel %vm559_vm12, %v4316_v48, 0.0 }
 0x3ab   :  { %594 = vadd.xlane.f32.xlu0 %v593_v49 }
 0x3b6   :  { %673 = vrot.lane.b32.xlu1 %v4929_v36, %s4686_s2 }
 0x3ba   :  { %665 = vrot.lane.b32.xlu1 %v4942_v51, %s4686_s2 }
 0x3be   :  { %667 = vrot.lane.b32.xlu1 %v4948_v56, %s4686_s2 }
 0x3c1   :  { %671 = vrot.lane.b32.xlu0 %v4937_v44, %s4686_s2 }
 0x42a   :  { %v592_v50 = vpop.xlane.xlu1 %591 }
 0x42e   :  { %v586_v52 = vpop.xlane.xlu1 %585 }
 0x42f   :  { %4317 = vrcp.f32 %v586_v52 }
 0x430   :  { %v589_v53 = vpop.xlane.xlu0 %588 }
 0x431   :  { %4319 = vrcp.f32 %v589_v53 }
 0x432   :  { %v674_v54 = vpop.permute.xlu1 %673  ;;  %4321 = vrcp.f32 %v592_v50 }
 0x433   :  { %4180 = vmatprep.subr.msk.bf16.mxu1 %vm497_vm1, %v674_v54  ;;  %v685_v13 = vsel %vm497_vm1, %v674_v54, 0 }
 0x434   :  { %v595_v55 = vpop.xlane.xlu0 %594 }
 0x435   :  { %4323 = vrcp.f32 %v595_v55 }
 0x436   :  { %v666_v9 = vpop.permute.xlu1 %665 }
 0x438   :  { %v672_v14 = vpop.permute.xlu0 %671 }
 0x439   :  { %v682_v15 = vsel %vm497_vm1, %v672_v14, 0 }
 0x43a   :  { %v668_v16 = vpop.permute.xlu1 %667 }
 0x43c   :  { %v4318_v57 = vpop.eup %4317 }
 0x43d   :  { %v600_v59 = vmul.f32 %v4318_v57, %v4312_v43 }
 0x43e   :  { %v4320_v58 = vpop.eup %4319 }
 0x43f   :  { %v601_v61 = vmul.f32 %v4320_v58, %v4314_v46  ;;  %v4322_v0 = vpop.eup %4321 }
 0x440   :  { %v602_v5 = vmul.f32 %v4322_v0, %v4310_v41 }
 0x441   :  { %v604_v1 = vpack.c.bf16 %v601_v61, %v600_v59 }
 0x442   :  { %v4324_v3 = vpop.eup %4323 }
 0x443   :  { %3950 = vmatprep.mubr.msk.bf16.mxu1 %vm559_vm12, %v604_v1  ;;  %v603_v6 = vmul.f32 %v4324_v3, %v4316_v48 }
 0x445   :  { %v605_v8 = vpack.c.bf16 %v603_v6, %v602_v5 }
 0x447   :  { %3951 = vmatmul.mubr.msk.bf16.vlgmr.msra.gmra.mxu1 %vm559_vm12, %v605_v8 }
 0x448   :  { %3955 = vmatpush3.bf16.xpose.msra.mxu1 %v685_v13  ;;  %3958 = vmatprep.mubr.msk.bf16.mxu1 %vm497_vm1, %v666_v9 }
 0x449   :  { %4181 = vmatprep.subr.msk.bf16.mxu1 %vm497_vm1, %v672_v14 }
 0x450   :  { %3957 = vmatpush3.bf16.xpose.msra.mxu1 %v682_v15 }
 0x451   :  { %3976 = vmatprep.subr.bf16.mxu1 %v4233_v17 }
 0x457   :  { %3959 = vmatmul.mubr.msk.bf16.vlgmr.msra.gmra.mxu1 %vm497_vm1, %v668_v16 }
 0x458   :  { %3977 = vmatpush3.bf16.msra.mxu1 %v4233_v17 }
 0x507   :  { %v3952_v18 = vpop.f32.mrf.mxu1 }
 0x509   :  { %v646_v19 = vpop.f32.mrf.mxu1 }
 0x50b   :  { %v3953_v23 = vpop.f32.mrf.mxu1 }
 0x50c   :  { %v662_v26 = vpack.c.bf16 %v3953_v23, %v3952_v18 }
 0x50d   :  { %v649_v24 = vpop.f32.mrf.mxu1 }
 0x50e   :  { %v661_v25 = vpack.c.bf16 %v649_v24, %v646_v19 }
 0x510   :  { %3978 = vmatprep.mubr.msk.bf16.mxu1 %vm497_vm1, %v661_v25 }
 0x511   :  { %3979 = vmatmul.mubr.msk.bf16.vlgmr.msra.gmra.mxu1 %vm497_vm1, %v662_v26 }
 0x517   :  { %v3960_v27 = vpop.f32.mrf.mxu1 }
 0x518   :  { %v730_v28 = vadd.f32 %v3960_v27, %v4962_v11 }
 0x519   :  { %v721_v29 = vpop.f32.mrf.mxu1 }
 0x51a   :  { %v722_v30 = vadd.f32 %v721_v29, %v4960_v10  ;;  %v742_v31 = vsel %vm559_vm12, %v730_v28, -inf }
 0x51b   :  { %743 = vmax.xlane.f32.xlu0 %v742_v31  ;;  %v3961_v32 = vpop.f32.mrf.mxu1 }
 0x51c   :  { %v736_v33 = vsel %vm559_vm12, %v722_v30, -inf  ;;  %v733_v37 = vadd.f32 %v3961_v32, %v4971_v22 }
 0x51d   :  { %v724_v34 = vpop.f32.mrf.mxu1  ;;  %737 = vmax.xlane.f32.xlu1 %v736_v33 }
 0x51e   :  { %v725_v35 = vadd.f32 %v724_v34, %v4969_v20  ;;  %v745_v39 = vsel %vm559_vm12, %v733_v37, -inf }
 0x520   :  { %v739_v38 = vsel %vm559_vm12, %v725_v35, -inf }
 0x521   :  { %740 = vmax.xlane.f32.xlu0 %v739_v38 }
 0x525   :  { %746 = vmax.xlane.f32.xlu0 %v745_v39 }
 0x5a4   :  { %v744_v40 = vpop.xlane.xlu0 %743 }
 0x5a5   :  { %v750_v41 = vsub.f32 %v730_v28, %v744_v40 }
 0x5a6   :  { %v738_v42 = vpop.xlane.xlu1 %737 }
 0x5a7   :  { %v756_v43 = vmul.f32 1.442695, %v750_v41  ;;  %v748_v45 = vsub.f32 %v722_v30, %v738_v42 }
 0x5a9   :  { %4325 = vpow2.f32 %v756_v43  ;;  %v752_v46 = vmul.f32 1.442695, %v748_v45 }
 0x5aa   :  { %v741_v47 = vpop.xlane.xlu0 %740 }
 0x5ab   :  { %4327 = vpow2.f32 %v752_v46  ;;  %v749_v48 = vsub.f32 %v725_v35, %v741_v47 }
 0x5ad   :  { %v754_v52 = vmul.f32 1.442695, %v749_v48 }
 0x5ae   :  { %v747_v49 = vpop.xlane.xlu0 %746 }
 0x5af   :  { %v751_v50 = vsub.f32 %v733_v37, %v747_v49 }
 0x5b1   :  { %v758_v53 = vmul.f32 1.442695, %v751_v50 }
 0x5b3   :  { %4329 = vpow2.f32 %v758_v53 }
 0x5b4   :  { %4331 = vpow2.f32 %v754_v52 }
 0x5b6   :  { %v4326_v54 = vpop.eup %4325 }
 0x5b7   :  { %v766_v55 = vsel %vm559_vm12, %v4326_v54, 0.0 }
 0x5b8   :  { %v4328_v57 = vpop.eup %4327  ;;  %767 = vadd.xlane.f32.xlu1 %v766_v55 }
 0x5b9   :  { %v760_v58 = vsel %vm559_vm12, %v4328_v57, 0.0 }
 0x5bc   :  { %761 = vadd.xlane.f32.xlu1 %v760_v58 }
 0x5c0   :  { %v4330_v59 = vpop.eup %4329 }
 0x5c1   :  { %v769_v61 = vsel %vm559_vm12, %v4330_v59, 0.0  ;;  %v4332_v0 = vpop.eup %4331 }
 0x5c2   :  { %770 = vadd.xlane.f32.xlu0 %v769_v61  ;;  %v763_v1 = vsel %vm559_vm12, %v4332_v0, 0.0 }
 0x5c6   :  { %764 = vadd.xlane.f32.xlu0 %v763_v1 }
 0x5cd   :  { %786 = vrot.lane.b32.xlu1 %v4882_v63, %s4686_s2 }
 0x5d1   :  { %975 = vrot.lane.b32.xlu1 %v4929_v36, %s4687_s30 }
 0x5d5   :  { %973 = vrot.lane.b32.xlu1 %v4937_v44, %s4687_s30 }
 0x5d9   :  { %969 = vrot.lane.b32.xlu1 %v4942_v51, %s4687_s30 }
 0x5dc   :  { %784 = vrot.lane.b32.xlu0 %v4884_v2, %s4686_s2 }
 0x5dd   :  { %1218 = vrot.lane.b32.xlu1 %v4929_v36, %s4688_s5 }
 0x5e0   :  { %971 = vrot.lane.b32.xlu0 %v4948_v56, %s4687_s30 }
 0x5e1   :  { %1212 = vrot.lane.b32.xlu1 %v4942_v51, %s4688_s5  ;;  %v4234_v51 = vld [vmem:[%s5563_s8 + $0x8] sm:$0xff]  }
 0x5e4   :  { %1216 = vrot.lane.b32.xlu0 %v4937_v44, %s4688_s5 }
 0x5e8   :  { %1214 = vrot.lane.b32.xlu0 %v4948_v56, %s4688_s5 }
 0x641   :  { %v768_v3 = vpop.xlane.xlu1 %767 }
 0x645   :  { %v762_v5 = vpop.xlane.xlu1 %761 }
 0x649   :  { %v787_v6 = vpop.permute.xlu1 %786 }
 0x64a   :  { %3962 = vmatprep.subr.bf16.mxu0 %v787_v6 }
 0x64b   :  { %v771_v8 = vpop.xlane.xlu0 %770  ;;  %3963 = vmatpush3.bf16.msra.mxu0 %v787_v6 }
 0x64c   :  { %4333 = vrcp.f32 %v771_v8 }
 0x64d   :  { %4335 = vrcp.f32 %v762_v5  ;;  %v976_v24 = vpop.permute.xlu1 %975 }
 0x64e   :  { %4337 = vrcp.f32 %v768_v3  ;;  %v987_v33 = vsel %vm497_vm1, %v976_v24, 0 }
 0x64f   :  { %v765_v36 = vpop.xlane.xlu0 %764 }
 0x650   :  { %4339 = vrcp.f32 %v765_v36 }
 0x651   :  { %v974_v27 = vpop.permute.xlu1 %973 }
 0x652   :  { %v984_v34 = vsel %vm497_vm1, %v974_v27, 0 }
 0x653   :  { %v785_v9 = vpop.permute.xlu0 %784 }
 0x654   :  { %3964 = vmatprep.subr.bf16.mxu0 %v785_v9 }
 0x655   :  { %3965 = vmatpush3.bf16.msra.mxu0 %v785_v9  ;;  %v970_v32 = vpop.permute.xlu1 %969 }
 0x656   :  { %3970 = vmatprep.subr.bf16.mxu0 %v4234_v51 }
 0x657   :  { %v972_v37 = vpop.permute.xlu0 %971 }
 0x659   :  { %v4334_v44 = vpop.eup %4333  ;;  %v1219_v35 = vpop.permute.xlu1 %1218 }
 0x65a   :  { %v4336_v56 = vpop.eup %4335  ;;  %v779_v15 = vmul.f32 %v4334_v44, %v4330_v59  ;;  %v1230_v39 = vsel %vm497_vm1, %v1219_v35, 0 }
 0x65b   :  { %v4338_v13 = vpop.eup %4337  ;;  %v776_v16 = vmul.f32 %v4336_v56, %v4328_v57  ;;  %v1217_v40 = vpop.permute.xlu0 %1216 }
 0x65c   :  { %v778_v18 = vmul.f32 %v4338_v13, %v4326_v54  ;;  %v1227_v41 = vsel %vm497_vm1, %v1217_v40, 0 }
 0x65d   :  { %v4340_v14 = vpop.eup %4339  ;;  %v1213_v38 = vpop.permute.xlu1 %1212 }
 0x65e   :  { %v777_v17 = vmul.f32 %v4340_v14, %v4332_v0  ;;  %v781_v23 = vpack.c.bf16 %v779_v15, %v778_v18 }
 0x65f   :  { %v1215_v42 = vpop.permute.xlu0 %1214 }
 0x660   :  { %v780_v19 = vpack.c.bf16 %v777_v17, %v776_v16 }
 0x662   :  { %3966 = vmatprep.mubr.msk.bf16.mxu0 %vm559_vm12, %v780_v19 }
 0x663   :  { %3967 = vmatmul.mubr.msk.bf16.vlgmr.msra.gmra.mxu0 %vm559_vm12, %v781_v23 }
 0x664   :  { %3971 = vmatpush3.bf16.msra.mxu0 %v4234_v51 }
 0x665   :  { %4182 = vmatprep.subr.msk.bf16.mxu0 %vm497_vm1, %v976_v24 }
 0x723   :  { %v3968_v25 = vpop.f32.mrf.mxu0 }
 0x725   :  { %v830_v26 = vpop.f32.mrf.mxu0 }
 0x727   :  { %v3969_v28 = vpop.f32.mrf.mxu0 }
 0x728   :  { %v846_v31 = vpack.c.bf16 %v3969_v28, %v3968_v25 }
 0x729   :  { %v833_v29 = vpop.f32.mrf.mxu0 }
 0x72a   :  { %v845_v30 = vpack.c.bf16 %v833_v29, %v830_v26 }
 0x72c   :  { %3972 = vmatprep.mubr.msk.bf16.mxu0 %vm497_vm1, %v845_v30 }
 0x72d   :  { %3973 = vmatmul.mubr.msk.bf16.vlgmr.msra.gmra.mxu0 %vm497_vm1, %v846_v31 }
 0x72e   :  { %3983 = vmatpush3.bf16.xpose.msra.mxu0 %v987_v33  ;;  %3986 = vmatprep.mubr.msk.bf16.mxu0 %vm497_vm1, %v970_v32 }
 0x72f   :  { %4183 = vmatprep.subr.msk.bf16.mxu0 %vm497_vm1, %v974_v27 }
 0x736   :  { %3985 = vmatpush3.bf16.xpose.msra.mxu0 %v984_v34 }
 0x737   :  { %4184 = vmatprep.subr.msk.bf16.mxu0 %vm497_vm1, %v1219_v35 }
 0x73d   :  { %3987 = vmatmul.mubr.msk.bf16.vlgmr.msra.gmra.mxu0 %vm497_vm1, %v972_v37 }
 0x73e   :  { %4005 = vmatpush3.bf16.xpose.msra.mxu0 %v1230_v39  ;;  %4008 = vmatprep.mubr.msk.bf16.mxu0 %vm497_vm1, %v1213_v38 }
 0x73f   :  { %4185 = vmatprep.subr.msk.bf16.mxu0 %vm497_vm1, %v1217_v40 }
 0x746   :  { %4007 = vmatpush3.bf16.xpose.msra.mxu0 %v1227_v41 }
 0x74d   :  { %4009 = vmatmul.mubr.msk.bf16.vlgmr.msra.gmra.mxu0 %vm497_vm1, %v1215_v42 }
 0x74e   :  { %1590 = vmatprep.mubr.bf16.mxu0 %v4684_v21 }
 0x7ed   :  { %v5054_v43 = vpop.f32.mrf.mxu0 }
 0x7ef   :  { %v5056_v45 = vpop.f32.mrf.mxu0 }
 0x7f1   :  { %v5058_v46 = vpop.f32.mrf.mxu0 }
 0x7f3   :  { %v5060_v47 = vpop.f32.mrf.mxu0 }
 0x7fd   :  { %v3988_v48 = vpop.f32.mrf.mxu0 }
 0x7fe   :  { %v1032_v49 = vadd.f32 %v3988_v48, %v4962_v11 }
 0x7ff   :  { %v1023_v50 = vpop.f32.mrf.mxu0 }
 0x800   :  { %v1024_v52 = vadd.f32 %v1023_v50, %v4960_v10  ;;  %v1044_v53 = vsel %vm559_vm12, %v1032_v49, -inf }
 0x801   :  { %1045 = vmax.xlane.f32.xlu0 %v1044_v53  ;;  %v3989_v54 = vpop.f32.mrf.mxu0 }
 0x802   :  { %v1038_v55 = vsel %vm559_vm12, %v1024_v52, -inf  ;;  %v1035_v59 = vadd.f32 %v3989_v54, %v4971_v22 }
 0x803   :  { %v1026_v57 = vpop.f32.mrf.mxu0  ;;  %1039 = vmax.xlane.f32.xlu1 %v1038_v55 }
 0x804   :  { %v1027_v58 = vadd.f32 %v1026_v57, %v4969_v20  ;;  %v1047_v0 = vsel %vm559_vm12, %v1035_v59, -inf }
 0x806   :  { %v1041_v61 = vsel %vm559_vm12, %v1027_v58, -inf }
 0x807   :  { %1042 = vmax.xlane.f32.xlu0 %v1041_v61 }
 0x80b   :  { %1048 = vmax.xlane.f32.xlu0 %v1047_v0 }
 0x80d   :  { %v4010_v26 = vpop.f32.mrf.mxu0 }
 0x80e   :  { %v1275_v30 = vadd.f32 %v4010_v26, %v4962_v11  ;;  %v4235_v26 = vld [vmem:[%s5563_s8 + $0x10] sm:$0xff]  }
 0x80f   :  { %v1266_v27 = vpop.f32.mrf.mxu0 }
 0x810   :  { %v1267_v28 = vadd.f32 %v1266_v27, %v4960_v10  ;;  %v1287_v33 = vsel %vm559_vm12, %v1275_v30, -inf  ;;  %v3980_v27 = vpop.f32.mrf.mxu1 }
 0x811   :  { %v4011_v29 = vpop.f32.mrf.mxu0 }
 0x812   :  { %v1281_v31 = vsel %vm559_vm12, %v1267_v28, -inf  ;;  %v1278_v35 = vadd.f32 %v4011_v29, %v4971_v22 }
 0x813   :  { %v1269_v32 = vpop.f32.mrf.mxu0 }
 0x814   :  { %v1270_v34 = vadd.f32 %v1269_v32, %v4969_v20  ;;  %v1290_v38 = vsel %vm559_vm12, %v1278_v35, -inf }
 0x816   :  { %v1284_v37 = vsel %vm559_vm12, %v1270_v34, -inf }
 0x88a   :  { %v1046_v1 = vpop.xlane.xlu0 %1045 }
 0x88b   :  { %v1052_v3 = vsub.f32 %v1032_v49, %v1046_v1 }
 0x88c   :  { %v1040_v5 = vpop.xlane.xlu1 %1039 }
 0x88d   :  { %v1058_v6 = vmul.f32 1.442695, %v1052_v3  ;;  %v1050_v8 = vsub.f32 %v1024_v52, %v1040_v5 }
 0x88f   :  { %4341 = vpow2.f32 %v1058_v6  ;;  %v1054_v36 = vmul.f32 1.442695, %v1050_v8 }
 0x890   :  { %v1043_v51 = vpop.xlane.xlu0 %1042 }
 0x891   :  { %4343 = vpow2.f32 %v1054_v36  ;;  %v1051_v9 = vsub.f32 %v1027_v58, %v1043_v51 }
 0x893   :  { %v1056_v13 = vmul.f32 1.442695, %v1051_v9 }
 0x894   :  { %v1049_v44 = vpop.xlane.xlu0 %1048 }
 0x895   :  { %v1053_v56 = vsub.f32 %v1035_v59, %v1049_v44 }
 0x897   :  { %v1060_v14 = vmul.f32 1.442695, %v1053_v56 }
 0x899   :  { %4345 = vpow2.f32 %v1060_v14 }
 0x89a   :  { %4347 = vpow2.f32 %v1056_v13 }
 0x89c   :  { %v4342_v15 = vpop.eup %4341 }
 0x89d   :  { %v1068_v16 = vsel %vm559_vm12, %v4342_v15, 0.0 }
 0x89e   :  { %v4344_v17 = vpop.eup %4343  ;;  %1069 = vadd.xlane.f32.xlu1 %v1068_v16 }
 0x89f   :  { %v1062_v18 = vsel %vm559_vm12, %v4344_v17, 0.0 }
 0x8a2   :  { %1063 = vadd.xlane.f32.xlu1 %v1062_v18 }
 0x8a6   :  { %v4346_v19 = vpop.eup %4345 }
 0x8a7   :  { %v1071_v23 = vsel %vm559_vm12, %v4346_v19, 0.0  ;;  %v4348_v24 = vpop.eup %4347 }
 0x8a8   :  { %1072 = vadd.xlane.f32.xlu0 %v1071_v23  ;;  %v1065_v25 = vsel %vm559_vm12, %v4348_v24, 0.0 }
 0x8ac   :  { %1066 = vadd.xlane.f32.xlu0 %v1065_v25 }
 0x8b3   :  { %1086 = vrot.lane.b32.xlu1 %v4882_v63, %s4687_s30 }
 0x8c2   :  { %1084 = vrot.lane.b32.xlu0 %v4884_v2, %s4687_s30 }
 0x8d7   :  { %1282 = vmax.xlane.f32.xlu1 %v1281_v31 }
 0x8db   :  { %1288 = vmax.xlane.f32.xlu1 %v1287_v33 }
 0x8e1   :  { %1285 = vmax.xlane.f32.xlu0 %v1284_v37 }
 0x8e5   :  { %1291 = vmax.xlane.f32.xlu0 %v1290_v38 }
 0x927   :  { %v1070_v39 = vpop.xlane.xlu1 %1069 }
 0x92b   :  { %v1064_v40 = vpop.xlane.xlu1 %1063 }
 0x92f   :  { %v1087_v41 = vpop.permute.xlu1 %1086 }
 0x930   :  { %3990 = vmatprep.subr.bf16.mxu1 %v1087_v41 }
 0x931   :  { %v1073_v42 = vpop.xlane.xlu0 %1072  ;;  %3991 = vmatpush3.bf16.msra.mxu1 %v1087_v41 }
 0x932   :  { %4349 = vrcp.f32 %v1073_v42 }
 0x933   :  { %4351 = vrcp.f32 %v1064_v40 }
 0x934   :  { %4353 = vrcp.f32 %v1070_v39 }
 0x935   :  { %v1067_v48 = vpop.xlane.xlu0 %1066 }
 0x936   :  { %4355 = vrcp.f32 %v1067_v48 }
 0x939   :  { %v1085_v49 = vpop.permute.xlu0 %1084 }
 0x93a   :  { %3992 = vmatprep.subr.bf16.mxu1 %v1085_v49 }
 0x93b   :  { %3993 = vmatpush3.bf16.msra.mxu1 %v1085_v49 }
 0x93c   :  { %3998 = vmatprep.subr.bf16.mxu1 %v4235_v26 }
 0x93f   :  { %v4350_v50 = vpop.eup %4349 }
 0x940   :  { %v4352_v52 = vpop.eup %4351  ;;  %v1081_v55 = vmul.f32 %v4350_v50, %v4346_v19 }
 0x941   :  { %v4354_v53 = vpop.eup %4353  ;;  %v1078_v57 = vmul.f32 %v4352_v52, %v4344_v17 }
 0x942   :  { %v1080_v59 = vmul.f32 %v4354_v53, %v4342_v15 }
 0x943   :  { %v4356_v54 = vpop.eup %4355 }
 0x944   :  { %v1079_v58 = vmul.f32 %v4356_v54, %v4348_v24  ;;  %v1083_v0 = vpack.c.bf16 %v1081_v55, %v1080_v59  ;;  %v4236_v59 = vld [vmem:[%s5563_s8 + $0x18] sm:$0xff]  }
 0x946   :  { %v1082_v61 = vpack.c.bf16 %v1079_v58, %v1078_v57 }
 0x948   :  { %3994 = vmatprep.mubr.msk.bf16.mxu1 %vm559_vm12, %v1082_v61  ;;  %v963_v61 = vadd.f32 %v3980_v27, %v5054_v43 }
 0x949   :  { %3995 = vmatmul.mubr.msk.bf16.vlgmr.msra.gmra.mxu1 %vm559_vm12, %v1083_v0 }
 0x94a   :  { %3999 = vmatpush3.bf16.msra.mxu1 %v4235_v26 }
 0x960   :  { %v1283_v1 = vpop.xlane.xlu1 %1282 }
 0x961   :  { %v1293_v3 = vsub.f32 %v1267_v28, %v1283_v1  ;;  %v954_v28 = vpop.f32.mrf.mxu1 }
 0x962   :  { %v955_v1 = vadd.f32 %v954_v28, %v5056_v45 }
 0x963   :  { %v1297_v8 = vmul.f32 1.442695, %v1293_v3 }
 0x964   :  { %v1289_v5 = vpop.xlane.xlu1 %1288 }
 0x965   :  { %v1295_v6 = vsub.f32 %v1275_v30, %v1289_v5  ;;  %v3981_v30 = vpop.f32.mrf.mxu1 }
 0x967   :  { %v1301_v36 = vmul.f32 1.442695, %v1295_v6  ;;  %v957_v32 = vpop.f32.mrf.mxu1  ;;  %v966_v6 = vadd.f32 %v3981_v30, %v5058_v46 }
 0x969   :  { %4357 = vpow2.f32 %v1301_v36 }
 0x96a   :  { %v1286_v51 = vpop.xlane.xlu0 %1285  ;;  %4359 = vpow2.f32 %v1297_v8 }
 0x96b   :  { %v1294_v9 = vsub.f32 %v1270_v34, %v1286_v51  ;;  %v958_v51 = vadd.f32 %v957_v32, %v5060_v47 }
 0x96d   :  { %v1299_v13 = vmul.f32 1.442695, %v1294_v9 }
 0x96e   :  { %v1292_v44 = vpop.xlane.xlu0 %1291 }
 0x96f   :  { %v1296_v56 = vsub.f32 %v1278_v35, %v1292_v44 }
 0x971   :  { %v1303_v14 = vmul.f32 1.442695, %v1296_v56 }
 0x973   :  { %4361 = vpow2.f32 %v1303_v14 }
 0x974   :  { %4363 = vpow2.f32 %v1299_v13 }
 0x976   :  { %v4358_v15 = vpop.eup %4357 }
 0x977   :  { %v1311_v16 = vsel %vm559_vm12, %v4358_v15, 0.0  ;;  %v4360_v17 = vpop.eup %4359 }
 0x978   :  { %1312 = vadd.xlane.f32.xlu1 %v1311_v16  ;;  %v1305_v18 = vsel %vm559_vm12, %v4360_v17, 0.0 }
 0x97c   :  { %1306 = vadd.xlane.f32.xlu1 %v1305_v18 }
 0x980   :  { %v4362_v19 = vpop.eup %4361 }
 0x981   :  { %v1314_v23 = vsel %vm559_vm12, %v4362_v19, 0.0  ;;  %v4364_v24 = vpop.eup %4363 }
 0x982   :  { %1315 = vadd.xlane.f32.xlu0 %v1314_v23  ;;  %v1308_v25 = vsel %vm559_vm12, %v4364_v24, 0.0 }
 0x986   :  { %1309 = vadd.xlane.f32.xlu0 %v1308_v25  ;;  %v4518_v25 = vld [vmem:[#allocation2] sm:$0xff] }
 0x98d   :  { %1329 = vrot.lane.b32.xlu1 %v4882_v63, %s4688_s5 }
 0x99c   :  { %1327 = vrot.lane.b32.xlu0 %v4884_v2, %s4688_s5 }
 0xa01   :  { %v1313_v29 = vpop.xlane.xlu1 %1312 }
 0xa05   :  { %v1307_v31 = vpop.xlane.xlu1 %1306 }
 0xa09   :  { %v3996_v33 = vpop.f32.mrf.mxu1  ;;  %v1330_v34 = vpop.permute.xlu1 %1329 }
 0xa0a   :  { %4012 = vmatprep.subr.bf16.mxu1 %v1330_v34 }
 0xa0b   :  { %v1316_v35 = vpop.xlane.xlu0 %1315  ;;  %v1130_v37 = vpop.f32.mrf.mxu1 }
 0xa0c   :  { %4365 = vrcp.f32 %v1316_v35 }
 0xa0d   :  { %v3997_v38 = vpop.f32.mrf.mxu1  ;;  %4367 = vrcp.f32 %v1307_v31  ;;  %v4519_v31 = vld [vmem:[#allocation2 + $0x18] sm:$0xff] }
 0xa0e   :  { %4369 = vrcp.f32 %v1313_v29  ;;  %v1146_v2 = vpack.c.bf16 %v3997_v38, %v3996_v33  ;;  %v4520_v33 = vld [vmem:[#allocation2 + $0x8] sm:$0xff] }
 0xa0f   :  { %v1310_v39 = vpop.xlane.xlu0 %1309  ;;  %v1133_v63 = vpop.f32.mrf.mxu1 }
 0xa10   :  { %4371 = vrcp.f32 %v1310_v39  ;;  %v1145_v40 = vpack.c.bf16 %v1133_v63, %v1130_v37 }
 0xa12   :  { %4000 = vmatprep.mubr.msk.bf16.mxu1 %vm497_vm1, %v1145_v40 }
 0xa13   :  { %v1328_v41 = vpop.permute.xlu0 %1327  ;;  %4001 = vmatmul.mubr.msk.bf16.vlgmr.msra.gmra.mxu1 %vm497_vm1, %v1146_v2 }
 0xa14   :  { %4013 = vmatpush3.bf16.msra.mxu1 %v1330_v34 }
 0xa15   :  { %4014 = vmatprep.subr.bf16.mxu1 %v1328_v41 }
 0xa18   :  { %4015 = vmatpush3.bf16.msra.mxu1 %v1328_v41  ;;  %v4239_v41 = vld [vmem:[#allocation8 + $0x34] ss:$8 sps:$4 sm:$0xff]  }
 0xa19   :  { %v4366_v42 = vpop.eup %4365  ;;  %4020 = vmatprep.subr.bf16.mxu1 %v4236_v59  ;;  %1566 = vmatprep.subr.bf16.mxu0 %v4239_v41 }
 0xa1a   :  { %v4368_v48 = vpop.eup %4367  ;;  %v1324_v52 = vmul.f32 %v4366_v42, %v4362_v19  ;;  %v4237_v42 = vld [vmem:[#allocation8 + $0x30] ss:$8 sps:$4 sm:$0xff]  }
 0xa1b   :  { %v4370_v49 = vpop.eup %4369  ;;  %v1321_v53 = vmul.f32 %v4368_v48, %v4360_v17  ;;  %1567 = vmatpush1.bf16.msra.mxu0 %v4237_v42  ;;  %v4242_v48 = vld [vmem:[#allocation8 + $0x24] ss:$8 sps:$4 sm:$0xff]  }
 0xa1c   :  { %v1323_v55 = vmul.f32 %v4370_v49, %v4358_v15  ;;  %v4240_v49 = vld [vmem:[#allocation8 + $0x20] ss:$8 sps:$4 sm:$0xff]   ;;  %1568 = vmatprep.subr.bf16.mxu0 %v4242_v48 }
 0xa1d   :  { %v4372_v50 = vpop.eup %4371 }
 0xa1e   :  { %v1322_v54 = vmul.f32 %v4372_v50, %v4364_v24  ;;  %v1326_v58 = vpack.c.bf16 %v1324_v52, %v1323_v55  ;;  %v4517_v24 = vld [vmem:[#allocation2 + $0x10] sm:$0xff] }
 0xa1f   :  { %1569 = vmatpush1.bf16.msra.mxu0 %v4240_v49  ;;  %v4245_v50 = vld [vmem:[#allocation8 + $0x14] ss:$8 sps:$4 sm:$0xff]   ;;  %v4243_v52 = vld [vmem:[#allocation8 + $0x10] ss:$8 sps:$4 sm:$0xff]  }
 0xa20   :  { %v1325_v57 = vpack.c.bf16 %v1322_v54, %v1321_v53  ;;  %1570 = vmatprep.subr.bf16.mxu0 %v4245_v50  ;;  %v4246_v53 = vld [vmem:[#allocation8] ss:$8 sps:$4 sm:$0xff]   ;;  %v4248_v54 = vld [vmem:[#allocation8 + $0x4] ss:$8 sps:$4 sm:$0xff]  }
 0xa22   :  { %4016 = vmatprep.mubr.msk.bf16.mxu1 %vm559_vm12, %v1325_v57 }
 0xa23   :  { %4017 = vmatmul.mubr.msk.bf16.vlgmr.msra.gmra.mxu1 %vm559_vm12, %v1326_v58  ;;  %1571 = vmatpush1.bf16.msra.mxu0 %v4243_v52 }
 0xa24   :  { %4021 = vmatpush3.bf16.msra.mxu1 %v4236_v59  ;;  %1572 = vmatprep.subr.bf16.mxu0 %v4248_v54 }
 0xa27   :  { %1573 = vmatpush1.bf16.msra.mxu0 %v4246_v53 }
 0xad3   :  { %v4002_v0 = vpop.f32.mrf.mxu1 }
 0xad4   :  { %v1210_v3 = vadd.f32 %v4002_v0, %v963_v61 }
 0xad5   :  { %v1193_v5 = vpop.f32.mrf.mxu1 }
 0xad6   :  { %v1208_v8 = vadd.f32 %v1193_v5, %v955_v1 }
 0xad7   :  { %v4003_v36 = vpop.f32.mrf.mxu1 }
 0xad8   :  { %v1211_v9 = vadd.f32 %v4003_v36, %v966_v6 }
 0xad9   :  { %v1196_v44 = vpop.f32.mrf.mxu1 }
 0xada   :  { %v1209_v56 = vadd.f32 %v1196_v44, %v958_v51 }
 0xae3   :  { %v4018_v13 = vpop.f32.mrf.mxu1 }
 0xae5   :  { %v1373_v14 = vpop.f32.mrf.mxu1 }
 0xae7   :  { %v4019_v15 = vpop.f32.mrf.mxu1 }
 0xae8   :  { %v1389_v43 = vpack.c.bf16 %v4019_v15, %v4018_v13 }
 0xae9   :  { %v1376_v16 = vpop.f32.mrf.mxu1 }
 0xaea   :  { %v1388_v17 = vpack.c.bf16 %v1376_v16, %v1373_v14 }
 0xaec   :  { %4022 = vmatprep.mubr.msk.bf16.mxu1 %vm497_vm1, %v1388_v17 }
 0xaed   :  { %4023 = vmatmul.mubr.msk.bf16.vlgmr.msra.gmra.mxu1 %vm497_vm1, %v1389_v43 }
 0xbad   :  { %v4024_v45 = vpop.f32.mrf.mxu1 }
 0xbae   :  { %v1453_v18 = vadd.f32 %v4024_v45, %v1210_v3 }
 0xbaf   :  { %v1436_v46 = vpop.f32.mrf.mxu1 }
 0xbb0   :  { %v1451_v19 = vadd.f32 %v1436_v46, %v1208_v8  ;;  %v5112_v47 = vadd.f32 %v4517_v24, %v1453_v18  ;;  %v4249_v24 = vld [vmem:[%s5566_s11 + $0x38] sm:$0xff]  }
 0xbb1   :  { %v4025_v23 = vpop.f32.mrf.mxu1  ;;  %4026 = vmatprep.subr.bf16.mxu1 %v4249_v24 }
 0xbb2   :  { %v5114_v26 = vadd.f32 %v4518_v25, %v1451_v19  ;;  %v1454_v27 = vadd.f32 %v4025_v23, %v1211_v9  ;;  %v1462_v37 = vmul.f32 %v5112_v47, %v5112_v47  ;;  %4027 = vmatpush3.bf16.msra.mxu1 %v4249_v24  ;;  %v4250_v25 = vld [vmem:[%s5566_s11 + $0x30] sm:$0xff]  }
 0xbb3   :  { %v1439_v28 = vpop.f32.mrf.mxu1  ;;  %4028 = vmatprep.subr.bf16.mxu1 %v4250_v25 }
 0xbb4   :  { %v1452_v29 = vadd.f32 %v1439_v28, %v1209_v56  ;;  %v1460_v30 = vmul.f32 %v5114_v26, %v5114_v26  ;;  %v5118_v32 = vadd.f32 %v4519_v31, %v1454_v27  ;;  %v1470_v39 = vsel %vm181_vm0, %v1462_v37, 0.0  ;;  %v3664_v56 = vld [vmem:[%s5564_s9] ss:$0 sm:$0xff]  ;;  %v4251_v27 = vld [vmem:[%s5566_s11 + $0x28] sm:$0xff]  }
 0xbb5   :  { %v4252_v28 = vld [vmem:[%s5566_s11 + $0x20] sm:$0xff]   ;;  %v4255_v31 = vld [vmem:[%s5566_s11 + $0x8] sm:$0xff]  }
 0xbb6   :  { %v5120_v34 = vadd.f32 %v4520_v33, %v1452_v29  ;;  %v1464_v35 = vsel %vm181_vm0, %v1460_v30, 0.0  ;;  %v1463_v40 = vmul.f32 %v5118_v32, %v5118_v32  ;;  %4029 = vmatpush3.bf16.msra.mxu1 %v4250_v25  ;;  %v4253_v29 = vld [vmem:[%s5566_s11 + $0x18] sm:$0xff]   ;;  %v4254_v30 = vld [vmem:[%s5566_s11 + $0x10] sm:$0xff]   ;;  %v4256_v33 = vld [vmem:[%s5566_s11] sm:$0xff]  }
 0xbb7   :  { %1465 = vadd.xlane.f32.xlu1 %v1464_v35  ;;  %4030 = vmatprep.subr.bf16.mxu1 %v4251_v27 }
 0xbb8   :  { %v1461_v38 = vmul.f32 %v5120_v34, %v5120_v34  ;;  %v1473_v2 = vsel %vm181_vm0, %v1463_v40, 0.0 }
 0xbba   :  { %v1467_v63 = vsel %vm181_vm0, %v1461_v38, 0.0  ;;  %4031 = vmatpush3.bf16.msra.mxu1 %v4251_v27 }
 0xbbb   :  { %1471 = vadd.xlane.f32.xlu1 %v1470_v39  ;;  %1468 = vadd.xlane.f32.xlu0 %v1467_v63 }
 0xbbc   :  { %4032 = vmatprep.subr.bf16.mxu1 %v4252_v28 }
 0xbbe   :  { %4033 = vmatpush3.bf16.msra.mxu1 %v4252_v28 }
 0xbbf   :  { %1474 = vadd.xlane.f32.xlu0 %v1473_v2  ;;  %4034 = vmatprep.subr.bf16.mxu1 %v4253_v29 }
 0xbc2   :  { %4035 = vmatpush3.bf16.msra.mxu1 %v4253_v29 }
 0xbc3   :  { %4036 = vmatprep.subr.bf16.mxu1 %v4254_v30 }
 0xbc6   :  { %4037 = vmatpush3.bf16.msra.mxu1 %v4254_v30 }
 0xbc7   :  { %4038 = vmatprep.subr.bf16.mxu1 %v4255_v31 }
 0xbca   :  { %4039 = vmatpush3.bf16.msra.mxu1 %v4255_v31 }
 0xbcb   :  { %4040 = vmatprep.subr.bf16.mxu1 %v4256_v33 }
 0xbce   :  { %4041 = vmatpush3.bf16.msra.mxu1 %v4256_v33 }
 0xc40   :  { %v1466_v55 = vpop.xlane.xlu1 %1465 }
 0xc41   :  { %v1476_v57 = vmul.f32 0.015625, %v1466_v55 }
 0xc43   :  { %v1480_v58 = vadd.f32 1e-06, %v1476_v57 }
 0xc44   :  { %v1472_v59 = vpop.xlane.xlu1 %1471  ;;  %v1469_v61 = vpop.xlane.xlu0 %1468 }
 0xc45   :  { %v1477_v0 = vmul.f32 0.015625, %v1469_v61  ;;  %4373 = vrsqrt.f32 %v1480_v58  ;;  %v1478_v1 = vmul.f32 0.015625, %v1472_v59 }
 0xc47   :  { %v1481_v3 = vadd.f32 1e-06, %v1477_v0  ;;  %v1482_v8 = vadd.f32 1e-06, %v1478_v1 }
 0xc48   :  { %v1475_v5 = vpop.xlane.xlu0 %1474 }
 0xc49   :  { %v1479_v6 = vmul.f32 0.015625, %v1475_v5  ;;  %4375 = vrsqrt.f32 %v1481_v3 }
 0xc4b   :  { %v1483_v36 = vadd.f32 1e-06, %v1479_v6 }
 0xc4d   :  { %4377 = vrsqrt.f32 %v1483_v36 }
 0xc4e   :  { %4379 = vrsqrt.f32 %v1482_v8 }
 0xc52   :  { %v4374_v51 = vpop.eup %4373 }
 0xc53   :  { %v1488_v9 = vmul.f32 %v4374_v51, %v5114_v26 }
 0xc55   :  { %v1498_v15 = vmul.f32 %v3664_v56, %v1488_v9 }
 0xc56   :  { %v4376_v44 = vpop.eup %4375 }
 0xc57   :  { %v1489_v13 = vmul.f32 %v4376_v44, %v5120_v34 }
 0xc59   :  { %v1499_v16 = vmul.f32 %v3664_v56, %v1489_v13 }
 0xc5a   :  { %v4378_v14 = vpop.eup %4377 }
 0xc5b   :  { %v4380_v17 = vpop.eup %4379  ;;  %v1502_v43 = vpack.c.bf16 %v1499_v16, %v1498_v15  ;;  %v1491_v45 = vmul.f32 %v4378_v14, %v5118_v32 }
 0xc5c   :  { %v1490_v18 = vmul.f32 %v4380_v17, %v5112_v47 }
 0xc5d   :  { %3673 = vmatmul.mubr.msk.bf16.vlgmr.msra.gmra.mxu0 %vm181_vm0, %v1502_v43  ;;  %v1501_v46 = vmul.f32 %v3664_v56, %v1491_v45 }
 0xc5e   :  { %1600 = vmatprep.mubr.bf16.mxu0 %v4684_v21  ;;  %v1500_v19 = vmul.f32 %v3664_v56, %v1490_v18 }
 0xc60   :  { %v1503_v23 = vpack.c.bf16 %v1501_v46, %v1500_v19 }
 0xc65   :  { %3674 = vmatmul.mubr.msk.bf16.gmra.mxu0 %vm181_vm0, %v1503_v23 }
 0xc66   :  { %1923 = vmatprep.mubr.bf16.mxu0 %v4684_v21 }
 0xd1d   :  { %v1592_v35 = vpop.f32.mrf.mxu0 }
 0xd1e   :  { %v1611_v37 = vsub.f32 0.0, %v1592_v35 }
 0xd1f   :  { %v1594_v38 = vpop.f32.mrf.mxu0 }
 0xd20   :  { %v1615_v39 = vmul.f32 1.442695, %v1611_v37  ;;  %v4257_v37 = vld [vmem:[%s5562_s7 + $0xa8] ss:$12 sps:$4 sm:$0xff]  }
 0xd21   :  { %v1596_v63 = vpop.f32.mrf.mxu0 }
 0xd22   :  { %4381 = vpow2.f32 %v1615_v39  ;;  %v1612_v40 = vsub.f32 0.0, %v1596_v63  ;;  %v4260_v39 = vld [vmem:[%s5562_s7 + $0x90] ss:$12 sps:$4 sm:$0xff]  }
 0xd23   :  { %v1598_v2 = vpop.f32.mrf.mxu0 }
 0xd24   :  { %v1617_v41 = vmul.f32 1.442695, %v1612_v40  ;;  %v4263_v40 = vld [vmem:[%s5562_s7 + $0x78] ss:$12 sps:$4 sm:$0xff]  }
 0xd25   :  { %v1602_v42 = vpop.f32.mrf.mxu0 }
 0xd26   :  { %4383 = vpow2.f32 %v1617_v41  ;;  %v1613_v48 = vsub.f32 0.0, %v1602_v42  ;;  %v4266_v41 = vld [vmem:[%s5562_s7 + $0x60] ss:$12 sps:$4 sm:$0xff]  }
 0xd27   :  { %v1604_v49 = vpop.f32.mrf.mxu0 }
 0xd28   :  { %v1619_v50 = vmul.f32 1.442695, %v1613_v48 }
 0xd29   :  { %v1606_v52 = vpop.f32.mrf.mxu0 }
 0xd2a   :  { %4385 = vpow2.f32 %v1619_v50  ;;  %v1614_v53 = vsub.f32 0.0, %v1606_v52 }
 0xd2b   :  { %v1608_v16 = vpop.f32.mrf.mxu0 }
 0xd2c   :  { %v1621_v54 = vmul.f32 1.442695, %v1614_v53 }
 0xd2e   :  { %4387 = vpow2.f32 %v1621_v54 }
 0xd2f   :  { %v4382_v55 = vpop.eup %4381 }
 0xd30   :  { %v1623_v57 = vadd.f32 1.0, %v4382_v55 }
 0xd32   :  { %4389 = vrcp.f32 %v1623_v57 }
 0xd33   :  { %v4384_v58 = vpop.eup %4383 }
 0xd34   :  { %v1624_v59 = vadd.f32 1.0, %v4384_v58 }
 0xd36   :  { %4391 = vrcp.f32 %v1624_v59 }
 0xd37   :  { %v4386_v61 = vpop.eup %4385 }
 0xd38   :  { %v1625_v0 = vadd.f32 1.0, %v4386_v61 }
 0xd3a   :  { %4393 = vrcp.f32 %v1625_v0 }
 0xd3b   :  { %v4388_v1 = vpop.eup %4387 }
 0xd3c   :  { %v1626_v3 = vadd.f32 1.0, %v4388_v1 }
 0xd3e   :  { %4395 = vrcp.f32 %v1626_v3 }
 0xd3f   :  { %v4390_v5 = vpop.eup %4389 }
 0xd40   :  { %v1631_v6 = vmul.f32 %v4390_v5, %v1592_v35  ;;  %v4259_v35 = vld [vmem:[%s5562_s7 + $0xac] ss:$12 sps:$4 sm:$0xff]  }
 0xd41   :  { %1899 = vmatprep.subr.bf16.mxu0 %v4259_v35 }
 0xd42   :  { %v1635_v51 = vmul.f32 %v1631_v6, %v1594_v38  ;;  %1900 = vmatpush1.bf16.msra.mxu0 %v4257_v37  ;;  %v4262_v38 = vld [vmem:[%s5562_s7 + $0x94] ss:$12 sps:$4 sm:$0xff]  }
 0xd43   :  { %v4392_v8 = vpop.eup %4391  ;;  %1901 = vmatprep.subr.bf16.mxu0 %v4262_v38  ;;  %v3684_v6 = vld [vmem:[%s5561_s6 + $0x1] ss:$0 sm:$0xff] }
 0xd44   :  { %v1632_v36 = vmul.f32 %v4392_v8, %v1596_v63  ;;  %v4265_v63 = vld [vmem:[%s5562_s7 + $0x7c] ss:$12 sps:$4 sm:$0xff]  }
 0xd46   :  { %v1636_v9 = vmul.f32 %v1632_v36, %v1598_v2  ;;  %1902 = vmatpush1.bf16.msra.mxu0 %v4260_v39  ;;  %v4268_v2 = vld [vmem:[%s5562_s7 + $0x64] ss:$12 sps:$4 sm:$0xff]  }
 0xd47   :  { %v4394_v44 = vpop.eup %4393  ;;  %1903 = vmatprep.subr.bf16.mxu0 %v4265_v63 }
 0xd48   :  { %v1639_v56 = vpack.c.bf16 %v1636_v9, %v1635_v51  ;;  %v1633_v13 = vmul.f32 %v4394_v44, %v1602_v42  ;;  %v4269_v42 = vld [vmem:[%s5562_s7 + $0xb0] ss:$12 sps:$4 sm:$0xff]  }
 0xd4a   :  { %4042 = vmatprep.mubr.bf16.mxu1 %v1639_v56  ;;  %v1637_v17 = vmul.f32 %v1633_v13, %v1604_v49  ;;  %1904 = vmatpush1.bf16.msra.mxu0 %v4263_v40  ;;  %v4270_v13 = vld [vmem:[%s5562_s7 + $0x98] ss:$12 sps:$4 sm:$0xff]  }
 0xd4b   :  { %v4396_v14 = vpop.eup %4395  ;;  %1905 = vmatprep.subr.bf16.mxu0 %v4268_v2 }
 0xd4c   :  { %v1634_v15 = vmul.f32 %v4396_v14, %v1606_v52 }
 0xd4e   :  { %v1638_v43 = vmul.f32 %v1634_v15, %v1608_v16  ;;  %1906 = vmatpush1.bf16.msra.mxu0 %v4266_v41 }
 0xd4f   :  { %4046 = vmatprep.subr.bf16.mxu0 %v4269_v42 }
 0xd50   :  { %v1640_v45 = vpack.c.bf16 %v1638_v43, %v1637_v17  ;;  %v4271_v17 = vld [vmem:[%s5562_s7 + $0x80] ss:$12 sps:$4 sm:$0xff]  }
 0xd52   :  { %4043 = vmatmul.mubr.bf16.vlgmr.msra.gmra.mxu1 %v1640_v45 }
 0xe12   :  { %v4044_v18 = vpop.f32.mrf.mxu1 }
 0xe13   :  { %v5168_v19 = vadd.f32 %v4044_v18, %v5112_v47  ;;  %v4272_v18 = vld [vmem:[%s5562_s7 + $0x68] ss:$12 sps:$4 sm:$0xff]  }
 0xe14   :  { %v1739_v46 = vpop.f32.mrf.mxu1 }
 0xe15   :  { %v5171_v23 = vadd.f32 %v1739_v46, %v5114_v26  ;;  %v1762_v47 = vmul.f32 %v5168_v19, %v5168_v19 }
 0xe16   :  { %v4045_v24 = vpop.f32.mrf.mxu1 }
 0xe17   :  { %v1760_v25 = vmul.f32 %v5171_v23, %v5171_v23  ;;  %v5176_v28 = vadd.f32 %v4045_v24, %v5118_v32  ;;  %v1770_v31 = vsel %vm181_vm0, %v1762_v47, 0.0 }
 0xe18   :  { %v1742_v27 = vpop.f32.mrf.mxu1 }
 0xe19   :  { %v5179_v29 = vadd.f32 %v1742_v27, %v5120_v34  ;;  %v1764_v30 = vsel %vm181_vm0, %v1760_v25, 0.0  ;;  %v1763_v32 = vmul.f32 %v5176_v28, %v5176_v28 }
 0xe1a   :  { %1765 = vadd.xlane.f32.xlu1 %v1764_v30 }
 0xe1b   :  { %v1761_v26 = vmul.f32 %v5179_v29, %v5179_v29  ;;  %v1773_v34 = vsel %vm181_vm0, %v1763_v32, 0.0 }
 0xe1d   :  { %v1767_v33 = vsel %vm181_vm0, %v1761_v26, 0.0 }
 0xe1e   :  { %1771 = vadd.xlane.f32.xlu1 %v1770_v31  ;;  %1768 = vadd.xlane.f32.xlu0 %v1767_v33 }
 0xe22   :  { %1774 = vadd.xlane.f32.xlu0 %v1773_v34 }
 0xea3   :  { %v1766_v48 = vpop.xlane.xlu1 %1765 }
 0xea4   :  { %v1776_v49 = vmul.f32 0.015625, %v1766_v48 }
 0xea6   :  { %v1780_v50 = vadd.f32 1e-06, %v1776_v49 }
 0xea7   :  { %v1772_v52 = vpop.xlane.xlu1 %1771  ;;  %v1769_v53 = vpop.xlane.xlu0 %1768 }
 0xea8   :  { %v1777_v54 = vmul.f32 0.015625, %v1769_v53  ;;  %4397 = vrsqrt.f32 %v1780_v50  ;;  %v1778_v55 = vmul.f32 0.015625, %v1772_v52  ;;  %v4521_v50 = vld [vmem:[#allocation5 + $0x10] sm:$0xff] }
 0xeaa   :  { %v1781_v57 = vadd.f32 1e-06, %v1777_v54  ;;  %v1782_v61 = vadd.f32 1e-06, %v1778_v55 }
 0xeab   :  { %v1775_v58 = vpop.xlane.xlu0 %1774 }
 0xeac   :  { %v1779_v59 = vmul.f32 0.015625, %v1775_v58  ;;  %4399 = vrsqrt.f32 %v1781_v57  ;;  %v4523_v58 = vld [vmem:[#allocation5] sm:$0xff] }
 0xeae   :  { %v1783_v0 = vadd.f32 1e-06, %v1779_v59 }
 0xeb0   :  { %4401 = vrsqrt.f32 %v1783_v0 }
 0xeb1   :  { %4403 = vrsqrt.f32 %v1782_v61  ;;  %v4524_v61 = vld [vmem:[#allocation5 + $0x8] sm:$0xff] }
 0xeb5   :  { %v4398_v1 = vpop.eup %4397 }
 0xeb6   :  { %v1788_v3 = vmul.f32 %v4398_v1, %v5171_v23 }
 0xeb8   :  { %v1798_v51 = vmul.f32 %v3684_v6, %v1788_v3 }
 0xeb9   :  { %v4400_v5 = vpop.eup %4399 }
 0xeba   :  { %v1789_v8 = vmul.f32 %v4400_v5, %v5179_v29 }
 0xebc   :  { %v1799_v9 = vmul.f32 %v3684_v6, %v1789_v8 }
 0xebd   :  { %v4402_v36 = vpop.eup %4401 }
 0xebe   :  { %v4404_v44 = vpop.eup %4403  ;;  %v1802_v56 = vpack.c.bf16 %v1799_v9, %v1798_v51  ;;  %v1791_v14 = vmul.f32 %v4402_v36, %v5176_v28 }
 0xebf   :  { %v1790_v15 = vmul.f32 %v4404_v44, %v5168_v19 }
 0xec0   :  { %3713 = vmatmul.mubr.msk.bf16.vlgmr.msra.gmra.mxu0 %vm181_vm0, %v1802_v56  ;;  %v1801_v16 = vmul.f32 %v3684_v6, %v1791_v14 }
 0xec1   :  { %4047 = vmatpush3.bf16.msra.mxu0 %v4269_v42  ;;  %1933 = vmatprep.mubr.bf16.mxu0 %v4684_v21  ;;  %v1800_v43 = vmul.f32 %v3684_v6, %v1790_v15 }
 0xec2   :  { %4048 = vmatprep.subr.bf16.mxu0 %v4270_v13 }
 0xec3   :  { %v1803_v45 = vpack.c.bf16 %v1801_v16, %v1800_v43 }
 0xec5   :  { %4049 = vmatpush3.bf16.msra.mxu0 %v4270_v13 }
 0xec6   :  { %4050 = vmatprep.subr.bf16.mxu0 %v4271_v17 }
 0xec8   :  { %3714 = vmatmul.mubr.msk.bf16.gmra.mxu0 %vm181_vm0, %v1803_v45 }
 0xec9   :  { %4051 = vmatpush3.bf16.msra.mxu0 %v4271_v17  ;;  %4054 = vmatprep.mubr.msk.bf16.mxu0 %vm181_vm0, %v1802_v56 }
 0xeca   :  { %4052 = vmatprep.subr.bf16.mxu0 %v4272_v18 }
 0xecd   :  { %4053 = vmatpush3.bf16.msra.mxu0 %v4272_v18 }
 0xed0   :  { %4055 = vmatmul.mubr.msk.bf16.vlgmr.msra.gmra.mxu0 %vm181_vm0, %v1803_v45 }
 0xf80   :  { %v1925_v46 = vpop.f32.mrf.mxu0 }
 0xf81   :  { %v1997_v42 = vmul.f32 %v1925_v46, %v4894_v7  ;;  %v1993_v36 = vmul.f32 %v4523_v58, %v1925_v46 }
 0xf82   :  { %v1927_v24 = vpop.f32.mrf.mxu0 }
 0xf83   :  { %v2025_v32 = vmul.f32 %v1927_v24, %v4894_v7  ;;  %v4522_v7 = vld [vmem:[#allocation5 + $0x18] sm:$0xff]  ;;  %v2021_v59 = vmul.f32 %v4523_v58, %v1927_v24 }
 0xf84   :  { %v1929_v25 = vpop.f32.mrf.mxu0 }
 0xf85   :  { %v1998_v39 = vmul.f32 %v1929_v25, %v4902_v12  ;;  %v1994_v51 = vmul.f32 %v4524_v61, %v1929_v25 }
 0xf86   :  { %v1931_v27 = vpop.f32.mrf.mxu0 }
 0xf87   :  { %v2026_v38 = vmul.f32 %v1931_v27, %v4902_v12  ;;  %v2022_v0 = vmul.f32 %v4524_v61, %v1931_v27 }
 0xf88   :  { %v1935_v30 = vpop.f32.mrf.mxu0 }
 0xf89   :  { %v1999_v12 = vmul.f32 %v1935_v30, %v4890_v4  ;;  %v1995_v15 = vmul.f32 %v4521_v50, %v1935_v30 }
 0xf8a   :  { %v1937_v47 = vpop.f32.mrf.mxu0 }
 0xf8b   :  { %v2027_v26 = vmul.f32 %v1937_v47, %v4890_v4  ;;  %v2023_v52 = vmul.f32 %v4521_v50, %v1937_v47 }
 0xf8c   :  { %v1939_v31 = vpop.f32.mrf.mxu0 }
 0xf8d   :  { %2037 = vrot.lane.b32.xlu1 %v2027_v26, %s4682_s0  ;;  %v2000_v48 = vmul.f32 %v1939_v31, %v4880_v62  ;;  %v1996_v16 = vmul.f32 %v4522_v7, %v1939_v31 }
 0xf8e   :  { %v1941_v33 = vpop.f32.mrf.mxu0 }
 0xf8f   :  { %v2028_v34 = vmul.f32 %v1941_v33, %v4880_v62  ;;  %v2024_v53 = vmul.f32 %v4522_v7, %v1941_v33 }
 0xf90   :  { %v4056_v35 = vpop.f32.mrf.mxu0 }
 0xf91   :  { %2033 = vrot.lane.b32.xlu1 %v2025_v32, %s4682_s0  ;;  %2039 = vrot.lane.b32.xlu0 %v2028_v34, %s4682_s0 }
 0xf92   :  { %v1978_v37 = vpop.f32.mrf.mxu0 }
 0xf94   :  { %v4057_v63 = vpop.f32.mrf.mxu0 }
 0xf95   :  { %v5247_v40 = vpack.c.bf16 %v4057_v63, %v4056_v35  ;;  %2035 = vrot.lane.b32.xlu1 %v2026_v38, %s4682_s0  ;;  %2007 = vrot.lane.b32.xlu0 %v1998_v39, %s4682_s0 }
 0xf96   :  { %v1981_v2 = vpop.f32.mrf.mxu0 }
 0xf97   :  { %v5251_v41 = vpack.c.bf16 %v1981_v2, %v1978_v37  ;;  %4066 = vmatprep.subr.bf16.mxu0 %v5247_v40 }
 0xf98   :  { %4067 = vmatpush3.bf16.msra.mxu0 %v5247_v40 }
 0xf99   :  { %2005 = vrot.lane.b32.xlu1 %v1997_v42, %s4682_s0  ;;  %2011 = vrot.lane.b32.xlu0 %v2000_v48, %s4682_s0 }
 0xf9a   :  { %4068 = vmatprep.subr.bf16.mxu0 %v5251_v41 }
 0xf9c   :  { %4069 = vmatpush3.bf16.msra.mxu0 %v5251_v41 }
 0xf9d   :  { %2009 = vrot.lane.b32.xlu1 %v1999_v12, %s4682_s0 }
 0xfff   :  { %v2038_v49 = vpop.permute.xlu1 %2037 }
0x1000   :  { %v2047_v55 = vadd.f32 %v2038_v49, %v2023_v52 }
0x1003   :  { %v2034_v62 = vpop.permute.xlu1 %2033  ;;  %v2040_v54 = vpop.permute.xlu0 %2039 }
0x1004   :  { %v2048_v57 = vadd.f32 %v2040_v54, %v2024_v53  ;;  %v2045_v5 = vadd.f32 %v2034_v62, %v2021_v59 }
0x1006   :  { %v5263_v1 = vpack.c.bf16 %v2048_v57, %v2047_v55 }
0x1007   :  { %v2036_v4 = vpop.permute.xlu1 %2035  ;;  %v2008_v3 = vpop.permute.xlu0 %2007 }
0x1008   :  { %v2046_v6 = vadd.f32 %v2036_v4, %v2022_v0  ;;  %2238 = vrot.lane.b32.xlu1 %v5263_v1, %s4686_s2  ;;  %4186 = vmatprep.subr.msk.bf16.mxu1 %vm497_vm1, %v5263_v1  ;;  %v2074_v8 = vsel %vm497_vm1, %v5263_v1, 0  ;;  %v2018_v56 = vadd.f32 %v2008_v3, %v1994_v51 }
0x1009   :  { %4059 = vmatpush3.bf16.xpose.msra.mxu1 %v2074_v8 }
0x100a   :  { %v5271_v9 = vpack.c.bf16 %v2046_v6, %v2045_v5 }
0x100b   :  { %v2006_v44 = vpop.permute.xlu1 %2005  ;;  %v2012_v14 = vpop.permute.xlu0 %2011 }
0x100c   :  { %v2017_v13 = vadd.f32 %v2006_v44, %v1993_v36  ;;  %2236 = vrot.lane.b32.xlu0 %v5271_v9, %s4686_s2  ;;  %4187 = vmatprep.subr.msk.bf16.mxu1 %vm497_vm1, %v5271_v9  ;;  %v2020_v45 = vadd.f32 %v2012_v14, %v1996_v16  ;;  %v2071_v46 = vsel %vm497_vm1, %v5271_v9, 0 }
0x100e   :  { %v5277_v17 = vpack.c.bf16 %v2018_v56, %v2017_v13 }
0x100f   :  { %v2010_v43 = vpop.permute.xlu1 %2009 }
0x1010   :  { %v2019_v18 = vadd.f32 %v2010_v43, %v1995_v15  ;;  %4062 = vmatprep.mubr.msk.bf16.mxu1 %vm497_vm1, %v5277_v17  ;;  %2230 = vrot.lane.b32.xlu1 %v5277_v17, %s4686_s2 }
0x1011   :  { %4061 = vmatpush3.bf16.xpose.msra.mxu1 %v2071_v46 }
0x1012   :  { %v5285_v24 = vpack.c.bf16 %v2020_v45, %v2019_v18 }
0x1014   :  { %2232 = vrot.lane.b32.xlu0 %v5285_v24, %s4686_s2 }
0x1018   :  { %4063 = vmatmul.mubr.msk.bf16.vlgmr.msra.gmra.mxu1 %vm497_vm1, %v5285_v24 }
0x107a   :  { %v2239_v25 = vpop.permute.xlu1 %2238 }
0x107b   :  { %v2250_v27 = vsel %vm497_vm1, %v2239_v25, 0  ;;  %4188 = vmatprep.subr.msk.bf16.mxu1 %vm497_vm1, %v2239_v25 }
0x107c   :  { %4075 = vmatpush3.bf16.xpose.msra.mxu1 %v2250_v27 }
0x107e   :  { %v2237_v30 = vpop.permute.xlu0 %2236 }
0x107f   :  { %4189 = vmatprep.subr.msk.bf16.mxu1 %vm497_vm1, %v2237_v30  ;;  %v2247_v26 = vsel %vm497_vm1, %v2237_v30, 0 }
0x1082   :  { %v2231_v47 = vpop.permute.xlu1 %2230 }
0x1083   :  { %4078 = vmatprep.mubr.msk.bf16.mxu1 %vm497_vm1, %v2231_v47 }
0x1084   :  { %4077 = vmatpush3.bf16.xpose.msra.mxu1 %v2247_v26 }
0x1086   :  { %v2233_v31 = vpop.permute.xlu0 %2232 }
0x108b   :  { %4079 = vmatmul.mubr.msk.bf16.vlgmr.msra.gmra.mxu1 %vm497_vm1, %v2233_v31 }
0x10d8   :  { %v4064_v33 = vpop.f32.mrf.mxu1 }
0x10d9   :  { %v2119_v32 = vadd.f32 %v4064_v33, %v4962_v11 }
0x10da   :  { %v2110_v34 = vpop.f32.mrf.mxu1 }
0x10db   :  { %v2111_v35 = vadd.f32 %v2110_v34, %v4960_v10  ;;  %v2131_v37 = vsel %vm559_vm12, %v2119_v32, -inf }
0x10dc   :  { %2132 = vmax.xlane.f32.xlu0 %v2131_v37  ;;  %v4065_v38 = vpop.f32.mrf.mxu1 }
0x10dd   :  { %v2125_v39 = vsel %vm559_vm12, %v2111_v35, -inf  ;;  %v2122_v42 = vadd.f32 %v4065_v38, %v4971_v22 }
0x10de   :  { %v2113_v63 = vpop.f32.mrf.mxu1  ;;  %2126 = vmax.xlane.f32.xlu1 %v2125_v39 }
0x10df   :  { %v2114_v2 = vadd.f32 %v2113_v63, %v4969_v20  ;;  %v2134_v12 = vsel %vm559_vm12, %v2122_v42, -inf }
0x10e1   :  { %v2128_v48 = vsel %vm559_vm12, %v2114_v2, -inf }
0x10e2   :  { %2129 = vmax.xlane.f32.xlu0 %v2128_v48 }
0x10e6   :  { %2135 = vmax.xlane.f32.xlu0 %v2134_v12 }
0x114b   :  { %v4080_v49 = vpop.f32.mrf.mxu1 }
0x114c   :  { %v2295_v53 = vadd.f32 %v4080_v49, %v4962_v11 }
0x114d   :  { %v2286_v50 = vpop.f32.mrf.mxu1 }
0x114e   :  { %v2287_v52 = vadd.f32 %v2286_v50, %v4960_v10  ;;  %v2307_v59 = vsel %vm559_vm12, %v2295_v53, -inf }
0x114f   :  { %v4081_v7 = vpop.f32.mrf.mxu1 }
0x1150   :  { %v2301_v62 = vsel %vm559_vm12, %v2287_v52, -inf  ;;  %v2298_v57 = vadd.f32 %v4081_v7, %v4971_v22 }
0x1151   :  { %v2289_v54 = vpop.f32.mrf.mxu1  ;;  %2302 = vmax.xlane.f32.xlu1 %v2301_v62 }
0x1152   :  { %v2290_v55 = vadd.f32 %v2289_v54, %v4969_v20  ;;  %v2310_v61 = vsel %vm559_vm12, %v2298_v57, -inf }
0x1154   :  { %v2304_v58 = vsel %vm559_vm12, %v2290_v55, -inf }
0x1155   :  { %2305 = vmax.xlane.f32.xlu0 %v2304_v58  ;;  %2308 = vmax.xlane.f32.xlu1 %v2307_v59 }
0x1159   :  { %2311 = vmax.xlane.f32.xlu0 %v2310_v61 }
0x1165   :  { %v2133_v0 = vpop.xlane.xlu0 %2132 }
0x1166   :  { %v2139_v4 = vsub.f32 %v2119_v32, %v2133_v0 }
0x1167   :  { %v2127_v3 = vpop.xlane.xlu1 %2126 }
0x1168   :  { %v2145_v5 = vmul.f32 1.442695, %v2139_v4  ;;  %v2137_v6 = vsub.f32 %v2111_v35, %v2127_v3 }
0x116a   :  { %4405 = vpow2.f32 %v2145_v5  ;;  %v2141_v8 = vmul.f32 1.442695, %v2137_v6 }
0x116b   :  { %v2130_v36 = vpop.xlane.xlu0 %2129 }
0x116c   :  { %4407 = vpow2.f32 %v2141_v8  ;;  %v2138_v51 = vsub.f32 %v2114_v2, %v2130_v36 }
0x116e   :  { %v2143_v13 = vmul.f32 1.442695, %v2138_v51 }
0x116f   :  { %v2136_v44 = vpop.xlane.xlu0 %2135 }
0x1170   :  { %v2140_v56 = vsub.f32 %v2122_v42, %v2136_v44 }
0x1172   :  { %v2147_v14 = vmul.f32 1.442695, %v2140_v56  ;;  %v4273_v56 = vld [vmem:[%s5563_s8 + $0x28] sm:$0xff]  }
0x1174   :  { %4409 = vpow2.f32 %v2147_v14 }
0x1175   :  { %4411 = vpow2.f32 %v2143_v13 }
0x1177   :  { %v5313_v15 = vpop.eup %4405 }
0x1178   :  { %v2155_v16 = vsel %vm559_vm12, %v5313_v15, 0.0 }
0x1179   :  { %v4408_v43 = vpop.eup %4407  ;;  %2156 = vadd.xlane.f32.xlu1 %v2155_v16 }
0x117a   :  { %v2149_v45 = vsel %vm559_vm12, %v4408_v43, 0.0 }
0x117d   :  { %2150 = vadd.xlane.f32.xlu1 %v2149_v45 }
0x1181   :  { %v4410_v18 = vpop.eup %4409 }
0x1182   :  { %v2158_v46 = vsel %vm559_vm12, %v4410_v18, 0.0  ;;  %v4412_v25 = vpop.eup %4411 }
0x1183   :  { %2159 = vadd.xlane.f32.xlu0 %v2158_v46  ;;  %v2152_v27 = vsel %vm559_vm12, %v4412_v25, 0.0 }
0x1187   :  { %2153 = vadd.xlane.f32.xlu0 %v2152_v27 }
0x11da   :  { %v2303_v30 = vpop.xlane.xlu1 %2302 }
0x11db   :  { %v2313_v47 = vsub.f32 %v2287_v52, %v2303_v30 }
0x11dd   :  { %v2317_v35 = vmul.f32 1.442695, %v2313_v47 }
0x11de   :  { %v2306_v26 = vpop.xlane.xlu0 %2305  ;;  %v2309_v31 = vpop.xlane.xlu1 %2308 }
0x11df   :  { %v2315_v33 = vsub.f32 %v2295_v53, %v2309_v31  ;;  %v2314_v32 = vsub.f32 %v2290_v55, %v2306_v26 }
0x11e1   :  { %v2321_v34 = vmul.f32 1.442695, %v2315_v33  ;;  %v2319_v39 = vmul.f32 1.442695, %v2314_v32 }
0x11e2   :  { %v2312_v37 = vpop.xlane.xlu0 %2311 }
0x11e3   :  { %v2316_v38 = vsub.f32 %v2298_v57, %v2312_v37  ;;  %4413 = vpow2.f32 %v2321_v34 }
0x11e4   :  { %4415 = vpow2.f32 %v2317_v35 }
0x11e5   :  { %v2323_v63 = vmul.f32 1.442695, %v2316_v38 }
0x11e7   :  { %4417 = vpow2.f32 %v2323_v63 }
0x11e8   :  { %4419 = vpow2.f32 %v2319_v39 }
0x11f0   :  { %v5320_v2 = vpop.eup %4413 }
0x11f1   :  { %v2331_v42 = vsel %vm559_vm12, %v5320_v2, 0.0  ;;  %v5324_v48 = vpop.eup %4415 }
0x11f2   :  { %2332 = vadd.xlane.f32.xlu1 %v2331_v42  ;;  %v2325_v52 = vsel %vm559_vm12, %v5324_v48, 0.0 }
0x11f4   :  { %v4418_v12 = vpop.eup %4417 }
0x11f5   :  { %v2334_v49 = vsel %vm559_vm12, %v4418_v12, 0.0  ;;  %v4420_v50 = vpop.eup %4419 }
0x11f6   :  { %2335 = vadd.xlane.f32.xlu0 %v2334_v49  ;;  %2326 = vadd.xlane.f32.xlu1 %v2325_v52  ;;  %v2328_v7 = vsel %vm559_vm12, %v4420_v50, 0.0 }
0x11fa   :  { %2329 = vadd.xlane.f32.xlu0 %v2328_v7 }
0x1202   :  { %v2157_v53 = vpop.xlane.xlu1 %2156 }
0x1206   :  { %v2151_v62 = vpop.xlane.xlu1 %2150 }
0x1207   :  { %2351 = vrot.lane.b32.xlu1 %v5247_v40, %s4686_s2 }
0x120b   :  { %2540 = vrot.lane.b32.xlu1 %v5263_v1, %s4687_s30 }
0x120c   :  { %v2160_v54 = vpop.xlane.xlu0 %2159 }
0x120d   :  { %4421 = vrcp.f32 %v2160_v54 }
0x120e   :  { %4423 = vrcp.f32 %v2151_v62 }
0x120f   :  { %4425 = vrcp.f32 %v2157_v53  ;;  %2538 = vrot.lane.b32.xlu1 %v5271_v9, %s4687_s30 }
0x1210   :  { %v2154_v55 = vpop.xlane.xlu0 %2153  ;;  %2349 = vrot.lane.b32.xlu0 %v5251_v41, %s4686_s2 }
0x1211   :  { %4427 = vrcp.f32 %v2154_v55 }
0x1213   :  { %2534 = vrot.lane.b32.xlu1 %v5277_v17, %s4687_s30 }
0x1214   :  { %2536 = vrot.lane.b32.xlu0 %v5285_v24, %s4687_s30 }
0x1217   :  { %2783 = vrot.lane.b32.xlu1 %v5263_v1, %s4688_s5 }
0x1218   :  { %2781 = vrot.lane.b32.xlu0 %v5271_v9, %s4688_s5  ;;  %v4274_v9 = vld [vmem:[%s5563_s8 + $0x20] sm:$0xff]  }
0x1219   :  { %4096 = vmatprep.subr.bf16.mxu1 %v4274_v9 }
0x121a   :  { %v4422_v57 = vpop.eup %4421  ;;  %4097 = vmatpush3.bf16.msra.mxu1 %v4274_v9 }
0x121b   :  { %v4424_v58 = vpop.eup %4423  ;;  %2777 = vrot.lane.b32.xlu1 %v5277_v17, %s4688_s5  ;;  %v2168_v0 = vmul.f32 %v4422_v57, %v4410_v18 }
0x121c   :  { %2779 = vrot.lane.b32.xlu0 %v5285_v24, %s4688_s5  ;;  %v4426_v59 = vpop.eup %4425  ;;  %v2165_v4 = vmul.f32 %v4424_v58, %v4408_v43 }
0x121d   :  { %v2167_v5 = vmul.f32 %v4426_v59, %v5313_v15 }
0x121e   :  { %v4428_v61 = vpop.eup %4427 }
0x121f   :  { %v2166_v3 = vmul.f32 %v4428_v61, %v4412_v25  ;;  %v2170_v1 = vpack.c.bf16 %v2168_v0, %v2167_v5 }
0x1221   :  { %v2169_v6 = vpack.c.bf16 %v2166_v3, %v2165_v4 }
0x1223   :  { %4070 = vmatprep.mubr.msk.bf16.mxu0 %vm559_vm12, %v2169_v6 }
0x1224   :  { %4071 = vmatmul.mubr.msk.bf16.vlgmr.msra.gmra.mxu0 %vm559_vm12, %v2170_v1 }
0x127b   :  { %v2333_v17 = vpop.xlane.xlu1 %2332 }
0x127f   :  { %v2336_v24 = vpop.xlane.xlu0 %2335  ;;  %v2327_v8 = vpop.xlane.xlu1 %2326 }
0x1280   :  { %4429 = vrcp.f32 %v2336_v24 }
0x1281   :  { %4431 = vrcp.f32 %v2327_v8 }
0x1282   :  { %4433 = vrcp.f32 %v2333_v17 }
0x1283   :  { %v2330_v36 = vpop.xlane.xlu0 %2329  ;;  %v2352_v51 = vpop.permute.xlu1 %2351 }
0x1284   :  { %4435 = vrcp.f32 %v2330_v36  ;;  %4082 = vmatprep.subr.bf16.mxu0 %v2352_v51 }
0x1285   :  { %4083 = vmatpush3.bf16.msra.mxu0 %v2352_v51 }
0x1287   :  { %v2350_v44 = vpop.permute.xlu0 %2349  ;;  %v2541_v30 = vpop.permute.xlu1 %2540 }
0x1288   :  { %4084 = vmatprep.subr.bf16.mxu0 %v2350_v44 }
0x1289   :  { %4085 = vmatpush3.bf16.msra.mxu0 %v2350_v44 }
0x128a   :  { %4090 = vmatprep.subr.bf16.mxu0 %v4273_v56 }
0x128b   :  { %v2539_v38 = vpop.permute.xlu1 %2538  ;;  %v2537_v52 = vpop.permute.xlu0 %2536 }
0x128c   :  { %v2549_v49 = vsel %vm497_vm1, %v2539_v38, 0 }
0x128d   :  { %v4430_v13 = vpop.eup %4429 }
0x128e   :  { %v4432_v14 = vpop.eup %4431  ;;  %v2344_v43 = vmul.f32 %v4430_v13, %v4418_v12 }
0x128f   :  { %v4434_v15 = vpop.eup %4433  ;;  %v2341_v45 = vmul.f32 %v4432_v14, %v5324_v48  ;;  %v2552_v48 = vsel %vm497_vm1, %v2541_v30, 0  ;;  %v2535_v12 = vpop.permute.xlu1 %2534 }
0x1290   :  { %v2343_v46 = vmul.f32 %v4434_v15, %v5320_v2  ;;  %v2782_v62 = vpop.permute.xlu0 %2781 }
0x1291   :  { %v4436_v16 = vpop.eup %4435  ;;  %v2792_v54 = vsel %vm497_vm1, %v2782_v62, 0 }
0x1292   :  { %v2342_v18 = vmul.f32 %v4436_v16, %v4420_v50  ;;  %v2346_v27 = vpack.c.bf16 %v2344_v43, %v2343_v46 }
0x1293   :  { %v2784_v50 = vpop.permute.xlu1 %2783 }
0x1294   :  { %v2345_v25 = vpack.c.bf16 %v2342_v18, %v2341_v45  ;;  %v2795_v7 = vsel %vm497_vm1, %v2784_v50, 0  ;;  %v2780_v55 = vpop.permute.xlu0 %2779 }
0x1296   :  { %4086 = vmatprep.mubr.msk.bf16.mxu0 %vm559_vm12, %v2345_v25 }
0x1297   :  { %4087 = vmatmul.mubr.msk.bf16.vlgmr.msra.gmra.mxu0 %vm559_vm12, %v2346_v27  ;;  %v2778_v53 = vpop.permute.xlu1 %2777 }
0x1298   :  { %4091 = vmatpush3.bf16.msra.mxu0 %v4273_v56 }
0x1299   :  { %4190 = vmatprep.subr.msk.bf16.mxu0 %vm497_vm1, %v2541_v30 }
0x12e4   :  { %v4072_v47 = vpop.f32.mrf.mxu0 }
0x12e6   :  { %v2211_v26 = vpop.f32.mrf.mxu0 }
0x12e8   :  { %v4073_v31 = vpop.f32.mrf.mxu0 }
0x12e9   :  { %v2227_v34 = vpack.c.bf16 %v4073_v31, %v4072_v47 }
0x12ea   :  { %v2214_v33 = vpop.f32.mrf.mxu0 }
0x12eb   :  { %v2226_v32 = vpack.c.bf16 %v2214_v33, %v2211_v26 }
0x12ed   :  { %4098 = vmatprep.mubr.msk.bf16.mxu1 %vm497_vm1, %v2226_v32 }
0x12ee   :  { %4099 = vmatmul.mubr.msk.bf16.vlgmr.msra.gmra.mxu1 %vm497_vm1, %v2227_v34 }
0x1357   :  { %v4088_v35 = vpop.f32.mrf.mxu0 }
0x1359   :  { %v2395_v37 = vpop.f32.mrf.mxu0 }
0x135b   :  { %v4089_v39 = vpop.f32.mrf.mxu0 }
0x135c   :  { %v2411_v42 = vpack.c.bf16 %v4089_v39, %v4088_v35 }
0x135d   :  { %v2398_v63 = vpop.f32.mrf.mxu0 }
0x135e   :  { %v2410_v2 = vpack.c.bf16 %v2398_v63, %v2395_v37 }
0x1360   :  { %4092 = vmatprep.mubr.msk.bf16.mxu0 %vm497_vm1, %v2410_v2 }
0x1361   :  { %4093 = vmatmul.mubr.msk.bf16.vlgmr.msra.gmra.mxu0 %vm497_vm1, %v2411_v42 }
0x1362   :  { %4103 = vmatpush3.bf16.xpose.msra.mxu0 %v2552_v48  ;;  %4106 = vmatprep.mubr.msk.bf16.mxu0 %vm497_vm1, %v2535_v12 }
0x1363   :  { %4191 = vmatprep.subr.msk.bf16.mxu0 %vm497_vm1, %v2539_v38 }
0x136a   :  { %4105 = vmatpush3.bf16.xpose.msra.mxu0 %v2549_v49 }
0x136b   :  { %4192 = vmatprep.subr.msk.bf16.mxu0 %vm497_vm1, %v2784_v50 }
0x1371   :  { %4107 = vmatmul.mubr.msk.bf16.vlgmr.msra.gmra.mxu0 %vm497_vm1, %v2537_v52 }
0x1372   :  { %4125 = vmatpush3.bf16.xpose.msra.mxu0 %v2795_v7  ;;  %4128 = vmatprep.mubr.msk.bf16.mxu0 %vm497_vm1, %v2778_v53 }
0x1373   :  { %4193 = vmatprep.subr.msk.bf16.mxu0 %vm497_vm1, %v2782_v62 }
0x137a   :  { %4127 = vmatpush3.bf16.xpose.msra.mxu0 %v2792_v54 }
0x1381   :  { %4129 = vmatmul.mubr.msk.bf16.vlgmr.msra.gmra.mxu0 %vm497_vm1, %v2780_v55 }
0x1382   :  { %3157 = vmatprep.mubr.bf16.mxu0 %v4684_v21 }
0x1421   :  { %v5380_v57 = vpop.f32.mrf.mxu0 }
0x1423   :  { %v5382_v58 = vpop.f32.mrf.mxu0 }
0x1425   :  { %v5384_v59 = vpop.f32.mrf.mxu0 }
0x1427   :  { %v5386_v61 = vpop.f32.mrf.mxu0 }
0x1431   :  { %v4108_v0 = vpop.f32.mrf.mxu0 }
0x1432   :  { %v2597_v4 = vadd.f32 %v4108_v0, %v4962_v11 }
0x1433   :  { %v2588_v3 = vpop.f32.mrf.mxu0 }
0x1434   :  { %v2589_v5 = vadd.f32 %v2588_v3, %v4960_v10  ;;  %v2609_v6 = vsel %vm559_vm12, %v2597_v4, -inf }
0x1435   :  { %2610 = vmax.xlane.f32.xlu0 %v2609_v6  ;;  %v4109_v1 = vpop.f32.mrf.mxu0 }
0x1436   :  { %v2603_v9 = vsel %vm559_vm12, %v2589_v5, -inf  ;;  %v2600_v8 = vadd.f32 %v4109_v1, %v4971_v22 }
0x1437   :  { %v2591_v17 = vpop.f32.mrf.mxu0  ;;  %2604 = vmax.xlane.f32.xlu1 %v2603_v9 }
0x1438   :  { %v2592_v24 = vadd.f32 %v2591_v17, %v4969_v20  ;;  %v2612_v51 = vsel %vm559_vm12, %v2600_v8, -inf }
0x143a   :  { %v2606_v36 = vsel %vm559_vm12, %v2592_v24, -inf }
0x143b   :  { %2607 = vmax.xlane.f32.xlu0 %v2606_v36 }
0x143f   :  { %2613 = vmax.xlane.f32.xlu0 %v2612_v51 }
0x1441   :  { %v4130_v37 = vpop.f32.mrf.mxu0 }
0x1442   :  { %v2840_v2 = vadd.f32 %v4130_v37, %v4962_v11 }
0x1443   :  { %v2831_v38 = vpop.f32.mrf.mxu0 }
0x1444   :  { %v2832_v39 = vadd.f32 %v2831_v38, %v4960_v10  ;;  %v2852_v12 = vsel %vm559_vm12, %v2840_v2, -inf }
0x1445   :  { %v4131_v63 = vpop.f32.mrf.mxu0 }
0x1446   :  { %v2846_v42 = vsel %vm559_vm12, %v2832_v39, -inf  ;;  %v2843_v50 = vadd.f32 %v4131_v63, %v4971_v22 }
0x1447   :  { %v2834_v48 = vpop.f32.mrf.mxu0 }
0x1448   :  { %v2835_v49 = vadd.f32 %v2834_v48, %v4969_v20  ;;  %v2855_v7 = vsel %vm559_vm12, %v2843_v50, -inf }
0x144a   :  { %v2849_v52 = vsel %vm559_vm12, %v2835_v49, -inf }
0x14be   :  { %v2611_v44 = vpop.xlane.xlu0 %2610 }
0x14bf   :  { %v2617_v56 = vsub.f32 %v2597_v4, %v2611_v44 }
0x14c0   :  { %v2605_v13 = vpop.xlane.xlu1 %2604 }
0x14c1   :  { %v2623_v14 = vmul.f32 1.442695, %v2617_v56  ;;  %v2615_v15 = vsub.f32 %v2589_v5, %v2605_v13 }
0x14c3   :  { %4437 = vpow2.f32 %v2623_v14  ;;  %v2619_v16 = vmul.f32 1.442695, %v2615_v15 }
0x14c4   :  { %v2608_v43 = vpop.xlane.xlu0 %2607 }
0x14c5   :  { %4439 = vpow2.f32 %v2619_v16  ;;  %v2616_v45 = vsub.f32 %v2592_v24, %v2608_v43 }
0x14c7   :  { %v2621_v25 = vmul.f32 1.442695, %v2616_v45 }
0x14c8   :  { %v2614_v18 = vpop.xlane.xlu0 %2613 }
0x14c9   :  { %v2618_v46 = vsub.f32 %v2600_v8, %v2614_v18 }
0x14cb   :  { %v2625_v27 = vmul.f32 1.442695, %v2618_v46 }
0x14cd   :  { %4441 = vpow2.f32 %v2625_v27 }
0x14ce   :  { %4443 = vpow2.f32 %v2621_v25 }
0x14d0   :  { %v4438_v30 = vpop.eup %4437 }
0x14d1   :  { %v2633_v47 = vsel %vm559_vm12, %v4438_v30, 0.0 }
0x14d2   :  { %v4440_v26 = vpop.eup %4439  ;;  %2634 = vadd.xlane.f32.xlu1 %v2633_v47 }
0x14d3   :  { %v2627_v31 = vsel %vm559_vm12, %v4440_v26, 0.0 }
0x14d6   :  { %2628 = vadd.xlane.f32.xlu1 %v2627_v31 }
0x14da   :  { %v4442_v33 = vpop.eup %4441 }
0x14db   :  { %v2636_v32 = vsel %vm559_vm12, %v4442_v33, 0.0  ;;  %v4444_v34 = vpop.eup %4443 }
0x14dc   :  { %2637 = vadd.xlane.f32.xlu0 %v2636_v32  ;;  %v2630_v35 = vsel %vm559_vm12, %v4444_v34, 0.0  ;;  %v4100_v32 = vpop.f32.mrf.mxu1 }
0x14e0   :  { %2631 = vadd.xlane.f32.xlu0 %v2630_v35 }
0x14e7   :  { %2651 = vrot.lane.b32.xlu1 %v5247_v40, %s4687_s30 }
0x14f6   :  { %2649 = vrot.lane.b32.xlu0 %v5251_v41, %s4687_s30 }
0x150b   :  { %2847 = vmax.xlane.f32.xlu1 %v2846_v42 }
0x150f   :  { %2853 = vmax.xlane.f32.xlu1 %v2852_v12 }
0x1515   :  { %2850 = vmax.xlane.f32.xlu0 %v2849_v52 }
0x1519   :  { %2856 = vmax.xlane.f32.xlu0 %v2855_v7 }
0x155b   :  { %v2635_v10 = vpop.xlane.xlu1 %2634 }
0x155f   :  { %v2629_v53 = vpop.xlane.xlu1 %2628 }
0x1563   :  { %v2652_v11 = vpop.permute.xlu1 %2651 }
0x1564   :  { %4110 = vmatprep.subr.bf16.mxu1 %v2652_v11 }
0x1565   :  { %v2638_v62 = vpop.xlane.xlu0 %2637  ;;  %4111 = vmatpush3.bf16.msra.mxu1 %v2652_v11 }
0x1566   :  { %4445 = vrcp.f32 %v2638_v62 }
0x1567   :  { %4447 = vrcp.f32 %v2629_v53 }
0x1568   :  { %4449 = vrcp.f32 %v2635_v10 }
0x1569   :  { %v2632_v54 = vpop.xlane.xlu0 %2631 }
0x156a   :  { %4451 = vrcp.f32 %v2632_v54 }
0x156d   :  { %v2650_v20 = vpop.permute.xlu0 %2649 }
0x156e   :  { %4112 = vmatprep.subr.bf16.mxu1 %v2650_v20 }
0x156f   :  { %4113 = vmatpush3.bf16.msra.mxu1 %v2650_v20 }
0x1573   :  { %v4446_v22 = vpop.eup %4445 }
0x1574   :  { %v4448_v55 = vpop.eup %4447  ;;  %v2646_v3 = vmul.f32 %v4446_v22, %v4442_v33  ;;  %v4275_v33 = vld [vmem:[%s5563_s8 + $0x30] sm:$0xff]  }
0x1575   :  { %v4450_v0 = vpop.eup %4449  ;;  %v2643_v5 = vmul.f32 %v4448_v55, %v4440_v26  ;;  %4118 = vmatprep.subr.bf16.mxu1 %v4275_v33 }
0x1576   :  { %v2645_v1 = vmul.f32 %v4450_v0, %v4438_v30 }
0x1577   :  { %v4452_v4 = vpop.eup %4451 }
0x1578   :  { %v2644_v6 = vmul.f32 %v4452_v4, %v4444_v34  ;;  %v2648_v17 = vpack.c.bf16 %v2646_v3, %v2645_v1  ;;  %v2519_v34 = vpop.f32.mrf.mxu1  ;;  %v4276_v4 = vld [vmem:[%s5563_s8 + $0x38] sm:$0xff]   ;;  %v2528_v3 = vadd.f32 %v4100_v32, %v5380_v57 }
0x157a   :  { %v2647_v9 = vpack.c.bf16 %v2644_v6, %v2643_v5  ;;  %v4101_v37 = vpop.f32.mrf.mxu1  ;;  %v2520_v6 = vadd.f32 %v2519_v34, %v5382_v58 }
0x157c   :  { %4114 = vmatprep.mubr.msk.bf16.mxu1 %vm559_vm12, %v2647_v9 }
0x157d   :  { %4115 = vmatmul.mubr.msk.bf16.vlgmr.msra.gmra.mxu1 %vm559_vm12, %v2648_v17  ;;  %v2531_v17 = vadd.f32 %v4101_v37, %v5384_v59  ;;  %v4279_v37 = vld [vmem:[#allocation8 + $0x74] ss:$8 sps:$4 sm:$0xff]  }
0x157e   :  { %4119 = vmatpush3.bf16.msra.mxu1 %v4275_v33  ;;  %3133 = vmatprep.subr.bf16.mxu0 %v4279_v37 }
0x1594   :  { %v2848_v24 = vpop.xlane.xlu1 %2847 }
0x1595   :  { %v2858_v8 = vsub.f32 %v2832_v39, %v2848_v24  ;;  %v2522_v39 = vpop.f32.mrf.mxu1 }
0x1597   :  { %v2862_v44 = vmul.f32 1.442695, %v2858_v8 }
0x1598   :  { %v2854_v36 = vpop.xlane.xlu1 %2853 }
0x1599   :  { %v2860_v51 = vsub.f32 %v2840_v2, %v2854_v36  ;;  %v2523_v36 = vadd.f32 %v2522_v39, %v5386_v61  ;;  %v4282_v39 = vld [vmem:[#allocation8 + $0x64] ss:$8 sps:$4 sm:$0xff]  }
0x159b   :  { %v2866_v56 = vmul.f32 1.442695, %v2860_v51 }
0x159d   :  { %4453 = vpow2.f32 %v2866_v56 }
0x159e   :  { %v2851_v13 = vpop.xlane.xlu0 %2850  ;;  %4455 = vpow2.f32 %v2862_v44 }
0x159f   :  { %v2859_v14 = vsub.f32 %v2835_v49, %v2851_v13 }
0x15a1   :  { %v2864_v43 = vmul.f32 1.442695, %v2859_v14 }
0x15a2   :  { %v2857_v15 = vpop.xlane.xlu0 %2856 }
0x15a3   :  { %v2861_v16 = vsub.f32 %v2843_v50, %v2857_v15 }
0x15a5   :  { %v2868_v45 = vmul.f32 1.442695, %v2861_v16 }
0x15a7   :  { %4457 = vpow2.f32 %v2868_v45 }
0x15a8   :  { %4459 = vpow2.f32 %v2864_v43 }
0x15aa   :  { %v4454_v18 = vpop.eup %4453 }
0x15ab   :  { %v2876_v46 = vsel %vm559_vm12, %v4454_v18, 0.0  ;;  %v4456_v25 = vpop.eup %4455 }
0x15ac   :  { %2877 = vadd.xlane.f32.xlu1 %v2876_v46  ;;  %v2870_v27 = vsel %vm559_vm12, %v4456_v25, 0.0 }
0x15b0   :  { %2871 = vadd.xlane.f32.xlu1 %v2870_v27 }
0x15b4   :  { %v4458_v30 = vpop.eup %4457 }
0x15b5   :  { %v2879_v47 = vsel %vm559_vm12, %v4458_v30, 0.0  ;;  %v4460_v26 = vpop.eup %4459 }
0x15b6   :  { %2880 = vadd.xlane.f32.xlu0 %v2879_v47  ;;  %v2873_v31 = vsel %vm559_vm12, %v4460_v26, 0.0 }
0x15ba   :  { %2874 = vadd.xlane.f32.xlu0 %v2873_v31 }
0x15c1   :  { %2894 = vrot.lane.b32.xlu1 %v5247_v40, %s4688_s5 }
0x15d0   :  { %2892 = vrot.lane.b32.xlu0 %v5251_v41, %s4688_s5 }
0x1635   :  { %v2878_v35 = vpop.xlane.xlu1 %2877 }
0x1639   :  { %v2872_v38 = vpop.xlane.xlu1 %2871 }
0x163d   :  { %v2895_v63 = vpop.permute.xlu1 %2894  ;;  %v4116_v2 = vpop.f32.mrf.mxu1 }
0x163e   :  { %4132 = vmatprep.subr.bf16.mxu1 %v2895_v63 }
0x163f   :  { %v2881_v42 = vpop.xlane.xlu0 %2880  ;;  %v2695_v48 = vpop.f32.mrf.mxu1 }
0x1640   :  { %4461 = vrcp.f32 %v2881_v42  ;;  %v4283_v42 = vld [vmem:[#allocation8 + $0x50] ss:$8 sps:$4 sm:$0xff]  }
0x1641   :  { %v4117_v12 = vpop.f32.mrf.mxu1  ;;  %4463 = vrcp.f32 %v2872_v38  ;;  %v4277_v38 = vld [vmem:[#allocation8 + $0x70] ss:$8 sps:$4 sm:$0xff]  }
0x1642   :  { %4465 = vrcp.f32 %v2878_v35  ;;  %v2711_v41 = vpack.c.bf16 %v4117_v12, %v4116_v2  ;;  %3134 = vmatpush1.bf16.msra.mxu0 %v4277_v38  ;;  %v4285_v2 = vld [vmem:[#allocation8 + $0x54] ss:$8 sps:$4 sm:$0xff]   ;;  %v4288_v12 = vld [vmem:[#allocation8 + $0x44] ss:$8 sps:$4 sm:$0xff]  }
0x1643   :  { %v2875_v49 = vpop.xlane.xlu0 %2874  ;;  %v2698_v40 = vpop.f32.mrf.mxu1  ;;  %3135 = vmatprep.subr.bf16.mxu0 %v4282_v39 }
0x1644   :  { %4467 = vrcp.f32 %v2875_v49  ;;  %v2710_v50 = vpack.c.bf16 %v2698_v40, %v2695_v48  ;;  %v4286_v48 = vld [vmem:[#allocation8 + $0x40] ss:$8 sps:$4 sm:$0xff]  }
0x1646   :  { %4120 = vmatprep.mubr.msk.bf16.mxu1 %vm497_vm1, %v2710_v50 }
0x1647   :  { %v2893_v52 = vpop.permute.xlu0 %2892  ;;  %4121 = vmatmul.mubr.msk.bf16.vlgmr.msra.gmra.mxu1 %vm497_vm1, %v2711_v41 }
0x1648   :  { %4133 = vmatpush3.bf16.msra.mxu1 %v2895_v63  ;;  %v4280_v63 = vld [vmem:[#allocation8 + $0x60] ss:$8 sps:$4 sm:$0xff]  }
0x1649   :  { %4134 = vmatprep.subr.bf16.mxu1 %v2893_v52  ;;  %3136 = vmatpush1.bf16.msra.mxu0 %v4280_v63 }
0x164a   :  { %3137 = vmatprep.subr.bf16.mxu0 %v4285_v2 }
0x164c   :  { %4135 = vmatpush3.bf16.msra.mxu1 %v2893_v52 }
0x164d   :  { %v4462_v7 = vpop.eup %4461  ;;  %4140 = vmatprep.subr.bf16.mxu1 %v4276_v4  ;;  %3138 = vmatpush1.bf16.msra.mxu0 %v4283_v42 }
0x164e   :  { %v4464_v10 = vpop.eup %4463  ;;  %v2889_v62 = vmul.f32 %v4462_v7, %v4458_v30  ;;  %3139 = vmatprep.subr.bf16.mxu0 %v4288_v12 }
0x164f   :  { %v4466_v53 = vpop.eup %4465  ;;  %v2886_v54 = vmul.f32 %v4464_v10, %v4456_v25 }
0x1650   :  { %v2888_v22 = vmul.f32 %v4466_v53, %v4454_v18 }
0x1651   :  { %v4468_v11 = vpop.eup %4467  ;;  %3140 = vmatpush1.bf16.msra.mxu0 %v4286_v48 }
0x1652   :  { %v2887_v20 = vmul.f32 %v4468_v11, %v4460_v26  ;;  %v2891_v0 = vpack.c.bf16 %v2889_v62, %v2888_v22 }
0x1654   :  { %v2890_v55 = vpack.c.bf16 %v2887_v20, %v2886_v54 }
0x1656   :  { %4136 = vmatprep.mubr.msk.bf16.mxu1 %vm559_vm12, %v2890_v55 }
0x1657   :  { %4137 = vmatmul.mubr.msk.bf16.vlgmr.msra.gmra.mxu1 %vm559_vm12, %v2891_v0 }
0x1658   :  { %4141 = vmatpush3.bf16.msra.mxu1 %v4276_v4  ;;  %v3754_v4 = vld [vmem:[%s5564_s9 + $0x1] ss:$0 sm:$0xff]  ;;  %s3603_s9 = sshll.u32 %s4691_s28, 4  ;;  %s3604_s9 = int_to_ptr.vmem [resolvable:$true] %s3603_s9 }
0x1707   :  { %v4122_v5 = vpop.f32.mrf.mxu1 }
0x1708   :  { %v2775_v1 = vadd.f32 %v4122_v5, %v2528_v3 }
0x1709   :  { %v2758_v9 = vpop.f32.mrf.mxu1 }
0x170a   :  { %v2773_v24 = vadd.f32 %v2758_v9, %v2520_v6 }
0x170b   :  { %v4123_v8 = vpop.f32.mrf.mxu1 }
0x170c   :  { %v2776_v51 = vadd.f32 %v4123_v8, %v2531_v17 }
0x170d   :  { %v2761_v44 = vpop.f32.mrf.mxu1 }
0x170e   :  { %v2774_v56 = vadd.f32 %v2761_v44, %v2523_v36 }
0x1717   :  { %v4138_v13 = vpop.f32.mrf.mxu1 }
0x1719   :  { %v2938_v14 = vpop.f32.mrf.mxu1 }
0x171b   :  { %v4139_v15 = vpop.f32.mrf.mxu1 }
0x171c   :  { %v2954_v57 = vpack.c.bf16 %v4139_v15, %v4138_v13  ;;  %v4290_v13 = vld [vmem:[%s5566_s11 + $0x70] sm:$0xff]   ;;  %v4293_v15 = vld [vmem:[%s5566_s11 + $0x58] sm:$0xff]  }
0x171d   :  { %v2941_v16 = vpop.f32.mrf.mxu1 }
0x171e   :  { %v2953_v43 = vpack.c.bf16 %v2941_v16, %v2938_v14  ;;  %v4292_v14 = vld [vmem:[%s5566_s11 + $0x60] sm:$0xff]   ;;  %v4294_v16 = vld [vmem:[%s5566_s11 + $0x50] sm:$0xff]  }
0x1720   :  { %4142 = vmatprep.mubr.msk.bf16.mxu1 %vm497_vm1, %v2953_v43  ;;  %v4295_v43 = vld [vmem:[%s5566_s11 + $0x48] sm:$0xff]  }
0x1721   :  { %4143 = vmatmul.mubr.msk.bf16.vlgmr.msra.gmra.mxu1 %vm497_vm1, %v2954_v57  ;;  %v4296_v57 = vld [vmem:[%s5566_s11 + $0x40] sm:$0xff]  }
0x17e1   :  { %v4144_v58 = vpop.f32.mrf.mxu1 }
0x17e2   :  { %v3018_v45 = vadd.f32 %v4144_v58, %v2775_v1 }
0x17e3   :  { %v3001_v59 = vpop.f32.mrf.mxu1 }
0x17e4   :  { %v3016_v18 = vadd.f32 %v3001_v59, %v2773_v24  ;;  %v5439_v61 = vadd.f32 %v3018_v45, %v5168_v19 }
0x17e5   :  { %v4145_v46 = vpop.f32.mrf.mxu1 }
0x17e6   :  { %v5442_v25 = vadd.f32 %v3016_v18, %v5171_v23  ;;  %v3019_v27 = vadd.f32 %v4145_v46, %v2776_v51  ;;  %v3028_v19 = vmul.f32 %v5439_v61, %v5439_v61 }
0x17e7   :  { %v3004_v30 = vpop.f32.mrf.mxu1 }
0x17e8   :  { %v3017_v47 = vadd.f32 %v3004_v30, %v2774_v56  ;;  %v3026_v26 = vmul.f32 %v5442_v25, %v5442_v25  ;;  %v5447_v31 = vadd.f32 %v3019_v27, %v5176_v28  ;;  %v3036_v35 = vsel %vm181_vm0, %v3028_v19, 0.0  ;;  %v4289_v56 = vld [vmem:[%s5566_s11 + $0x78] sm:$0xff]  }
0x17e9   :  { %4146 = vmatprep.subr.bf16.mxu1 %v4289_v56 }
0x17ea   :  { %v5450_v33 = vadd.f32 %v3017_v47, %v5179_v29  ;;  %v3030_v32 = vsel %vm181_vm0, %v3026_v26, 0.0  ;;  %v3029_v28 = vmul.f32 %v5447_v31, %v5447_v31  ;;  %4147 = vmatpush3.bf16.msra.mxu1 %v4289_v56 }
0x17eb   :  { %3031 = vadd.xlane.f32.xlu1 %v3030_v32  ;;  %4148 = vmatprep.subr.bf16.mxu1 %v4290_v13 }
0x17ec   :  { %v3027_v23 = vmul.f32 %v5450_v33, %v5450_v33  ;;  %v3039_v29 = vsel %vm181_vm0, %v3029_v28, 0.0 }
0x17ee   :  { %v3033_v34 = vsel %vm181_vm0, %v3027_v23, 0.0  ;;  %4149 = vmatpush3.bf16.msra.mxu1 %v4290_v13 }
0x17ef   :  { %3034 = vadd.xlane.f32.xlu0 %v3033_v34  ;;  %3037 = vadd.xlane.f32.xlu1 %v3036_v35 }
0x17f3   :  { %3040 = vadd.xlane.f32.xlu0 %v3039_v29 }
0x1874   :  { %v3032_v49 = vpop.xlane.xlu1 %3031 }
0x1875   :  { %v3042_v40 = vmul.f32 0.015625, %v3032_v49 }
0x1877   :  { %v3046_v50 = vadd.f32 1e-06, %v3042_v40 }
0x1878   :  { %v3035_v41 = vpop.xlane.xlu0 %3034  ;;  %v3038_v52 = vpop.xlane.xlu1 %3037 }
0x1879   :  { %4469 = vrsqrt.f32 %v3046_v50  ;;  %v3043_v7 = vmul.f32 0.015625, %v3035_v41  ;;  %v3044_v10 = vmul.f32 0.015625, %v3038_v52 }
0x187b   :  { %v3047_v53 = vadd.f32 1e-06, %v3043_v7  ;;  %v3048_v11 = vadd.f32 1e-06, %v3044_v10 }
0x187c   :  { %v3041_v62 = vpop.xlane.xlu0 %3040 }
0x187d   :  { %4471 = vrsqrt.f32 %v3047_v53  ;;  %v3045_v54 = vmul.f32 0.015625, %v3041_v62 }
0x187e   :  { %4473 = vrsqrt.f32 %v3048_v11 }
0x187f   :  { %v3049_v20 = vadd.f32 1e-06, %v3045_v54 }
0x1881   :  { %4475 = vrsqrt.f32 %v3049_v20 }
0x1886   :  { %v4470_v22 = vpop.eup %4469 }
0x1887   :  { %v3054_v55 = vmul.f32 %v4470_v22, %v5442_v25 }
0x1889   :  { %v3064_v6 = vmul.f32 %v3754_v4, %v3054_v55 }
0x188a   :  { %v4472_v0 = vpop.eup %4471 }
0x188b   :  { %v3055_v3 = vmul.f32 %v4472_v0, %v5450_v33  ;;  %v4474_v5 = vpop.eup %4473 }
0x188c   :  { %v3056_v8 = vmul.f32 %v4474_v5, %v5439_v61 }
0x188d   :  { %v3065_v1 = vmul.f32 %v3754_v4, %v3055_v3 }
0x188e   :  { %v4476_v9 = vpop.eup %4475  ;;  %v3066_v51 = vmul.f32 %v3754_v4, %v3056_v8 }
0x188f   :  { %v3068_v17 = vpack.c.bf16 %v3065_v1, %v3064_v6  ;;  %v3057_v24 = vmul.f32 %v4476_v9, %v5447_v31 }
0x1891   :  { %3763 = vmatmul.mubr.msk.bf16.vlgmr.msra.gmra.mxu0 %vm181_vm0, %v3068_v17  ;;  %v3067_v36 = vmul.f32 %v3754_v4, %v3057_v24 }
0x1892   :  { %3167 = vmatprep.mubr.bf16.mxu0 %v4684_v21  ;;  %v4291_v21 = vld [vmem:[%s5566_s11 + $0x68] sm:$0xff]  }
0x1893   :  { %v3069_v44 = vpack.c.bf16 %v3067_v36, %v3066_v51  ;;  %4150 = vmatprep.subr.bf16.mxu1 %v4291_v21 }
0x1894   :  { %4151 = vmatpush3.bf16.msra.mxu1 %v4291_v21  ;;  %v4300_v21 = vld [vmem:[#allocation10] sm:$0xff]  }
0x1895   :  { %4152 = vmatprep.subr.bf16.mxu1 %v4292_v14 }
0x1898   :  { %4153 = vmatpush3.bf16.msra.mxu1 %v4292_v14 }
0x1899   :  { %3764 = vmatmul.mubr.msk.bf16.gmra.mxu0 %vm181_vm0, %v3069_v44  ;;  %4154 = vmatprep.subr.bf16.mxu1 %v4293_v15 }
0x189c   :  { %4155 = vmatpush3.bf16.msra.mxu1 %v4293_v15 }
0x189d   :  { %4156 = vmatprep.subr.bf16.mxu1 %v4294_v16 }
0x18a0   :  { %4157 = vmatpush3.bf16.msra.mxu1 %v4294_v16 }
0x18a1   :  { %4158 = vmatprep.subr.bf16.mxu1 %v4295_v43 }
0x18a4   :  { %4159 = vmatpush3.bf16.msra.mxu1 %v4295_v43 }
0x18a5   :  { %4160 = vmatprep.subr.bf16.mxu1 %v4296_v57 }
0x18a8   :  { %4161 = vmatpush3.bf16.msra.mxu1 %v4296_v57 }
0x1951   :  { %v3159_v58 = vpop.f32.mrf.mxu0 }
0x1952   :  { %v3178_v45 = vsub.f32 0.0, %v3159_v58 }
0x1953   :  { %v3161_v59 = vpop.f32.mrf.mxu0 }
0x1954   :  { %v3182_v18 = vmul.f32 1.442695, %v3178_v45 }
0x1955   :  { %v3163_v46 = vpop.f32.mrf.mxu0 }
0x1956   :  { %4477 = vpow2.f32 %v3182_v18  ;;  %v3179_v27 = vsub.f32 0.0, %v3163_v46 }
0x1957   :  { %v3165_v30 = vpop.f32.mrf.mxu0 }
0x1958   :  { %v3184_v47 = vmul.f32 1.442695, %v3179_v27 }
0x1959   :  { %v3169_v26 = vpop.f32.mrf.mxu0 }
0x195a   :  { %4479 = vpow2.f32 %v3184_v47  ;;  %v3180_v32 = vsub.f32 0.0, %v3169_v26 }
0x195b   :  { %v3171_v19 = vpop.f32.mrf.mxu0 }
0x195c   :  { %v3186_v23 = vmul.f32 1.442695, %v3180_v32 }
0x195d   :  { %v3173_v34 = vpop.f32.mrf.mxu0 }
0x195e   :  { %4481 = vpow2.f32 %v3186_v23  ;;  %v3181_v35 = vsub.f32 0.0, %v3173_v34  ;;  %v3789_v23 = vld [vmem:[%s5567_s12] ss:$0 sm:$0xff] }
0x195f   :  { %v3175_v54 = vpop.f32.mrf.mxu0 }
0x1960   :  { %v3188_v28 = vmul.f32 1.442695, %v3181_v35 }
0x1962   :  { %4483 = vpow2.f32 %v3188_v28 }
0x1963   :  { %v4478_v29 = vpop.eup %4477 }
0x1964   :  { %v3190_v37 = vadd.f32 1.0, %v4478_v29 }
0x1966   :  { %4485 = vrcp.f32 %v3190_v37 }
0x1967   :  { %v4480_v38 = vpop.eup %4479 }
0x1968   :  { %v3191_v39 = vadd.f32 1.0, %v4480_v38 }
0x196a   :  { %4487 = vrcp.f32 %v3191_v39 }
0x196b   :  { %v4482_v63 = vpop.eup %4481 }
0x196c   :  { %v3192_v2 = vadd.f32 1.0, %v4482_v63 }
0x196e   :  { %4489 = vrcp.f32 %v3192_v2 }
0x196f   :  { %v4484_v42 = vpop.eup %4483 }
0x1970   :  { %v3193_v48 = vadd.f32 1.0, %v4484_v42 }
0x1972   :  { %4491 = vrcp.f32 %v3193_v48 }
0x1973   :  { %v4486_v12 = vpop.eup %4485 }
0x1974   :  { %v3198_v49 = vmul.f32 %v4486_v12, %v3159_v58 }
0x1976   :  { %v3202_v41 = vmul.f32 %v3198_v49, %v3161_v59 }
0x1977   :  { %v4488_v40 = vpop.eup %4487 }
0x1978   :  { %v3199_v50 = vmul.f32 %v4488_v40, %v3163_v46 }
0x197a   :  { %v3203_v52 = vmul.f32 %v3199_v50, %v3165_v30  ;;  %v3458_v50 = vld [vmem:[%s5558_s3] sm:$0xff] }
0x197b   :  { %v4490_v7 = vpop.eup %4489  ;;  %vm3490_vm3 = vcmp.ge.s32.totalorder %v3458_v50, 0 }
0x197c   :  { %v3206_v10 = vpack.c.bf16 %v3203_v52, %v3202_v41  ;;  %v3200_v53 = vmul.f32 %v4490_v7, %v3169_v26  ;;  %v3460_v41 = vld [vmem:[%s5558_s3 + $0x10] sm:$0xff]  ;;  %v3461_v52 = vld [vmem:[%s5558_s3 + $0x18] sm:$0xff]  ;;  %v3459_v7 = vld [vmem:[%s5558_s3 + $0x8] sm:$0xff]  ;;  %s4690_s3 = smov [#allocation11]  }
0x197d   :  { %vm3492_vm5 = vcmp.ge.s32.totalorder %v3460_v41, 0  ;;  %vm3491_vm6 = vcmp.ge.s32.totalorder %v3459_v7, 0  ;;  %vm3493_vm7 = vcmp.ge.s32.totalorder %v3461_v52, 0  ;;  %s3593_s8 = sshll.u32 %s4690_s3, 4  ;;  %s3594_s8 = int_to_ptr.vmem [resolvable:$true] %s3593_s8 }
0x197e   :  { %4162 = vmatprep.mubr.bf16.mxu1 %v3206_v10  ;;  %v3204_v20 = vmul.f32 %v3200_v53, %v3171_v19  ;;  %s4625_s23 = scalar_lea.vmem %s3594_s8, 16  ;;  %s4629_s24 = scalar_lea.vmem %s3594_s8, 32 }
0x197f   :  { %v4492_v11 = vpop.eup %4491  ;;  %p4626_p11 = scmp.ne.s32.totalorder %s3594_s8, %s4625_s23  ;;  %p4630_p12 = scmp.lt.s32.totalorder %s3594_s8, %s3594_s8 }
0x1980   :  { %v3201_v62 = vmul.f32 %v4492_v11, %v3173_v34  ;;  %p4631_p13 = scmp.lt.s32.totalorder %s4629_s24, %s4625_s23 }
0x1982   :  { %v3205_v22 = vmul.f32 %v3201_v62, %v3175_v54  ;;  %p4632_p0 = por %p4631_p13, %p4630_p12 }
0x1984   :  { %v3207_v55 = vpack.c.bf16 %v3205_v22, %v3204_v20  ;;  %p4633_p1 = pnand %p4632_p0, %p4626_p11 }
0x1986   :  { %4163 = vmatmul.mubr.bf16.vlgmr.msra.gmra.mxu1 %v3207_v55 }
0x1a46   :  { %v4164_v0 = vpop.f32.mrf.mxu1 }
0x1a47   :  { %v3324_v3 = vadd.f32 %v4164_v0, %v5439_v61 }
0x1a48   :  { %v3307_v4 = vpop.f32.mrf.mxu1 }
0x1a49   :  { %v3322_v5 = vadd.f32 %v3307_v4, %v5442_v25  ;;  %v3329_v17 = vmul.f32 %v3324_v3, %v3324_v3  ;;  %v4297_v25 = vld [vmem:[#allocation10 + $0x18] sm:$0xff]  }
0x1a4a   :  { %v4165_v6 = vpop.f32.mrf.mxu1  ;;  %4166 = vmatprep.subr.bf16.mxu0 %v4297_v25 }
0x1a4b   :  { %v3327_v1 = vmul.f32 %v3322_v5, %v3322_v5  ;;  %v3325_v24 = vadd.f32 %v4165_v6, %v5447_v31  ;;  %v3337_v56 = vsel %vm181_vm0, %v3329_v17, 0.0  ;;  %4167 = vmatpush3.bf16.msra.mxu0 %v4297_v25  ;;  %v4298_v31 = vld [vmem:[#allocation10 + $0x10] sm:$0xff]   ;;  %v4689_v25 = vmov 0.0  }
0x1a4c   :  { %v3310_v9 = vpop.f32.mrf.mxu1  ;;  %4168 = vmatprep.subr.bf16.mxu0 %v4298_v31 }
0x1a4d   :  { %v3323_v8 = vadd.f32 %v3310_v9, %v5450_v33  ;;  %v3331_v36 = vsel %vm181_vm0, %v3327_v1, 0.0  ;;  %v3330_v44 = vmul.f32 %v3325_v24, %v3325_v24  ;;  %v4299_v33 = vld [vmem:[#allocation10 + $0x8] sm:$0xff]  }
0x1a4e   :  { %3332 = vadd.xlane.f32.xlu1 %v3331_v36 }
0x1a4f   :  { %v3328_v51 = vmul.f32 %v3323_v8, %v3323_v8  ;;  %v3340_v61 = vsel %vm181_vm0, %v3330_v44, 0.0  ;;  %4169 = vmatpush3.bf16.msra.mxu0 %v4298_v31  ;;  %v3796_v31 = vsel %vm3490_vm3, 1.0, %v4689_v25 }
0x1a50   :  { %4170 = vmatprep.subr.bf16.mxu0 %v4299_v33 }
0x1a51   :  { %v3334_v13 = vsel %vm181_vm0, %v3328_v51, 0.0 }
0x1a52   :  { %3338 = vadd.xlane.f32.xlu1 %v3337_v56  ;;  %3335 = vadd.xlane.f32.xlu0 %v3334_v13 }
0x1a53   :  { %4171 = vmatpush3.bf16.msra.mxu0 %v4299_v33  ;;  %v3567_v33 = vsel %vm3550_vm4, %v3796_v31, 0.0 }
0x1a54   :  { %4172 = vmatprep.subr.bf16.mxu0 %v4300_v21 }
0x1a56   :  { %3341 = vadd.xlane.f32.xlu0 %v3340_v61 }
0x1a57   :  { %4173 = vmatpush3.bf16.msra.mxu0 %v4300_v21  ;;  %v3798_v21 = vsel %vm3492_vm5, 1.0, %v4689_v25 }
0x1ad7   :  { %v3333_v14 = vpop.xlane.xlu1 %3332 }
0x1ad8   :  { %v3343_v15 = vmul.f32 0.015625, %v3333_v14  ;;  %v3797_v14 = vsel %vm3491_vm6, 1.0, %v4689_v25 }
0x1ada   :  { %v3347_v16 = vadd.f32 1e-06, %v3343_v15  ;;  %v3570_v15 = vsel %vm3550_vm4, %v3798_v21, 0.0 }
0x1adb   :  { %v3339_v43 = vpop.xlane.xlu1 %3338  ;;  %v3336_v57 = vpop.xlane.xlu0 %3335 }
0x1adc   :  { %v3345_v58 = vmul.f32 0.015625, %v3339_v43  ;;  %v3344_v45 = vmul.f32 0.015625, %v3336_v57  ;;  %4493 = vrsqrt.f32 %v3347_v16  ;;  %v3568_v16 = vsel %vm3550_vm4, %v3797_v14, 0.0 }
0x1add   :  { %v3569_v43 = vadd.f32 %v3568_v16, %v3567_v33 }
0x1ade   :  { %v3349_v59 = vadd.f32 1e-06, %v3345_v58  ;;  %v3348_v18 = vadd.f32 1e-06, %v3344_v45 }
0x1adf   :  { %v3342_v46 = vpop.xlane.xlu0 %3341  ;;  %v3571_v57 = vadd.f32 %v3570_v15, %v3569_v43 }
0x1ae0   :  { %4495 = vrsqrt.f32 %v3349_v59  ;;  %v3346_v27 = vmul.f32 0.015625, %v3342_v46 }
0x1ae1   :  { %4497 = vrsqrt.f32 %v3348_v18 }
0x1ae2   :  { %v3350_v30 = vadd.f32 1e-06, %v3346_v27 }
0x1ae4   :  { %4499 = vrsqrt.f32 %v3350_v30 }
0x1ae9   :  { %v4494_v47 = vpop.eup %4493 }
0x1aea   :  { %v3355_v32 = vmul.f32 %v4494_v47, %v3322_v5 }
0x1aec   :  { %v3365_v29 = vmul.f32 %v3789_v23, %v3355_v32 }
0x1aed   :  { %v4496_v26 = vpop.eup %4495 }
0x1aee   :  { %v4498_v19 = vpop.eup %4497  ;;  %v3357_v35 = vmul.f32 %v4496_v26, %v3324_v3 }
0x1aef   :  { %v3356_v34 = vmul.f32 %v4498_v19, %v3323_v8 }
0x1af0   :  { %v3367_v63 = vmul.f32 %v3789_v23, %v3357_v35 }
0x1af1   :  { %v4500_v28 = vpop.eup %4499  ;;  %v3366_v37 = vmul.f32 %v3789_v23, %v3356_v34 }
0x1af2   :  { %v3358_v38 = vmul.f32 %v4500_v28, %v3325_v24 }
0x1af3   :  { %v3369_v39 = vpack.c.bf16 %v3366_v37, %v3365_v29 }
0x1af4   :  { %v3368_v2 = vmul.f32 %v3789_v23, %v3358_v38 }
0x1af5   :  { %4174 = vmatprep.mubr.msk.bf16.mxu0 %vm181_vm0, %v3369_v39 }
0x1af6   :  { %v3370_v42 = vpack.c.bf16 %v3368_v2, %v3367_v63 }
0x1af8   :  { %4175 = vmatmul.mubr.msk.bf16.vlgmr.msra.gmra.mxu0 %vm181_vm0, %v3370_v42 }
0x1bb8   :  { %v4176_v48 = vpop.f32.mrf.mxu0 }
0x1bba   :  { %v3443_v12 = vpop.f32.mrf.mxu0 }
0x1bbb   :  { %3502 = vmax.xlane.f32.xlu1 %v3443_v12 }
0x1bbc   :  { %v4177_v49 = vpop.f32.mrf.mxu0 }
0x1bbe   :  { %v3446_v40 = vpop.f32.mrf.mxu0 }
0x1bbf   :  { %3506 = vmax.xlane.f32.xlu1 %v4176_v48  ;;  %3504 = vmax.xlane.f32.xlu0 %v3446_v40 }
0x1bc3   :  { %3508 = vmax.xlane.f32.xlu0 %v4177_v49 }
0x1bd0   :  { %3463 = vperm.xlu1 %4216, %v3458_v50  }
0x1bd4   :  { %3469 = vperm.xlu1 %4216, %v3460_v41  }
0x1bd8   :  { %3472 = vperm.xlu1 %4216, %v3461_v52  }
0x1bd9   :  { %3466 = vperm.xlu0 %4215, %v3459_v7  }
0x1c44   :  { %v5521_v10 = vpop.xlane.xlu1 %3502 }
0x1c45   :  { %v3510_v53 = vsub.f32 %v3443_v12, %v5521_v10 }
0x1c47   :  { %v3514_v11 = vmul.f32 1.442695, %v3510_v53 }
0x1c48   :  { %v5524_v62 = vpop.xlane.xlu1 %3506  ;;  %v5526_v54 = vpop.xlane.xlu0 %3504 }
0x1c49   :  { %4501 = vpow2.f32 %v3514_v11  ;;  %v3512_v20 = vsub.f32 %v4176_v48, %v5524_v62  ;;  %v3511_v22 = vsub.f32 %v3446_v40, %v5526_v54 }
0x1c4b   :  { %v3518_v55 = vmul.f32 1.442695, %v3512_v20  ;;  %v3516_v4 = vmul.f32 1.442695, %v3511_v22 }
0x1c4c   :  { %v5530_v0 = vpop.xlane.xlu0 %3508  ;;  %v3464_v6 = vpop.permute.xlu1 %3463 }
0x1c4d   :  { %4503 = vpow2.f32 %v3518_v55  ;;  %v3513_v3 = vsub.f32 %v4177_v49, %v5530_v0  ;;  %vm3474_vm15 = vcmp.eq.s32.totalorder %v4952_v60, %v3464_v6 }
0x1c4e   :  { %4505 = vpow2.f32 %v3516_v4  ;;  %v3478_v24 = vsel %vm3474_vm15, %v3443_v12, 0.0 }
0x1c4f   :  { %v3520_v5 = vmul.f32 1.442695, %v3513_v3 }
0x1c50   :  { %v3470_v9 = vpop.permute.xlu1 %3469 }
0x1c51   :  { %4507 = vpow2.f32 %v3520_v5  ;;  %vm3476_vm0 = vcmp.eq.s32.totalorder %v4952_v60, %v3470_v9 }
0x1c52   :  { %v3480_v36 = vsel %vm3476_vm0, %v4176_v48, 0.0 }
0x1c54   :  { %v3467_v51 = vpop.permute.xlu0 %3466  ;;  %v3473_v56 = vpop.permute.xlu1 %3472 }
0x1c55   :  { %vm3475_vm1 = vcmp.eq.s32.totalorder %v4952_v60, %v3467_v51  ;;  %vm3477_vm2 = vcmp.eq.s32.totalorder %v4952_v60, %v3473_v56  ;;  %v3799_v60 = vsel %vm3493_vm7, 1.0, %v4689_v25 }
0x1c56   :  { %v4502_v1 = vpop.eup %4501  ;;  %v3479_v13 = vsel %vm3475_vm1, %v3446_v40, 0.0  ;;  %v3481_v61 = vsel %vm3477_vm2, %v4177_v49, 0.0  ;;  %v3572_v58 = vsel %vm3550_vm4, %v3799_v60, 0.0 }
0x1c57   :  { %3522 = vadd.xlane.f32.xlu1 %v4502_v1  ;;  %v3573_v45 = vadd.f32 %v3572_v58, %v3571_v57 }
0x1c5a   :  { %v4504_v17 = vpop.eup %4503 }
0x1c5b   :  { %3482 = vadd.xlane.f32.xlu1 %v3478_v24  ;;  %3526 = vadd.xlane.f32.xlu0 %v4504_v17  ;;  %v4506_v8 = vpop.eup %4505 }
0x1c5e   :  { %v4508_v44 = vpop.eup %4507 }
0x1c5f   :  { %3486 = vadd.xlane.f32.xlu1 %v3480_v36  ;;  %3524 = vadd.xlane.f32.xlu0 %v4506_v8 }
0x1c63   :  { %3528 = vadd.xlane.f32.xlu0 %v4508_v44 }
0x1c67   :  { %3484 = vadd.xlane.f32.xlu0 %v3479_v13 }
0x1c6b   :  { %3488 = vadd.xlane.f32.xlu0 %v3481_v61 }
0x1c6f   :  { %3574 = vadd.xlane.f32.xlu0 %v3573_v45 }
0x1ce0   :  { %v3523_v59 = vpop.xlane.xlu1 %3522 }
0x1ce1   :  { %4509 = vlog2.f32 %v3523_v59 }
0x1ce4   :  { %v3527_v18 = vpop.xlane.xlu0 %3526  ;;  %v3483_v32 = vpop.xlane.xlu1 %3482 }
0x1ce5   :  { %4511 = vlog2.f32 %v3527_v18 }
0x1ce8   :  { %v3525_v46 = vpop.xlane.xlu0 %3524  ;;  %v3487_v37 = vpop.xlane.xlu1 %3486 }
0x1ce9   :  { %4513 = vlog2.f32 %v3525_v46 }
0x1cec   :  { %v3529_v27 = vpop.xlane.xlu0 %3528 }
0x1ced   :  { %4515 = vlog2.f32 %v3529_v27 }
0x1cee   :  { %v4510_v30 = vpop.eup %4509 }
0x1cef   :  { %v3531_v47 = vmul.f32 0.6931472, %v4510_v30 }
0x1cf0   :  { %v3485_v38 = vpop.xlane.xlu0 %3484 }
0x1cf1   :  { %v3538_v19 = vadd.f32 %v3531_v47, %v5521_v10 }
0x1cf2   :  { %v4512_v26 = vpop.eup %4511 }
0x1cf3   :  { %v3535_v23 = vmul.f32 0.6931472, %v4512_v26  ;;  %v3542_v28 = vsub.f32 %v3538_v19, %v3483_v32 }
0x1cf4   :  { %v3489_v41 = vpop.xlane.xlu0 %3488 }
0x1cf5   :  { %v3540_v34 = vadd.f32 %v3535_v23, %v5524_v62  ;;  %v3546_v42 = vmul.f32 %v3796_v31, %v3542_v28 }
0x1cf6   :  { %v4514_v35 = vpop.eup %4513 }
0x1cf7   :  { %v3533_v29 = vmul.f32 0.6931472, %v4514_v35  ;;  %v3544_v39 = vsub.f32 %v3540_v34, %v3487_v37  ;;  %v3551_v52 = vsel %vm3550_vm4, %v3546_v42, 0.0 }
0x1cf8   :  { %v3575_v55 = vpop.xlane.xlu0 %3574 }
0x1cf9   :  { %v3539_v63 = vadd.f32 %v3533_v29, %v5526_v54  ;;  %v3548_v49 = vmul.f32 %v3798_v21, %v3544_v39  ;;  %v3576_v4 = vrot.slane %v3575_v55, 4 }
0x1cfa   :  { %v4516_v2 = vpop.eup %4515 }
0x1cfb   :  { %v3537_v48 = vmul.f32 0.6931472, %v4516_v2  ;;  %v3543_v12 = vsub.f32 %v3539_v63, %v3485_v38  ;;  %v3554_v11 = vsel %vm3550_vm4, %v3548_v49, 0.0  ;;  %v3577_v3 = vadd.f32 %v3576_v4, %v3575_v55 }
0x1cfd   :  { %v3547_v40 = vmul.f32 %v3797_v14, %v3543_v12  ;;  %v3541_v50 = vadd.f32 %v3537_v48, %v5530_v0  ;;  %v3578_v5 = vrot.slane %v3577_v3, 2 }
0x1cff   :  { %v3552_v7 = vsel %vm3550_vm4, %v3547_v40, 0.0  ;;  %v3545_v10 = vsub.f32 %v3541_v50, %v3489_v41  ;;  %v3579_v9 = vadd.f32 %v3578_v5, %v3577_v3 }
0x1d00   :  { %v3553_v53 = vadd.f32 %v3552_v7, %v3551_v52 }
0x1d01   :  { %v3549_v62 = vmul.f32 %v3799_v60, %v3545_v10  ;;  %v3580_v8 = vrot.slane %v3579_v9, 1 }
0x1d02   :  { %v3555_v20 = vadd.f32 %v3554_v11, %v3553_v53 }
0x1d03   :  { %v3556_v54 = vsel %vm3550_vm4, %v3549_v62, 0.0  ;;  %v3581_v44 = vadd.f32 %v3580_v8, %v3579_v9 }
0x1d04   :  { %v3557_v22 = vadd.f32 %v3556_v54, %v3555_v20 }
0x1d06   :  { %3558 = vadd.xlane.f32.xlu1 %v3557_v22 }
0x1d8f   :  { %v3559_v0 = vpop.xlane.xlu1 %3558 }
0x1d90   :  { %v3560_v6 = vrot.slane %v3559_v0, 4 }
0x1d92   :  { %v3561_v1 = vadd.f32 %v3560_v6, %v3559_v0 }
0x1d94   :  { %v3562_v17 = vrot.slane %v3561_v1, 2 }
0x1d96   :  { %v3563_v24 = vadd.f32 %v3562_v17, %v3561_v1 }
0x1d98   :  { %v3564_v36 = vrot.slane %v3563_v24, 1 }
0x1d9a   :  { %v3565_v51 = vadd.f32 %v3564_v36, %v3563_v24 }
0x1d9c   :  { %4194 = vpush %v3565_v51 }
0x1d9d   :  { %4196 = vpush %v3581_v44 }
0x1dcd   :  { %s4195_s29 = spop %4194 }
0x1dce   :  { %v3583_v56 = vstv %s4195_s29  ;;  %s4197_s13 = spop %4196 }
0x1dcf   :  { %3584 = vst [vmem:[#allocation11] sm:$0x1] %v3583_v56  ;;  %v3585_v13 = vstv %s4197_s13 }
0x1dd0   :  { %3586 = vst [vmem:[#allocation12] sm:$0x1] %v3585_v13 }
0x1dd1   :  { %4636 = shalt.err (!%p4633_p1)
}
0x1dd2   :  { %3596 = dma.vmem_to_hbm [thread:$0]  %s3594_s8, 16, %s5569_s14, [#allocation4]  }
0x1dd3   :  { %s4645_s18 = scalar_lea.vmem %s3604_s9, 16  ;;  %s4649_s4 = scalar_lea.vmem %s3604_s9, 32 }
0x1dd4   :  { %p4646_p2 = scmp.ne.s32.totalorder %s3604_s9, %s4645_s18  ;;  %p4650_p3 = scmp.lt.s32.totalorder %s3604_s9, %s3604_s9 }
0x1dd5   :  { %p4651_p4 = scmp.lt.s32.totalorder %s4649_s4, %s4645_s18 }
0x1dd7   :  { %p4652_p5 = por %p4651_p4, %p4650_p3 }
0x1dd9   :  { %p4653_p6 = pnand %p4652_p5, %p4646_p2 }
0x1ddb   :  { %4656 = shalt.err (!%p4653_p6)
}
0x1ddc   :  { %3606 = dma.vmem_to_hbm [thread:$0]  %s3604_s9, 16, %s5570_s15, [#allocation13]  }
0x1ddd   :  { %4671 = dma.done.wait [#allocation4], 16  }
0x1dde   :  { %4672 = vsyncadd [#allocation4], 4294967280 }
0x1ddf   :  { %4673 = dma.done.wait [#allocation13], 16  }
0x1de0   :  { %4674 = vsyncadd [#allocation13], 4294967280 }
0x1de1   :  { %3613 = vsyncpa [#allocation3], 1 }
0x1de2   :  { %3614 = vsyncpa [#allocation6], 1 }
0x1de3   :  { %3615 = vsyncpa [#allocation9], 1 }
0x1de4   :  { %3616 = vsyncpa [#allocation4], 1 }
0x1de5   :  { %3617 = vsyncpa [#allocation13], 1 }

</bundles_post_ra>
